<compile_context>
chip_gen: v5e
topology: v5e:2x2
jax: 0.10.0
libtpu: 0.0.40
codegen_flags: <defaults>
</compile_context>

<pallas_src>
import jax
import jax.numpy as jnp
from jax.experimental import pallas as pl
from jax.experimental.pallas import tpu as pltpu


# ----------------------------- configuration --------------------------------
TOKENS = ["A", "C", "G", "U", "N", "X"]          # stand-in token vocab
TISSUES = ["brain", "liver", "heart", "kidney"]  # stand-in tissue list

B = 16                # batch (demo)
S_IN = 48             # raw (unpadded) rna sequence length
MAX_SEQ = 64          # config.max_seq_length
C = 32                # config.dim_embedding_token == dim_embedding_tissue
N_LAYERS = 2          # config.num_layers (kept small so lengths stay positive)
HIDDEN = 16           # hidden width of the (assumed) 2-layer Predictor head
EMB_MAX_NORM = 1.0    # config.embedding_max_norm
NR_TOKENS = len(TOKENS) + 2
N_TISSUES = len(TISSUES)
EPS = 1e-5            # nn.LayerNorm default eps

G = 4                 # samples lane-packed per group (G*C = 128 lanes)
NG = 2                # lane-groups per grid step (Bt = G*NG samples / step)
GC = G * C
GH = G * HIDDEN

# seq_only=False, single_tissue=True, frequency_features=False, pretrain=False
# dropout is inference-mode -> identity.


def _layer_lengths(max_seq: int, n_layers: int):
    """Static length bookkeeping: conv_in, then N x (conv k=5, pool k=2)."""
    conv_lens = []
    l = max_seq - 4                   # conv_in
    for _ in range(n_layers):
        lc = l - 4                    # conv k=5
        conv_lens.append(lc)
        l = lc // 2                   # maxpool k=2 (floor)
    return conv_lens, l


CONV_LENS, L_FINAL = _layer_lengths(MAX_SEQ, N_LAYERS)   # [56, 24], 12
POOL_LENS = [lc // 2 for lc in CONV_LENS]                # [28, 12]
LP_MAX = max(POOL_LENS)
LCM1_MAX = max(lc - 1 for lc in CONV_LENS)


# ------------------------------- kernel -------------------------------------
def ptrnet_kernel(sl_ref,                       # (NG, 1, GC) int32 lane seq_len
                  x_ref,                        # (NG, MAX_SEQ, GC) packed seqs
                  w_in_ref, b_in_ref,           # (GC, 5GC), (1, GC) conv_in
                  ln_a_ref,                     # (GC, GC) segment-mean matrix
                  gam_ref, bet_ref,             # (N, GC), (N, GC) LayerNorms
                  cw_ref, cb_ref,               # (N, GC, 5GC), (N, GC) convs
                  pool_ref,                     # (N, LP_MAX, LCM1_MAX) 0/1
                  w1_ref, b1_ref,               # (GC, Lf*GH), (1, GH) head l1
                  w2_ref, b2_ref,               # (GH, G), (1, 1)      head l2
                  out_ref):                     # (NG, G)
    a_mat = ln_a_ref[...]                       # block-diag (1/C) averaging

    def conv5(xin, w_fused, bias):
        """Fused 5-tap Conv1d: one (L, GC)@(GC, 5*GC) matmul + shifted adds."""
        l_out = xin.shape[0] - 4
        y = jnp.dot(xin, w_fused, preferred_element_type=jnp.float32)
        acc = y[0:l_out, 0:GC]
        for k in range(1, 5):
            acc = acc + y[k:k + l_out, k * GC:(k + 1) * GC]
        return acc + bias

    for gi in range(NG):                        # NG lane-packed groups / step
        x = x_ref[gi]                           # (MAX_SEQ, GC) f32
        # mask = arange(L) < seq_len  (per 32-lane sample segment)
        pos = jax.lax.broadcasted_iota(jnp.int32, (x.shape[0], 1), 0)
        x = x * (pos < sl_ref[gi]).astype(x.dtype)

        # conv_in
        x = conv5(x, w_in_ref[...], b_in_ref[...])

        for bi in range(N_LAYERS):
            # LayerNorm over channels within each 32-lane segment; reduction
            # done as a block-diag averaging matmul (keeps work on the MXU).
            mu = jnp.dot(x, a_mat, preferred_element_type=jnp.float32)
            xc = x - mu
            var = jnp.dot(xc * xc, a_mat, preferred_element_type=jnp.float32)
            x = xc * jax.lax.rsqrt(var + EPS)
            x = x * gam_ref[bi:bi + 1, :] + bet_ref[bi:bi + 1, :]
            # ReLU
            x = jnp.maximum(x, 0.0)
            # Conv1d k=5  (fused taps, block-diag over the G packed samples)
            y = conv5(x, cw_ref[bi], cb_ref[bi:bi + 1, :])
            # Dropout -> identity (inference)
            # MaxPool1d(k=2): pairwise max of adjacent rows, then one
            # precomputed even-row selection matmul.
            lc = CONV_LENS[bi]
            lp = POOL_LENS[bi]
            ym = jnp.maximum(y[0:lc - 1, :], y[1:lc, :])
            p_even = pool_ref[bi, 0:lp, 0:lc - 1]
            x = jnp.dot(p_even, ym, preferred_element_type=jnp.float32)

        # Head: PyTorch flatten order (c*L+l) is folded into the W1cat layout;
        # one wide matmul, then gather the diagonal (row l, column-block l)
        # partial sums.
        yh = jnp.dot(x, w1_ref[...], preferred_element_type=jnp.float32)
        h = b1_ref[...]                          # (1, G*HIDDEN)
        for l in range(L_FINAL):
            h = h + yh[l:l + 1, l * GH:(l + 1) * GH]
        h = jnp.maximum(h, 0.0)                  # ReLU between head layers
        o = jnp.dot(h, w2_ref[...], preferred_element_type=jnp.float32)
        o = o + b2_ref[...]
        # TODO(synk): Predictor class is not provided upstream; assumed a
        # 2-layer MLP (Linear-ReLU-Linear) followed by sigmoid ("probs").
        out_ref[gi:gi + 1, :] = jax.nn.sigmoid(o)   # (1, G) row per group


# ------------------------------ wrapper --------------------------------------
@jax.jit
def ptrnet_forward(rna_data, tissue_id, seq_lengths, codon_freqs,
                   packed_params):
    del codon_freqs  # frequency_features=False for this config
    (seq_table, tissue_table, w_in_f, b_in_t, ln_a, gam_t, bet_t,
     cw_f, cb_t, pool_all, w1_cat, b1_t, w2_bd, b2) = packed_params

    bsz, s_in, _ = rna_data.shape
    # F.pad(rna_data, (0, 0, 0, max_seq - L)) -> pad along the length axis.
    rna_pad = jnp.pad(rna_data, ((0, 0), (0, MAX_SEQ - s_in), (0, 0)))
    # Token embedding (padding_idx=0 row is zero) and sum over the 4 features.
    x = jnp.sum(seq_table[rna_pad], axis=2)              # (B, MAX_SEQ, C)
    # single_tissue: add tissue embedding, broadcast over length.
    x = x + tissue_table[tissue_id][:, None, :]
    x = x.astype(jnp.float32)

    # ---- batch-block + lane-pack: G samples share the 128-lane axis --------
    step = G * NG
    b_pad = pl.cdiv(bsz, step) * step
    x = jnp.pad(x, ((0, b_pad - bsz), (0, 0), (0, 0)))
    sl = jnp.pad(seq_lengths.astype(jnp.int32), (0, b_pad - bsz))
    n_grp = b_pad // G
    n_steps = n_grp // NG
    x_packed = x.reshape(n_grp, G, MAX_SEQ, C).transpose(0, 2, 1, 3)
    x_packed = x_packed.reshape(n_grp, MAX_SEQ, GC)
    sl_lanes = jnp.repeat(sl.reshape(n_grp, G), C, axis=1)
    sl_lanes = sl_lanes.reshape(n_grp, 1, GC)

    grid_spec = pltpu.PrefetchScalarGridSpec(
        num_scalar_prefetch=0,
        grid=(n_steps,),
        in_specs=[
            pl.BlockSpec((NG, 1, GC), lambda s: (s, 0, 0)),          # seq_len
            pl.BlockSpec((NG, MAX_SEQ, GC), lambda s: (s, 0, 0)),    # x packed
            pl.BlockSpec((GC, 5 * GC), lambda s: (0, 0)),            # w_in
            pl.BlockSpec((1, GC), lambda s: (0, 0)),                 # b_in
            pl.BlockSpec((GC, GC), lambda s: (0, 0)),                # ln A
            pl.BlockSpec((N_LAYERS, GC), lambda s: (0, 0)),          # gamma
            pl.BlockSpec((N_LAYERS, GC), lambda s: (0, 0)),          # beta
            pl.BlockSpec((N_LAYERS, GC, 5 * GC), lambda s: (0, 0, 0)),
            pl.BlockSpec((N_LAYERS, GC), lambda s: (0, 0)),          # conv b
            pl.BlockSpec((N_LAYERS, LP_MAX, LCM1_MAX), lambda s: (0, 0, 0)),
            pl.BlockSpec((GC, L_FINAL * GH), lambda s: (0, 0)),      # w1
            pl.BlockSpec((1, GH), lambda s: (0, 0)),                 # b1
            pl.BlockSpec((GH, G), lambda s: (0, 0)),                 # w2
            pl.BlockSpec((1, 1), lambda s: (0, 0)),                  # b2
        ],
        out_specs=pl.BlockSpec((None, NG, G), lambda s: (s, 0, 0)),
    )

    out = pl.pallas_call(
        ptrnet_kernel,
        out_shape=jax.ShapeDtypeStruct((n_steps, NG, G), jnp.float32),
        grid_spec=grid_spec,
        compiler_params=pltpu.CompilerParams(
            dimension_semantics=("parallel",)),   # v7x: batch across 2 TCs
    )(sl_lanes, x_packed, w_in_f, b_in_t, ln_a, gam_t, bet_t,
      cw_f, cb_t, pool_all, w1_cat, b1_t, w2_bd, b2)

    return out.reshape(b_pad, 1)[:bsz]            # (batch, 1)


# --------------------------- weight pre-packing ------------------------------
def _pool_matrices():
    """0/1 even-row selection matrices, padded to a common (LP, LC-1) shape."""
    mats = []
    for lc, lp in zip(CONV_LENS, POOL_LENS):
        r = jnp.arange(LP_MAX)[:, None]
        c = jnp.arange(LCM1_MAX)[None, :]
        m = ((c == 2 * r) & (r < lp) & (c < lc - 1)).astype(jnp.float32)
        mats.append(m)
    return jnp.stack(mats)                        # (N_LAYERS, LP_MAX, LCM1_MAX)


def pack_params(params):
    """Build lane-packed (block-diagonal, tap-fused) kernel weights."""
    (seq_table, tissue_table, w_in, b_in, gammas, betas,
     conv_ws, conv_bs, w1, b1, w2, b2) = params
    eye = jnp.eye(G, dtype=jnp.float32)

    def pack_conv(w):  # (5, C, C) -> (GC, 5*GC): block-diag per tap, taps concat
        bd = jax.vmap(lambda wk: jnp.kron(eye, wk))(w)        # (5, GC, GC)
        return jnp.transpose(bd, (1, 0, 2)).reshape(GC, 5 * GC)

    w_in_f = pack_conv(w_in)
    cw_f = jnp.stack([pack_conv(conv_ws[i]) for i in range(N_LAYERS)])
    ln_a = jnp.kron(eye, jnp.full((C, C), 1.0 / C, jnp.float32))
    w1_bd = jax.vmap(lambda wl: jnp.kron(eye, wl))(w1)        # (Lf, GC, GH)
    w1_cat = jnp.transpose(w1_bd, (1, 0, 2)).reshape(GC, L_FINAL * GH)
    w2_bd = jnp.kron(eye, w2)                                 # (GH, G)
    return (seq_table, tissue_table,
            w_in_f, jnp.tile(b_in, (1, G)), ln_a,
            jnp.tile(gammas, (1, G)), jnp.tile(betas, (1, G)),
            cw_f, jnp.tile(conv_bs, (1, G)), _pool_matrices(),
            w1_cat, jnp.tile(b1, (1, G)), w2_bd, b2)


# --------------------------- pure-JAX reference ------------------------------
def _reference_single(x, seq_len, params):
    (_, _, w_in, b_in, gammas, betas, conv_ws, conv_bs, w1, b1, w2, b2) = params
    l_max = x.shape[0]
    x = x * (jnp.arange(l_max)[:, None] < seq_len).astype(x.dtype)

    def conv5(xin, w, b):
        l_out = xin.shape[0] - 4
        return b + sum(xin[k:k + l_out] @ w[k] for k in range(5))

    x = conv5(x, w_in, b_in[0])
    for bi in range(N_LAYERS):
        mu = x.mean(-1, keepdims=True)
        var = ((x - mu) ** 2).mean(-1, keepdims=True)
        x = (x - mu) / jnp.sqrt(var + EPS) * gammas[bi] + betas[bi]
        x = jnp.maximum(x, 0.0)
        y = conv5(x, conv_ws[bi], conv_bs[bi])
        l_p = y.shape[0] // 2
        x = y[:2 * l_p].reshape(l_p, 2, -1).max(axis=1)
    h = b1[0] + jnp.einsum("lc,lch->h", x, w1)
    h = jnp.maximum(h, 0.0)
    return jax.nn.sigmoid(h @ w2[:, 0] + b2[0, 0])


# ------------------------------ param init -----------------------------------
def init_params(key):
    ks = jax.random.split(key, 12)

    def nrm(k, shape, scale=0.1):
        return (jax.random.normal(k, shape) * scale).astype(jnp.float32)

    def renorm(t, max_norm):  # emulate Embedding(max_norm=...) at init time
        n = jnp.linalg.norm(t, axis=-1, keepdims=True)
        return t * jnp.minimum(1.0, max_norm / jnp.maximum(n, 1e-12))

    seq_table = renorm(nrm(ks[0], (NR_TOKENS, C), 0.5), EMB_MAX_NORM)
    seq_table = seq_table.at[0].set(0.0)          # padding_idx=0
    tissue_table = renorm(nrm(ks[1], (N_TISSUES, C), 0.5), EMB_MAX_NORM)

    w_in = nrm(ks[2], (5, C, C))                  # per-tap (C_in, C_out)
    b_in = nrm(ks[3], (1, C))
    gammas = 1.0 + nrm(ks[4], (N_LAYERS, C))
    betas = nrm(ks[5], (N_LAYERS, C))
    conv_ws = nrm(ks[6], (N_LAYERS, 5, C, C))
    conv_bs = nrm(ks[7], (N_LAYERS, C))
    w1 = nrm(ks[8], (L_FINAL, C, HIDDEN))         # torch W1[h, c*L+l] -> [l,c,h]
    b1 = nrm(ks[9], (1, HIDDEN))
    w2 = nrm(ks[10], (HIDDEN, 1))
    b2 = nrm(ks[11], (1, 1))
    return (seq_table, tissue_table, w_in, b_in, gammas, betas,
            conv_ws, conv_bs, w1, b1, w2, b2)


# --------------------------------- main ---------------------------------------
if __name__ == "__main__":
    key = jax.random.PRNGKey(0)
    k_par, k_rna, k_tis, k_len = jax.random.split(key, 4)

    params = init_params(k_par)
    packed = pack_params(params)

    rna_data = jax.random.randint(k_rna, (B, S_IN, 4), 1, NR_TOKENS,
                                  dtype=jnp.int32)
    tissue_id = jax.random.randint(k_tis, (B,), 0, N_TISSUES, dtype=jnp.int32)
    seq_lengths = jax.random.randint(k_len, (B,), 24, S_IN + 1,
                                     dtype=jnp.int32)
    codon_freqs = jnp.zeros((B, 10), dtype=jnp.float32)

    probs = ptrnet_forward(rna_data, tissue_id, seq_lengths, codon_freqs,
                           packed)
    probs = jax.block_until_ready(probs)
    assert probs.shape == (B, 1)

    # Cross-check kernel math against a pure-JAX reference (raw weights).
    seq_table, tissue_table = params[0], params[1]
    rna_pad = jnp.pad(rna_data, ((0, 0), (0, MAX_SEQ - S_IN), (0, 0)))
    x_emb = jnp.sum(seq_table[rna_pad], axis=2) + \
        tissue_table[tissue_id][:, None, :]
    ref = jax.vmap(lambda xe, sl: _reference_single(xe, sl, params))(
        x_emb.astype(jnp.float32), seq_lengths)
    assert jnp.allclose(probs[:, 0], ref, rtol=1e-4, atol=1e-4), (probs[:, 0],
                                                                  ref)

    print("KERNEL_OK")
</pallas_src>

<mosaic_0001>
module attributes {stable_mosaic.version = 11 : i64} {
  func.func @ptrnet_kernel(%arg0: i32, %arg1: memref<2x1x128xi32, #tpu.memory_space<vmem>>, %arg2: memref<2x64x128xf32, #tpu.memory_space<vmem>>, %arg3: memref<128x640xf32, #tpu.memory_space<vmem>>, %arg4: memref<1x128xf32, #tpu.memory_space<vmem>>, %arg5: memref<128x128xf32, #tpu.memory_space<vmem>>, %arg6: memref<2x128xf32, #tpu.memory_space<vmem>>, %arg7: memref<2x128xf32, #tpu.memory_space<vmem>>, %arg8: memref<2x128x640xf32, #tpu.memory_space<vmem>>, %arg9: memref<2x128xf32, #tpu.memory_space<vmem>>, %arg10: memref<2x28x55xf32, #tpu.memory_space<vmem>>, %arg11: memref<128x768xf32, #tpu.memory_space<vmem>>, %arg12: memref<1x64xf32, #tpu.memory_space<vmem>>, %arg13: memref<64x4xf32, #tpu.memory_space<vmem>>, %arg14: memref<1x1xf32, #tpu.memory_space<vmem>>, %arg15: memref<1x2x4xf32, #tpu.memory_space<vmem>>) attributes {dimension_semantics = [#tpu.dimension_semantics<parallel>], iteration_bounds = array<i64: 2>, scalar_prefetch = 0 : i64, scratch_operands = 0 : i64, tpu.core_type = #tpu.core_type<tc>, window_params = [{transform_indices = @transform_0, window_bounds = array<i64: 2, 1, 128>}, {transform_indices = @transform_1, window_bounds = array<i64: 2, 64, 128>}, {pipeline_mode = #tpu.pipeline_mode<synchronous>, transform_indices = @transform_2, window_bounds = array<i64: 128, 640>}, {pipeline_mode = #tpu.pipeline_mode<synchronous>, transform_indices = @transform_3, window_bounds = array<i64: 1, 128>}, {pipeline_mode = #tpu.pipeline_mode<synchronous>, transform_indices = @transform_4, window_bounds = array<i64: 128, 128>}, {pipeline_mode = #tpu.pipeline_mode<synchronous>, transform_indices = @transform_5, window_bounds = array<i64: 2, 128>}, {pipeline_mode = #tpu.pipeline_mode<synchronous>, transform_indices = @transform_6, window_bounds = array<i64: 2, 128>}, {pipeline_mode = #tpu.pipeline_mode<synchronous>, transform_indices = @transform_7, window_bounds = array<i64: 2, 128, 640>}, {pipeline_mode = #tpu.pipeline_mode<synchronous>, transform_indices = @transform_8, window_bounds = array<i64: 2, 128>}, {pipeline_mode = #tpu.pipeline_mode<synchronous>, transform_indices = @transform_9, window_bounds = array<i64: 2, 28, 55>}, {pipeline_mode = #tpu.pipeline_mode<synchronous>, transform_indices = @transform_10, window_bounds = array<i64: 128, 768>}, {pipeline_mode = #tpu.pipeline_mode<synchronous>, transform_indices = @transform_11, window_bounds = array<i64: 1, 64>}, {pipeline_mode = #tpu.pipeline_mode<synchronous>, transform_indices = @transform_12, window_bounds = array<i64: 64, 4>}, {pipeline_mode = #tpu.pipeline_mode<synchronous>, transform_indices = @transform_13, window_bounds = array<i64: 1, 1>}, {transform_indices = @transform_14, window_bounds = array<i64: 1, 2, 4>}]} {
    %c0 = arith.constant 0 : index
    %c0_0 = arith.constant 0 : index
    %0 = vector.load %arg5[%c0, %c0_0] : memref<128x128xf32, #tpu.memory_space<vmem>>, vector<128x128xf32>
    %c0_1 = arith.constant 0 : index
    %c0_2 = arith.constant 0 : index
    %c0_3 = arith.constant 0 : index
    %1 = vector.load %arg2[%c0_1, %c0_2, %c0_3] : memref<2x64x128xf32, #tpu.memory_space<vmem>>, vector<1x64x128xf32>
    %2 = vector.shape_cast %1 : vector<1x64x128xf32> to vector<64x128xf32>
    %3 = tpu.iota {dimensions = array<i32: 0>} : vector<64x1xi32>
    %c0_4 = arith.constant 0 : index
    %c0_5 = arith.constant 0 : index
    %c0_6 = arith.constant 0 : index
    %4 = vector.load %arg1[%c0_4, %c0_5, %c0_6] : memref<2x1x128xi32, #tpu.memory_space<vmem>>, vector<1x1x128xi32>
    %5 = vector.shape_cast %4 : vector<1x1x128xi32> to vector<1x128xi32>
    %6 = vector.broadcast %3 : vector<64x1xi32> to vector<64x128xi32>
    %7 = vector.broadcast %5 : vector<1x128xi32> to vector<64x128xi32>
    %8 = arith.cmpi slt, %6, %7 : vector<64x128xi32>
    %9 = arith.extui %8 : vector<64x128xi1> to vector<64x128xi32>
    %10 = arith.sitofp %9 : vector<64x128xi32> to vector<64x128xf32>
    %11 = arith.mulf %2, %10 : vector<64x128xf32>
    %c0_7 = arith.constant 0 : index
    %c0_8 = arith.constant 0 : index
    %12 = vector.load %arg3[%c0_7, %c0_8] : memref<128x640xf32, #tpu.memory_space<vmem>>, vector<128x640xf32>
    %c0_9 = arith.constant 0 : index
    %c0_10 = arith.constant 0 : index
    %13 = vector.load %arg4[%c0_9, %c0_10] : memref<1x128xf32, #tpu.memory_space<vmem>>, vector<1x128xf32>
    %cst = arith.constant dense<0.000000e+00> : vector<64x640xf32>
    %14 = tpu.matmul %11, %12, %cst {dimension_numbers = #tpu.dot_dimension_numbers<[1], [0], [0], [1], [0, 0, 1, 1], [], []>} : vector<64x128xf32>, vector<128x640xf32>, vector<64x640xf32> -> vector<64x640xf32>
    %15 = vector.extract_strided_slice %14 {offsets = [0, 0], sizes = [60, 128], strides = [1, 1]} : vector<64x640xf32> to vector<60x128xf32>
    %16 = vector.extract_strided_slice %14 {offsets = [1, 128], sizes = [60, 128], strides = [1, 1]} : vector<64x640xf32> to vector<60x128xf32>
    %17 = arith.addf %15, %16 : vector<60x128xf32>
    %18 = vector.extract_strided_slice %14 {offsets = [2, 256], sizes = [60, 128], strides = [1, 1]} : vector<64x640xf32> to vector<60x128xf32>
    %19 = arith.addf %17, %18 : vector<60x128xf32>
    %20 = vector.extract_strided_slice %14 {offsets = [3, 384], sizes = [60, 128], strides = [1, 1]} : vector<64x640xf32> to vector<60x128xf32>
    %21 = arith.addf %19, %20 : vector<60x128xf32>
    %22 = vector.extract_strided_slice %14 {offsets = [4, 512], sizes = [60, 128], strides = [1, 1]} : vector<64x640xf32> to vector<60x128xf32>
    %23 = arith.addf %21, %22 : vector<60x128xf32>
    %24 = vector.broadcast %13 : vector<1x128xf32> to vector<60x128xf32>
    %25 = arith.addf %23, %24 : vector<60x128xf32>
    %cst_11 = arith.constant dense<0.000000e+00> : vector<60x128xf32>
    %26 = tpu.matmul %25, %0, %cst_11 {dimension_numbers = #tpu.dot_dimension_numbers<[1], [0], [0], [1], [0, 0, 1, 1], [], []>} : vector<60x128xf32>, vector<128x128xf32>, vector<60x128xf32> -> vector<60x128xf32>
    %27 = arith.subf %25, %26 : vector<60x128xf32>
    %28 = arith.mulf %27, %27 : vector<60x128xf32>
    %cst_12 = arith.constant dense<0.000000e+00> : vector<60x128xf32>
    %29 = tpu.matmul %28, %0, %cst_12 {dimension_numbers = #tpu.dot_dimension_numbers<[1], [0], [0], [1], [0, 0, 1, 1], [], []>} : vector<60x128xf32>, vector<128x128xf32>, vector<60x128xf32> -> vector<60x128xf32>
    %cst_13 = arith.constant 9.99999974E-6 : f32
    %30 = vector.broadcast %cst_13 : f32 to vector<60x128xf32>
    %31 = arith.addf %29, %30 : vector<60x128xf32>
    %32 = math.rsqrt %31 : vector<60x128xf32>
    %33 = arith.mulf %27, %32 : vector<60x128xf32>
    %c0_14 = arith.constant 0 : index
    %c0_15 = arith.constant 0 : index
    %34 = vector.load %arg6[%c0_14, %c0_15] : memref<2x128xf32, #tpu.memory_space<vmem>>, vector<1x128xf32>
    %35 = vector.broadcast %34 : vector<1x128xf32> to vector<60x128xf32>
    %36 = arith.mulf %33, %35 : vector<60x128xf32>
    %c0_16 = arith.constant 0 : index
    %c0_17 = arith.constant 0 : index
    %37 = vector.load %arg7[%c0_16, %c0_17] : memref<2x128xf32, #tpu.memory_space<vmem>>, vector<1x128xf32>
    %38 = vector.broadcast %37 : vector<1x128xf32> to vector<60x128xf32>
    %39 = arith.addf %36, %38 : vector<60x128xf32>
    %cst_18 = arith.constant 0.000000e+00 : f32
    %40 = vector.broadcast %cst_18 : f32 to vector<60x128xf32>
    %41 = arith.maximumf %39, %40 : vector<60x128xf32>
    %c0_19 = arith.constant 0 : index
    %c0_20 = arith.constant 0 : index
    %c0_21 = arith.constant 0 : index
    %42 = vector.load %arg8[%c0_19, %c0_20, %c0_21] : memref<2x128x640xf32, #tpu.memory_space<vmem>>, vector<1x128x640xf32>
    %43 = vector.shape_cast %42 : vector<1x128x640xf32> to vector<128x640xf32>
    %c0_22 = arith.constant 0 : index
    %c0_23 = arith.constant 0 : index
    %44 = vector.load %arg9[%c0_22, %c0_23] : memref<2x128xf32, #tpu.memory_space<vmem>>, vector<1x128xf32>
    %cst_24 = arith.constant dense<0.000000e+00> : vector<60x640xf32>
    %45 = tpu.matmul %41, %43, %cst_24 {dimension_numbers = #tpu.dot_dimension_numbers<[1], [0], [0], [1], [0, 0, 1, 1], [], []>} : vector<60x128xf32>, vector<128x640xf32>, vector<60x640xf32> -> vector<60x640xf32>
    %46 = vector.extract_strided_slice %45 {offsets = [0, 0], sizes = [56, 128], strides = [1, 1]} : vector<60x640xf32> to vector<56x128xf32>
    %47 = vector.extract_strided_slice %45 {offsets = [1, 128], sizes = [56, 128], strides = [1, 1]} : vector<60x640xf32> to vector<56x128xf32>
    %48 = arith.addf %46, %47 : vector<56x128xf32>
    %49 = vector.extract_strided_slice %45 {offsets = [2, 256], sizes = [56, 128], strides = [1, 1]} : vector<60x640xf32> to vector<56x128xf32>
    %50 = arith.addf %48, %49 : vector<56x128xf32>
    %51 = vector.extract_strided_slice %45 {offsets = [3, 384], sizes = [56, 128], strides = [1, 1]} : vector<60x640xf32> to vector<56x128xf32>
    %52 = arith.addf %50, %51 : vector<56x128xf32>
    %53 = vector.extract_strided_slice %45 {offsets = [4, 512], sizes = [56, 128], strides = [1, 1]} : vector<60x640xf32> to vector<56x128xf32>
    %54 = arith.addf %52, %53 : vector<56x128xf32>
    %55 = vector.broadcast %44 : vector<1x128xf32> to vector<56x128xf32>
    %56 = arith.addf %54, %55 : vector<56x128xf32>
    %57 = vector.extract_strided_slice %56 {offsets = [0, 0], sizes = [55, 128], strides = [1, 1]} : vector<56x128xf32> to vector<55x128xf32>
    %58 = vector.extract_strided_slice %56 {offsets = [1, 0], sizes = [55, 128], strides = [1, 1]} : vector<56x128xf32> to vector<55x128xf32>
    %59 = arith.maximumf %57, %58 : vector<55x128xf32>
    %c0_25 = arith.constant 0 : index
    %c0_26 = arith.constant 0 : index
    %c0_27 = arith.constant 0 : index
    %60 = vector.load %arg10[%c0_25, %c0_26, %c0_27] : memref<2x28x55xf32, #tpu.memory_space<vmem>>, vector<1x28x55xf32>
    %61 = vector.shape_cast %60 : vector<1x28x55xf32> to vector<28x55xf32>
    %cst_28 = arith.constant dense<0.000000e+00> : vector<28x128xf32>
    %62 = tpu.matmul %61, %59, %cst_28 {dimension_numbers = #tpu.dot_dimension_numbers<[1], [0], [0], [1], [0, 0, 1, 1], [], []>} : vector<28x55xf32>, vector<55x128xf32>, vector<28x128xf32> -> vector<28x128xf32>
    %cst_29 = arith.constant dense<0.000000e+00> : vector<28x128xf32>
    %63 = tpu.matmul %62, %0, %cst_29 {dimension_numbers = #tpu.dot_dimension_numbers<[1], [0], [0], [1], [0, 0, 1, 1], [], []>} : vector<28x128xf32>, vector<128x128xf32>, vector<28x128xf32> -> vector<28x128xf32>
    %64 = arith.subf %62, %63 : vector<28x128xf32>
    %65 = arith.mulf %64, %64 : vector<28x128xf32>
    %cst_30 = arith.constant dense<0.000000e+00> : vector<28x128xf32>
    %66 = tpu.matmul %65, %0, %cst_30 {dimension_numbers = #tpu.dot_dimension_numbers<[1], [0], [0], [1], [0, 0, 1, 1], [], []>} : vector<28x128xf32>, vector<128x128xf32>, vector<28x128xf32> -> vector<28x128xf32>
    %cst_31 = arith.constant 9.99999974E-6 : f32
    %67 = vector.broadcast %cst_31 : f32 to vector<28x128xf32>
    %68 = arith.addf %66, %67 : vector<28x128xf32>
    %69 = math.rsqrt %68 : vector<28x128xf32>
    %70 = arith.mulf %64, %69 : vector<28x128xf32>
    %c1 = arith.constant 1 : index
    %c0_32 = arith.constant 0 : index
    %71 = vector.load %arg6[%c1, %c0_32] : memref<2x128xf32, #tpu.memory_space<vmem>>, vector<1x128xf32>
    %72 = vector.broadcast %71 : vector<1x128xf32> to vector<28x128xf32>
    %73 = arith.mulf %70, %72 : vector<28x128xf32>
    %c1_33 = arith.constant 1 : index
    %c0_34 = arith.constant 0 : index
    %74 = vector.load %arg7[%c1_33, %c0_34] : memref<2x128xf32, #tpu.memory_space<vmem>>, vector<1x128xf32>
    %75 = vector.broadcast %74 : vector<1x128xf32> to vector<28x128xf32>
    %76 = arith.addf %73, %75 : vector<28x128xf32>
    %cst_35 = arith.constant 0.000000e+00 : f32
    %77 = vector.broadcast %cst_35 : f32 to vector<28x128xf32>
    %78 = arith.maximumf %76, %77 : vector<28x128xf32>
    %c1_36 = arith.constant 1 : index
    %c0_37 = arith.constant 0 : index
    %c0_38 = arith.constant 0 : index
    %79 = vector.load %arg8[%c1_36, %c0_37, %c0_38] : memref<2x128x640xf32, #tpu.memory_space<vmem>>, vector<1x128x640xf32>
    %80 = vector.shape_cast %79 : vector<1x128x640xf32> to vector<128x640xf32>
    %c1_39 = arith.constant 1 : index
    %c0_40 = arith.constant 0 : index
    %81 = vector.load %arg9[%c1_39, %c0_40] : memref<2x128xf32, #tpu.memory_space<vmem>>, vector<1x128xf32>
    %cst_41 = arith.constant dense<0.000000e+00> : vector<28x640xf32>
    %82 = tpu.matmul %78, %80, %cst_41 {dimension_numbers = #tpu.dot_dimension_numbers<[1], [0], [0], [1], [0, 0, 1, 1], [], []>} : vector<28x128xf32>, vector<128x640xf32>, vector<28x640xf32> -> vector<28x640xf32>
    %83 = vector.extract_strided_slice %82 {offsets = [0, 0], sizes = [24, 128], strides = [1, 1]} : vector<28x640xf32> to vector<24x128xf32>
    %84 = vector.extract_strided_slice %82 {offsets = [1, 128], sizes = [24, 128], strides = [1, 1]} : vector<28x640xf32> to vector<24x128xf32>
    %85 = arith.addf %83, %84 : vector<24x128xf32>
    %86 = vector.extract_strided_slice %82 {offsets = [2, 256], sizes = [24, 128], strides = [1, 1]} : vector<28x640xf32> to vector<24x128xf32>
    %87 = arith.addf %85, %86 : vector<24x128xf32>
    %88 = vector.extract_strided_slice %82 {offsets = [3, 384], sizes = [24, 128], strides = [1, 1]} : vector<28x640xf32> to vector<24x128xf32>
    %89 = arith.addf %87, %88 : vector<24x128xf32>
    %90 = vector.extract_strided_slice %82 {offsets = [4, 512], sizes = [24, 128], strides = [1, 1]} : vector<28x640xf32> to vector<24x128xf32>
    %91 = arith.addf %89, %90 : vector<24x128xf32>
    %92 = vector.broadcast %81 : vector<1x128xf32> to vector<24x128xf32>
    %93 = arith.addf %91, %92 : vector<24x128xf32>
    %94 = vector.extract_strided_slice %93 {offsets = [0, 0], sizes = [23, 128], strides = [1, 1]} : vector<24x128xf32> to vector<23x128xf32>
    %95 = vector.extract_strided_slice %93 {offsets = [1, 0], sizes = [23, 128], strides = [1, 1]} : vector<24x128xf32> to vector<23x128xf32>
    %96 = arith.maximumf %94, %95 : vector<23x128xf32>
    %c1_42 = arith.constant 1 : index
    %c0_43 = arith.constant 0 : index
    %c0_44 = arith.constant 0 : index
    %97 = vector.load %arg10[%c1_42, %c0_43, %c0_44] : memref<2x28x55xf32, #tpu.memory_space<vmem>>, vector<1x12x23xf32>
    %98 = vector.shape_cast %97 : vector<1x12x23xf32> to vector<12x23xf32>
    %cst_45 = arith.constant dense<0.000000e+00> : vector<12x128xf32>
    %99 = tpu.matmul %98, %96, %cst_45 {dimension_numbers = #tpu.dot_dimension_numbers<[1], [0], [0], [1], [0, 0, 1, 1], [], []>} : vector<12x23xf32>, vector<23x128xf32>, vector<12x128xf32> -> vector<12x128xf32>
    %c0_46 = arith.constant 0 : index
    %c0_47 = arith.constant 0 : index
    %100 = vector.load %arg11[%c0_46, %c0_47] : memref<128x768xf32, #tpu.memory_space<vmem>>, vector<128x768xf32>
    %cst_48 = arith.constant dense<0.000000e+00> : vector<12x768xf32>
    %101 = tpu.matmul %99, %100, %cst_48 {dimension_numbers = #tpu.dot_dimension_numbers<[1], [0], [0], [1], [0, 0, 1, 1], [], []>} : vector<12x128xf32>, vector<128x768xf32>, vector<12x768xf32> -> vector<12x768xf32>
    %c0_49 = arith.constant 0 : index
    %c0_50 = arith.constant 0 : index
    %102 = vector.load %arg12[%c0_49, %c0_50] : memref<1x64xf32, #tpu.memory_space<vmem>>, vector<1x64xf32>
    %103 = vector.extract_strided_slice %101 {offsets = [0, 0], sizes = [1, 64], strides = [1, 1]} : vector<12x768xf32> to vector<1x64xf32>
    %104 = arith.addf %102, %103 : vector<1x64xf32>
    %105 = vector.extract_strided_slice %101 {offsets = [1, 64], sizes = [1, 64], strides = [1, 1]} : vector<12x768xf32> to vector<1x64xf32>
    %106 = arith.addf %104, %105 : vector<1x64xf32>
    %107 = vector.extract_strided_slice %101 {offsets = [2, 128], sizes = [1, 64], strides = [1, 1]} : vector<12x768xf32> to vector<1x64xf32>
    %108 = arith.addf %106, %107 : vector<1x64xf32>
    %109 = vector.extract_strided_slice %101 {offsets = [3, 192], sizes = [1, 64], strides = [1, 1]} : vector<12x768xf32> to vector<1x64xf32>
    %110 = arith.addf %108, %109 : vector<1x64xf32>
    %111 = vector.extract_strided_slice %101 {offsets = [4, 256], sizes = [1, 64], strides = [1, 1]} : vector<12x768xf32> to vector<1x64xf32>
    %112 = arith.addf %110, %111 : vector<1x64xf32>
    %113 = vector.extract_strided_slice %101 {offsets = [5, 320], sizes = [1, 64], strides = [1, 1]} : vector<12x768xf32> to vector<1x64xf32>
    %114 = arith.addf %112, %113 : vector<1x64xf32>
    %115 = vector.extract_strided_slice %101 {offsets = [6, 384], sizes = [1, 64], strides = [1, 1]} : vector<12x768xf32> to vector<1x64xf32>
    %116 = arith.addf %114, %115 : vector<1x64xf32>
    %117 = vector.extract_strided_slice %101 {offsets = [7, 448], sizes = [1, 64], strides = [1, 1]} : vector<12x768xf32> to vector<1x64xf32>
    %118 = arith.addf %116, %117 : vector<1x64xf32>
    %119 = vector.extract_strided_slice %101 {offsets = [8, 512], sizes = [1, 64], strides = [1, 1]} : vector<12x768xf32> to vector<1x64xf32>
    %120 = arith.addf %118, %119 : vector<1x64xf32>
    %121 = vector.extract_strided_slice %101 {offsets = [9, 576], sizes = [1, 64], strides = [1, 1]} : vector<12x768xf32> to vector<1x64xf32>
    %122 = arith.addf %120, %121 : vector<1x64xf32>
    %123 = vector.extract_strided_slice %101 {offsets = [10, 640], sizes = [1, 64], strides = [1, 1]} : vector<12x768xf32> to vector<1x64xf32>
    %124 = arith.addf %122, %123 : vector<1x64xf32>
    %125 = vector.extract_strided_slice %101 {offsets = [11, 704], sizes = [1, 64], strides = [1, 1]} : vector<12x768xf32> to vector<1x64xf32>
    %126 = arith.addf %124, %125 : vector<1x64xf32>
    %cst_51 = arith.constant 0.000000e+00 : f32
    %127 = vector.broadcast %cst_51 : f32 to vector<1x64xf32>
    %128 = arith.maximumf %126, %127 : vector<1x64xf32>
    %c0_52 = arith.constant 0 : index
    %c0_53 = arith.constant 0 : index
    %129 = vector.load %arg13[%c0_52, %c0_53] : memref<64x4xf32, #tpu.memory_space<vmem>>, vector<64x4xf32>
    %cst_54 = arith.constant dense<0.000000e+00> : vector<1x4xf32>
    %130 = tpu.matmul %128, %129, %cst_54 {dimension_numbers = #tpu.dot_dimension_numbers<[1], [0], [0], [1], [0, 0, 1, 1], [], []>} : vector<1x64xf32>, vector<64x4xf32>, vector<1x4xf32> -> vector<1x4xf32>
    %c0_55 = arith.constant 0 : index
    %c0_56 = arith.constant 0 : index
    %131 = vector.load %arg14[%c0_55, %c0_56] : memref<1x1xf32, #tpu.memory_space<vmem>>, vector<1x1xf32>
    %132 = vector.broadcast %131 : vector<1x1xf32> to vector<1x4xf32>
    %133 = arith.addf %130, %132 : vector<1x4xf32>
    %134 = arith.negf %133 : vector<1x4xf32>
    %135 = math.exp %134 : vector<1x4xf32>
    %cst_57 = arith.constant 1.000000e+00 : f32
    %136 = vector.broadcast %cst_57 : f32 to vector<1x4xf32>
    %137 = arith.addf %136, %135 : vector<1x4xf32>
    %138 = arith.divf %136, %137 : vector<1x4xf32>
    %c0_58 = arith.constant 0 : index
    %c0_59 = arith.constant 0 : index
    %c0_60 = arith.constant 0 : index
    %139 = vector.load %arg15[%c0_58, %c0_59, %c0_60] : memref<1x2x4xf32, #tpu.memory_space<vmem>>, vector<1x1x4xf32>
    %140 = vector.shape_cast %139 : vector<1x1x4xf32> to vector<1x4xf32>
    %141 = vector.shape_cast %138 : vector<1x4xf32> to vector<1x1x4xf32>
    tpu.vector_store %arg15[%c0_58, %c0_59, %c0_60], %141 {strides = array<i32>} : memref<1x2x4xf32, #tpu.memory_space<vmem>>, vector<1x1x4xf32>,
    %c1_61 = arith.constant 1 : index
    %c0_62 = arith.constant 0 : index
    %c0_63 = arith.constant 0 : index
    %142 = vector.load %arg2[%c1_61, %c0_62, %c0_63] : memref<2x64x128xf32, #tpu.memory_space<vmem>>, vector<1x64x128xf32>
    %143 = vector.shape_cast %142 : vector<1x64x128xf32> to vector<64x128xf32>
    %144 = tpu.iota {dimensions = array<i32: 0>} : vector<64x1xi32>
    %c1_64 = arith.constant 1 : index
    %c0_65 = arith.constant 0 : index
    %c0_66 = arith.constant 0 : index
    %145 = vector.load %arg1[%c1_64, %c0_65, %c0_66] : memref<2x1x128xi32, #tpu.memory_space<vmem>>, vector<1x1x128xi32>
    %146 = vector.shape_cast %145 : vector<1x1x128xi32> to vector<1x128xi32>
    %147 = vector.broadcast %144 : vector<64x1xi32> to vector<64x128xi32>
    %148 = vector.broadcast %146 : vector<1x128xi32> to vector<64x128xi32>
    %149 = arith.cmpi slt, %147, %148 : vector<64x128xi32>
    %150 = arith.extui %149 : vector<64x128xi1> to vector<64x128xi32>
    %151 = arith.sitofp %150 : vector<64x128xi32> to vector<64x128xf32>
    %152 = arith.mulf %143, %151 : vector<64x128xf32>
    %c0_67 = arith.constant 0 : index
    %c0_68 = arith.constant 0 : index
    %153 = vector.load %arg3[%c0_67, %c0_68] : memref<128x640xf32, #tpu.memory_space<vmem>>, vector<128x640xf32>
    %c0_69 = arith.constant 0 : index
    %c0_70 = arith.constant 0 : index
    %154 = vector.load %arg4[%c0_69, %c0_70] : memref<1x128xf32, #tpu.memory_space<vmem>>, vector<1x128xf32>
    %cst_71 = arith.constant dense<0.000000e+00> : vector<64x640xf32>
    %155 = tpu.matmul %152, %153, %cst_71 {dimension_numbers = #tpu.dot_dimension_numbers<[1], [0], [0], [1], [0, 0, 1, 1], [], []>} : vector<64x128xf32>, vector<128x640xf32>, vector<64x640xf32> -> vector<64x640xf32>
    %156 = vector.extract_strided_slice %155 {offsets = [0, 0], sizes = [60, 128], strides = [1, 1]} : vector<64x640xf32> to vector<60x128xf32>
    %157 = vector.extract_strided_slice %155 {offsets = [1, 128], sizes = [60, 128], strides = [1, 1]} : vector<64x640xf32> to vector<60x128xf32>
    %158 = arith.addf %156, %157 : vector<60x128xf32>
    %159 = vector.extract_strided_slice %155 {offsets = [2, 256], sizes = [60, 128], strides = [1, 1]} : vector<64x640xf32> to vector<60x128xf32>
    %160 = arith.addf %158, %159 : vector<60x128xf32>
    %161 = vector.extract_strided_slice %155 {offsets = [3, 384], sizes = [60, 128], strides = [1, 1]} : vector<64x640xf32> to vector<60x128xf32>
    %162 = arith.addf %160, %161 : vector<60x128xf32>
    %163 = vector.extract_strided_slice %155 {offsets = [4, 512], sizes = [60, 128], strides = [1, 1]} : vector<64x640xf32> to vector<60x128xf32>
    %164 = arith.addf %162, %163 : vector<60x128xf32>
    %165 = vector.broadcast %154 : vector<1x128xf32> to vector<60x128xf32>
    %166 = arith.addf %164, %165 : vector<60x128xf32>
    %cst_72 = arith.constant dense<0.000000e+00> : vector<60x128xf32>
    %167 = tpu.matmul %166, %0, %cst_72 {dimension_numbers = #tpu.dot_dimension_numbers<[1], [0], [0], [1], [0, 0, 1, 1], [], []>} : vector<60x128xf32>, vector<128x128xf32>, vector<60x128xf32> -> vector<60x128xf32>
    %168 = arith.subf %166, %167 : vector<60x128xf32>
    %169 = arith.mulf %168, %168 : vector<60x128xf32>
    %cst_73 = arith.constant dense<0.000000e+00> : vector<60x128xf32>
    %170 = tpu.matmul %169, %0, %cst_73 {dimension_numbers = #tpu.dot_dimension_numbers<[1], [0], [0], [1], [0, 0, 1, 1], [], []>} : vector<60x128xf32>, vector<128x128xf32>, vector<60x128xf32> -> vector<60x128xf32>
    %cst_74 = arith.constant 9.99999974E-6 : f32
    %171 = vector.broadcast %cst_74 : f32 to vector<60x128xf32>
    %172 = arith.addf %170, %171 : vector<60x128xf32>
    %173 = math.rsqrt %172 : vector<60x128xf32>
    %174 = arith.mulf %168, %173 : vector<60x128xf32>
    %c0_75 = arith.constant 0 : index
    %c0_76 = arith.constant 0 : index
    %175 = vector.load %arg6[%c0_75, %c0_76] : memref<2x128xf32, #tpu.memory_space<vmem>>, vector<1x128xf32>
    %176 = vector.broadcast %175 : vector<1x128xf32> to vector<60x128xf32>
    %177 = arith.mulf %174, %176 : vector<60x128xf32>
    %c0_77 = arith.constant 0 : index
    %c0_78 = arith.constant 0 : index
    %178 = vector.load %arg7[%c0_77, %c0_78] : memref<2x128xf32, #tpu.memory_space<vmem>>, vector<1x128xf32>
    %179 = vector.broadcast %178 : vector<1x128xf32> to vector<60x128xf32>
    %180 = arith.addf %177, %179 : vector<60x128xf32>
    %cst_79 = arith.constant 0.000000e+00 : f32
    %181 = vector.broadcast %cst_79 : f32 to vector<60x128xf32>
    %182 = arith.maximumf %180, %181 : vector<60x128xf32>
    %c0_80 = arith.constant 0 : index
    %c0_81 = arith.constant 0 : index
    %c0_82 = arith.constant 0 : index
    %183 = vector.load %arg8[%c0_80, %c0_81, %c0_82] : memref<2x128x640xf32, #tpu.memory_space<vmem>>, vector<1x128x640xf32>
    %184 = vector.shape_cast %183 : vector<1x128x640xf32> to vector<128x640xf32>
    %c0_83 = arith.constant 0 : index
    %c0_84 = arith.constant 0 : index
    %185 = vector.load %arg9[%c0_83, %c0_84] : memref<2x128xf32, #tpu.memory_space<vmem>>, vector<1x128xf32>
    %cst_85 = arith.constant dense<0.000000e+00> : vector<60x640xf32>
    %186 = tpu.matmul %182, %184, %cst_85 {dimension_numbers = #tpu.dot_dimension_numbers<[1], [0], [0], [1], [0, 0, 1, 1], [], []>} : vector<60x128xf32>, vector<128x640xf32>, vector<60x640xf32> -> vector<60x640xf32>
    %187 = vector.extract_strided_slice %186 {offsets = [0, 0], sizes = [56, 128], strides = [1, 1]} : vector<60x640xf32> to vector<56x128xf32>
    %188 = vector.extract_strided_slice %186 {offsets = [1, 128], sizes = [56, 128], strides = [1, 1]} : vector<60x640xf32> to vector<56x128xf32>
    %189 = arith.addf %187, %188 : vector<56x128xf32>
    %190 = vector.extract_strided_slice %186 {offsets = [2, 256], sizes = [56, 128], strides = [1, 1]} : vector<60x640xf32> to vector<56x128xf32>
    %191 = arith.addf %189, %190 : vector<56x128xf32>
    %192 = vector.extract_strided_slice %186 {offsets = [3, 384], sizes = [56, 128], strides = [1, 1]} : vector<60x640xf32> to vector<56x128xf32>
    %193 = arith.addf %191, %192 : vector<56x128xf32>
    %194 = vector.extract_strided_slice %186 {offsets = [4, 512], sizes = [56, 128], strides = [1, 1]} : vector<60x640xf32> to vector<56x128xf32>
    %195 = arith.addf %193, %194 : vector<56x128xf32>
    %196 = vector.broadcast %185 : vector<1x128xf32> to vector<56x128xf32>
    %197 = arith.addf %195, %196 : vector<56x128xf32>
    %198 = vector.extract_strided_slice %197 {offsets = [0, 0], sizes = [55, 128], strides = [1, 1]} : vector<56x128xf32> to vector<55x128xf32>
    %199 = vector.extract_strided_slice %197 {offsets = [1, 0], sizes = [55, 128], strides = [1, 1]} : vector<56x128xf32> to vector<55x128xf32>
    %200 = arith.maximumf %198, %199 : vector<55x128xf32>
    %c0_86 = arith.constant 0 : index
    %c0_87 = arith.constant 0 : index
    %c0_88 = arith.constant 0 : index
    %201 = vector.load %arg10[%c0_86, %c0_87, %c0_88] : memref<2x28x55xf32, #tpu.memory_space<vmem>>, vector<1x28x55xf32>
    %202 = vector.shape_cast %201 : vector<1x28x55xf32> to vector<28x55xf32>
    %cst_89 = arith.constant dense<0.000000e+00> : vector<28x128xf32>
    %203 = tpu.matmul %202, %200, %cst_89 {dimension_numbers = #tpu.dot_dimension_numbers<[1], [0], [0], [1], [0, 0, 1, 1], [], []>} : vector<28x55xf32>, vector<55x128xf32>, vector<28x128xf32> -> vector<28x128xf32>
    %cst_90 = arith.constant dense<0.000000e+00> : vector<28x128xf32>
    %204 = tpu.matmul %203, %0, %cst_90 {dimension_numbers = #tpu.dot_dimension_numbers<[1], [0], [0], [1], [0, 0, 1, 1], [], []>} : vector<28x128xf32>, vector<128x128xf32>, vector<28x128xf32> -> vector<28x128xf32>
    %205 = arith.subf %203, %204 : vector<28x128xf32>
    %206 = arith.mulf %205, %205 : vector<28x128xf32>
    %cst_91 = arith.constant dense<0.000000e+00> : vector<28x128xf32>
    %207 = tpu.matmul %206, %0, %cst_91 {dimension_numbers = #tpu.dot_dimension_numbers<[1], [0], [0], [1], [0, 0, 1, 1], [], []>} : vector<28x128xf32>, vector<128x128xf32>, vector<28x128xf32> -> vector<28x128xf32>
    %cst_92 = arith.constant 9.99999974E-6 : f32
    %208 = vector.broadcast %cst_92 : f32 to vector<28x128xf32>
    %209 = arith.addf %207, %208 : vector<28x128xf32>
    %210 = math.rsqrt %209 : vector<28x128xf32>
    %211 = arith.mulf %205, %210 : vector<28x128xf32>
    %c1_93 = arith.constant 1 : index
    %c0_94 = arith.constant 0 : index
    %212 = vector.load %arg6[%c1_93, %c0_94] : memref<2x128xf32, #tpu.memory_space<vmem>>, vector<1x128xf32>
    %213 = vector.broadcast %212 : vector<1x128xf32> to vector<28x128xf32>
    %214 = arith.mulf %211, %213 : vector<28x128xf32>
    %c1_95 = arith.constant 1 : index
    %c0_96 = arith.constant 0 : index
    %215 = vector.load %arg7[%c1_95, %c0_96] : memref<2x128xf32, #tpu.memory_space<vmem>>, vector<1x128xf32>
    %216 = vector.broadcast %215 : vector<1x128xf32> to vector<28x128xf32>
    %217 = arith.addf %214, %216 : vector<28x128xf32>
    %cst_97 = arith.constant 0.000000e+00 : f32
    %218 = vector.broadcast %cst_97 : f32 to vector<28x128xf32>
    %219 = arith.maximumf %217, %218 : vector<28x128xf32>
    %c1_98 = arith.constant 1 : index
    %c0_99 = arith.constant 0 : index
    %c0_100 = arith.constant 0 : index
    %220 = vector.load %arg8[%c1_98, %c0_99, %c0_100] : memref<2x128x640xf32, #tpu.memory_space<vmem>>, vector<1x128x640xf32>
    %221 = vector.shape_cast %220 : vector<1x128x640xf32> to vector<128x640xf32>
    %c1_101 = arith.constant 1 : index
    %c0_102 = arith.constant 0 : index
    %222 = vector.load %arg9[%c1_101, %c0_102] : memref<2x128xf32, #tpu.memory_space<vmem>>, vector<1x128xf32>
    %cst_103 = arith.constant dense<0.000000e+00> : vector<28x640xf32>
    %223 = tpu.matmul %219, %221, %cst_103 {dimension_numbers = #tpu.dot_dimension_numbers<[1], [0], [0], [1], [0, 0, 1, 1], [], []>} : vector<28x128xf32>, vector<128x640xf32>, vector<28x640xf32> -> vector<28x640xf32>
    %224 = vector.extract_strided_slice %223 {offsets = [0, 0], sizes = [24, 128], strides = [1, 1]} : vector<28x640xf32> to vector<24x128xf32>
    %225 = vector.extract_strided_slice %223 {offsets = [1, 128], sizes = [24, 128], strides = [1, 1]} : vector<28x640xf32> to vector<24x128xf32>
    %226 = arith.addf %224, %225 : vector<24x128xf32>
    %227 = vector.extract_strided_slice %223 {offsets = [2, 256], sizes = [24, 128], strides = [1, 1]} : vector<28x640xf32> to vector<24x128xf32>
    %228 = arith.addf %226, %227 : vector<24x128xf32>
    %229 = vector.extract_strided_slice %223 {offsets = [3, 384], sizes = [24, 128], strides = [1, 1]} : vector<28x640xf32> to vector<24x128xf32>
    %230 = arith.addf %228, %229 : vector<24x128xf32>
    %231 = vector.extract_strided_slice %223 {offsets = [4, 512], sizes = [24, 128], strides = [1, 1]} : vector<28x640xf32> to vector<24x128xf32>
    %232 = arith.addf %230, %231 : vector<24x128xf32>
    %233 = vector.broadcast %222 : vector<1x128xf32> to vector<24x128xf32>
    %234 = arith.addf %232, %233 : vector<24x128xf32>
    %235 = vector.extract_strided_slice %234 {offsets = [0, 0], sizes = [23, 128], strides = [1, 1]} : vector<24x128xf32> to vector<23x128xf32>
    %236 = vector.extract_strided_slice %234 {offsets = [1, 0], sizes = [23, 128], strides = [1, 1]} : vector<24x128xf32> to vector<23x128xf32>
    %237 = arith.maximumf %235, %236 : vector<23x128xf32>
    %c1_104 = arith.constant 1 : index
    %c0_105 = arith.constant 0 : index
    %c0_106 = arith.constant 0 : index
    %238 = vector.load %arg10[%c1_104, %c0_105, %c0_106] : memref<2x28x55xf32, #tpu.memory_space<vmem>>, vector<1x12x23xf32>
    %239 = vector.shape_cast %238 : vector<1x12x23xf32> to vector<12x23xf32>
    %cst_107 = arith.constant dense<0.000000e+00> : vector<12x128xf32>
    %240 = tpu.matmul %239, %237, %cst_107 {dimension_numbers = #tpu.dot_dimension_numbers<[1], [0], [0], [1], [0, 0, 1, 1], [], []>} : vector<12x23xf32>, vector<23x128xf32>, vector<12x128xf32> -> vector<12x128xf32>
    %c0_108 = arith.constant 0 : index
    %c0_109 = arith.constant 0 : index
    %241 = vector.load %arg11[%c0_108, %c0_109] : memref<128x768xf32, #tpu.memory_space<vmem>>, vector<128x768xf32>
    %cst_110 = arith.constant dense<0.000000e+00> : vector<12x768xf32>
    %242 = tpu.matmul %240, %241, %cst_110 {dimension_numbers = #tpu.dot_dimension_numbers<[1], [0], [0], [1], [0, 0, 1, 1], [], []>} : vector<12x128xf32>, vector<128x768xf32>, vector<12x768xf32> -> vector<12x768xf32>
    %c0_111 = arith.constant 0 : index
    %c0_112 = arith.constant 0 : index
    %243 = vector.load %arg12[%c0_111, %c0_112] : memref<1x64xf32, #tpu.memory_space<vmem>>, vector<1x64xf32>
    %244 = vector.extract_strided_slice %242 {offsets = [0, 0], sizes = [1, 64], strides = [1, 1]} : vector<12x768xf32> to vector<1x64xf32>
    %245 = arith.addf %243, %244 : vector<1x64xf32>
    %246 = vector.extract_strided_slice %242 {offsets = [1, 64], sizes = [1, 64], strides = [1, 1]} : vector<12x768xf32> to vector<1x64xf32>
    %247 = arith.addf %245, %246 : vector<1x64xf32>
    %248 = vector.extract_strided_slice %242 {offsets = [2, 128], sizes = [1, 64], strides = [1, 1]} : vector<12x768xf32> to vector<1x64xf32>
    %249 = arith.addf %247, %248 : vector<1x64xf32>
    %250 = vector.extract_strided_slice %242 {offsets = [3, 192], sizes = [1, 64], strides = [1, 1]} : vector<12x768xf32> to vector<1x64xf32>
    %251 = arith.addf %249, %250 : vector<1x64xf32>
    %252 = vector.extract_strided_slice %242 {offsets = [4, 256], sizes = [1, 64], strides = [1, 1]} : vector<12x768xf32> to vector<1x64xf32>
    %253 = arith.addf %251, %252 : vector<1x64xf32>
    %254 = vector.extract_strided_slice %242 {offsets = [5, 320], sizes = [1, 64], strides = [1, 1]} : vector<12x768xf32> to vector<1x64xf32>
    %255 = arith.addf %253, %254 : vector<1x64xf32>
    %256 = vector.extract_strided_slice %242 {offsets = [6, 384], sizes = [1, 64], strides = [1, 1]} : vector<12x768xf32> to vector<1x64xf32>
    %257 = arith.addf %255, %256 : vector<1x64xf32>
    %258 = vector.extract_strided_slice %242 {offsets = [7, 448], sizes = [1, 64], strides = [1, 1]} : vector<12x768xf32> to vector<1x64xf32>
    %259 = arith.addf %257, %258 : vector<1x64xf32>
    %260 = vector.extract_strided_slice %242 {offsets = [8, 512], sizes = [1, 64], strides = [1, 1]} : vector<12x768xf32> to vector<1x64xf32>
    %261 = arith.addf %259, %260 : vector<1x64xf32>
    %262 = vector.extract_strided_slice %242 {offsets = [9, 576], sizes = [1, 64], strides = [1, 1]} : vector<12x768xf32> to vector<1x64xf32>
    %263 = arith.addf %261, %262 : vector<1x64xf32>
    %264 = vector.extract_strided_slice %242 {offsets = [10, 640], sizes = [1, 64], strides = [1, 1]} : vector<12x768xf32> to vector<1x64xf32>
    %265 = arith.addf %263, %264 : vector<1x64xf32>
    %266 = vector.extract_strided_slice %242 {offsets = [11, 704], sizes = [1, 64], strides = [1, 1]} : vector<12x768xf32> to vector<1x64xf32>
    %267 = arith.addf %265, %266 : vector<1x64xf32>
    %cst_113 = arith.constant 0.000000e+00 : f32
    %268 = vector.broadcast %cst_113 : f32 to vector<1x64xf32>
    %269 = arith.maximumf %267, %268 : vector<1x64xf32>
    %c0_114 = arith.constant 0 : index
    %c0_115 = arith.constant 0 : index
    %270 = vector.load %arg13[%c0_114, %c0_115] : memref<64x4xf32, #tpu.memory_space<vmem>>, vector<64x4xf32>
    %cst_116 = arith.constant dense<0.000000e+00> : vector<1x4xf32>
    %271 = tpu.matmul %269, %270, %cst_116 {dimension_numbers = #tpu.dot_dimension_numbers<[1], [0], [0], [1], [0, 0, 1, 1], [], []>} : vector<1x64xf32>, vector<64x4xf32>, vector<1x4xf32> -> vector<1x4xf32>
    %c0_117 = arith.constant 0 : index
    %c0_118 = arith.constant 0 : index
    %272 = vector.load %arg14[%c0_117, %c0_118] : memref<1x1xf32, #tpu.memory_space<vmem>>, vector<1x1xf32>
    %273 = vector.broadcast %272 : vector<1x1xf32> to vector<1x4xf32>
    %274 = arith.addf %271, %273 : vector<1x4xf32>
    %275 = arith.negf %274 : vector<1x4xf32>
    %276 = math.exp %275 : vector<1x4xf32>
    %cst_119 = arith.constant 1.000000e+00 : f32
    %277 = vector.broadcast %cst_119 : f32 to vector<1x4xf32>
    %278 = arith.addf %277, %276 : vector<1x4xf32>
    %279 = arith.divf %277, %278 : vector<1x4xf32>
    %c0_120 = arith.constant 0 : index
    %c1_121 = arith.constant 1 : index
    %c0_122 = arith.constant 0 : index
    %280 = vector.load %arg15[%c0_120, %c1_121, %c0_122] : memref<1x2x4xf32, #tpu.memory_space<vmem>>, vector<1x1x4xf32>
    %281 = vector.shape_cast %280 : vector<1x1x4xf32> to vector<1x4xf32>
    %282 = vector.shape_cast %279 : vector<1x4xf32> to vector<1x1x4xf32>
    tpu.vector_store %arg15[%c0_120, %c1_121, %c0_122], %282 {strides = array<i32>} : memref<1x2x4xf32, #tpu.memory_space<vmem>>, vector<1x1x4xf32>,
    return
  }
  func.func @transform_0(%arg0: i32) -> (i32, i32, i32) {
    %c0_i32 = arith.constant 0 : i32
    %c0_i32_0 = arith.constant 0 : i32
    %c0_i32_1 = arith.constant 0 : i32
    return %arg0, %c0_i32, %c0_i32_0 : i32, i32, i32
  }
  func.func @transform_1(%arg0: i32) -> (i32, i32, i32) {
    %c0_i32 = arith.constant 0 : i32
    %c0_i32_0 = arith.constant 0 : i32
    %c0_i32_1 = arith.constant 0 : i32
    return %arg0, %c0_i32, %c0_i32_0 : i32, i32, i32
  }
  func.func @transform_2(%arg0: i32) -> (i32, i32) {
    %c0_i32 = arith.constant 0 : i32
    %c0_i32_0 = arith.constant 0 : i32
    %c0_i32_1 = arith.constant 0 : i32
    return %c0_i32, %c0_i32_0 : i32, i32
  }
  func.func @transform_3(%arg0: i32) -> (i32, i32) {
    %c0_i32 = arith.constant 0 : i32
    %c0_i32_0 = arith.constant 0 : i32
    %c0_i32_1 = arith.constant 0 : i32
    return %c0_i32, %c0_i32_0 : i32, i32
  }
  func.func @transform_4(%arg0: i32) -> (i32, i32) {
    %c0_i32 = arith.constant 0 : i32
    %c0_i32_0 = arith.constant 0 : i32
    %c0_i32_1 = arith.constant 0 : i32
    return %c0_i32, %c0_i32_0 : i32, i32
  }
  func.func @transform_5(%arg0: i32) -> (i32, i32) {
    %c0_i32 = arith.constant 0 : i32
    %c0_i32_0 = arith.constant 0 : i32
    %c0_i32_1 = arith.constant 0 : i32
    return %c0_i32, %c0_i32_0 : i32, i32
  }
  func.func @transform_6(%arg0: i32) -> (i32, i32) {
    %c0_i32 = arith.constant 0 : i32
    %c0_i32_0 = arith.constant 0 : i32
    %c0_i32_1 = arith.constant 0 : i32
    return %c0_i32, %c0_i32_0 : i32, i32
  }
  func.func @transform_7(%arg0: i32) -> (i32, i32, i32) {
    %c0_i32 = arith.constant 0 : i32
    %c0_i32_0 = arith.constant 0 : i32
    %c0_i32_1 = arith.constant 0 : i32
    %c0_i32_2 = arith.constant 0 : i32
    return %c0_i32, %c0_i32_0, %c0_i32_1 : i32, i32, i32
  }
  func.func @transform_8(%arg0: i32) -> (i32, i32) {
    %c0_i32 = arith.constant 0 : i32
    %c0_i32_0 = arith.constant 0 : i32
    %c0_i32_1 = arith.constant 0 : i32
    return %c0_i32, %c0_i32_0 : i32, i32
  }
  func.func @transform_9(%arg0: i32) -> (i32, i32, i32) {
    %c0_i32 = arith.constant 0 : i32
    %c0_i32_0 = arith.constant 0 : i32
    %c0_i32_1 = arith.constant 0 : i32
    %c0_i32_2 = arith.constant 0 : i32
    return %c0_i32, %c0_i32_0, %c0_i32_1 : i32, i32, i32
  }
  func.func @transform_10(%arg0: i32) -> (i32, i32) {
    %c0_i32 = arith.constant 0 : i32
    %c0_i32_0 = arith.constant 0 : i32
    %c0_i32_1 = arith.constant 0 : i32
    return %c0_i32, %c0_i32_0 : i32, i32
  }
  func.func @transform_11(%arg0: i32) -> (i32, i32) {
    %c0_i32 = arith.constant 0 : i32
    %c0_i32_0 = arith.constant 0 : i32
    %c0_i32_1 = arith.constant 0 : i32
    return %c0_i32, %c0_i32_0 : i32, i32
  }
  func.func @transform_12(%arg0: i32) -> (i32, i32) {
    %c0_i32 = arith.constant 0 : i32
    %c0_i32_0 = arith.constant 0 : i32
    %c0_i32_1 = arith.constant 0 : i32
    return %c0_i32, %c0_i32_0 : i32, i32
  }
  func.func @transform_13(%arg0: i32) -> (i32, i32) {
    %c0_i32 = arith.constant 0 : i32
    %c0_i32_0 = arith.constant 0 : i32
    %c0_i32_1 = arith.constant 0 : i32
    return %c0_i32, %c0_i32_0 : i32, i32
  }
  func.func @transform_14(%arg0: i32) -> (i32, i32, i32) {
    %c0_i32 = arith.constant 0 : i32
    %c0_i32_0 = arith.constant 0 : i32
    %c0_i32_1 = arith.constant 0 : i32
    return %arg0, %c0_i32, %c0_i32_0 : i32, i32, i32
  }
}

</mosaic_0001>

<bundles_post_ra>
// kernel: ptrnet_forward.1
= control target key start
LH: loop header
LB: loop body
LE: loop exit
PB: predicated region body
PF: predicated region fallthrough
CT: control target
= control target key end

     0   :  { %s5125_s15 = smov 0   ;;  %s8457_s0 = inlined_call_operand.vmem [shape: s32[4,1,128], index: 0, kind: input, shape index: {}]   ;;  %s8458_s1 = inlined_call_operand.vmem [shape: f32[4,64,128], index: 1, kind: input, shape index: {}]   ;;  %s8459_s2 = inlined_call_operand.vmem [shape: f32[128,640], index: 2, kind: input, shape index: {}]   ;;  %s8460_s3 = inlined_call_operand.vmem [shape: f32[1,128], index: 3, kind: input, shape index: {}]   ;;  %s8461_s4 = inlined_call_operand.vmem [shape: f32[128,128], index: 4, kind: input, shape index: {}]   ;;  %s8462_s5 = inlined_call_operand.vmem [shape: f32[2,128], index: 5, kind: input, shape index: {}]   ;;  %s8463_s6 = inlined_call_operand.vmem [shape: f32[2,128], index: 6, kind: input, shape index: {}]   ;;  %s8464_s7 = inlined_call_operand.vmem [shape: f32[2,128,640], index: 7, kind: input, shape index: {}]   ;;  %s8465_s8 = inlined_call_operand.vmem [shape: f32[2,128], index: 8, kind: input, shape index: {}]   ;;  %s8466_s9 = inlined_call_operand.vmem [shape: f32[2,28,55], index: 9, kind: input, shape index: {}]   ;;  %s8467_s10 = inlined_call_operand.vmem [shape: f32[128,768], index: 10, kind: input, shape index: {}]   ;;  %s8468_s11 = inlined_call_operand.vmem [shape: f32[1,64], index: 11, kind: input, shape index: {}]   ;;  %s8469_s12 = inlined_call_operand.vmem [shape: f32[64,4], index: 12, kind: input, shape index: {}]   ;;  %s8470_s13 = inlined_call_operand.<no memory space> [shape: f32[1,1], index: 13, kind: input, shape index: {}]   ;;  %s8471_s14 = inlined_call_operand.vmem [shape: f32[2,2,4], index: 14, kind: output, shape index: {}]  }
   0x1   :  { %v19_v0 = vstv %s8470_s13 }
   0x2   :  { %20 = vst [vmem:[#allocation2] sm:$0x1] %v19_v0 }
   0x3 LB: > { %s5131_s16 = sadd.s32 4294967295, %s5042_s15   ;;  %p4717_p0 = scmp.ge.s32.totalorder %s5042_s15, 1  ;;  %s5042_s15 = sphi %s5125_s15, %s26_s15  }
   0x4   : > { %p426_p1 = scmp.lt.s32.totalorder %s5042_s15, 3 }
   0x6   : > { %p427_p2 = pnand %p4717_p0, %p426_p1 }
   0x7   : > { %s4718_s24 = sshll.u32 (!%p427_p2), %s5131_s16, 1  ;;  %s5045_s22 = smov (!%p427_p2), 64  }
   0x8   : > { %430 = sbr.rel (%p427_p2) target bundleno = 3879 (0xf27), region = 76  ;;  %p5213_p3 = scmp.lt.s32.totalorder (!%p427_p2), %s4718_s24, 3 }
   0x9   : > { %p488_p4 = scmp.lt.s32.totalorder (!%p427_p2), %s5131_s16, 1 }
   0xd   : > { %v634_v1 = vld [vmem:[%s8459_s2 + $0x258] sm:$0xff]  ;;  %v635_v2 = vld [vmem:[%s8459_s2 + $0x260] sm:$0xff]  ;;  %v636_v3 = vld [vmem:[%s8459_s2 + $0x268] sm:$0xff]  ;;  %s8474_s24 = smov (!%p5213_p3, %s4718_s24), 3  ;;  %v516_v36 = vlaneseq  ;;  %v5044_v0 = vmov 0.0   ;;  %vm853_vm8 = vcmask 1046528  }
   0xe   : > { %640 = vmatpush.msra.mxu0 %v634_v1  ;;  %681 = vmatpush.msra.mxu1 %v635_v2  ;;  %v629_v4 = vld [vmem:[%s8459_s2 + $0x230] sm:$0xff]  ;;  %v630_v5 = vld [vmem:[%s8459_s2 + $0x238] sm:$0xff]  ;;  %v631_v6 = vld [vmem:[%s8459_s2 + $0x240] sm:$0xff]  ;;  %s5281_s19 = scalar_lea.vmem %s8457_s0, %s8474_s24  ;;  %s4934_s28 = sshll.u32 %s8474_s24, 6  ;;  %vm893_vm9 = vcmask 1045504   ;;  %vm933_vm10 = vcmask 1044480  }
   0xf   : > { %722 = vmatpush.msra.mxu2 %v636_v3  ;;  %v637_v7 = vld [vmem:[%s8459_s2 + $0x270] sm:$0xff]  ;;  %v624_v8 = vld [vmem:[%s8459_s2 + $0x208] sm:$0xff]  ;;  %v626_v10 = vld [vmem:[%s8459_s2 + $0x218] sm:$0xff]  ;;  %v5293_v48 = vshrl.u32 %v516_v36, 7  ;;  %s5322_s18 = scalar_lea.vmem %s8458_s1, %s4934_s28  ;;  %vm973_vm11 = vcmask 1043456   ;;  %s8476_s16 = smov (!%p488_p4, %s5131_s16), 1 }
  0x10   : > { %v625_v9 = vld [vmem:[%s8459_s2 + $0x210] sm:$0xff]  ;;  %641 = vmatpush.msra.mxu0 %v629_v4  ;;  %682 = vmatpush.msra.mxu1 %v630_v5  ;;  %v632_v11 = vld [vmem:[%s8459_s2 + $0x248] sm:$0xff]  ;;  %v619_v12 = vld [vmem:[%s8459_s2 + $0x1e0] sm:$0xff] }
  0x11   : > { %723 = vmatpush.msra.mxu2 %v631_v6  ;;  %763 = vmatpush.msra.mxu3 %v637_v7  ;;  %v620_v13 = vld [vmem:[%s8459_s2 + $0x1e8] sm:$0xff]  ;;  %v621_v14 = vld [vmem:[%s8459_s2 + $0x1f0] sm:$0xff]  ;;  %v627_v15 = vld [vmem:[%s8459_s2 + $0x220] sm:$0xff]  ;;  %v5356_v5 = vadd.s32 8, %v5293_v48  ;;  %v5447_v36 = vadd.s32 40, %v5293_v48 }
  0x12   : > { %642 = vmatpush.msra.mxu0 %v624_v8  ;;  %683 = vmatpush.msra.mxu1 %v625_v9  ;;  %v614_v16 = vld [vmem:[%s8459_s2 + $0x1b8] sm:$0xff]  ;;  %v615_v17 = vld [vmem:[%s8459_s2 + $0x1c0] sm:$0xff]  ;;  %v616_v18 = vld [vmem:[%s8459_s2 + $0x1c8] sm:$0xff] }
  0x13   : > { %724 = vmatpush.msra.mxu2 %v626_v10  ;;  %764 = vmatpush.msra.mxu3 %v632_v11  ;;  %v622_v19 = vld [vmem:[%s8459_s2 + $0x1f8] sm:$0xff]  ;;  %v609_v20 = vld [vmem:[%s8459_s2 + $0x190] sm:$0xff]  ;;  %v611_v22 = vld [vmem:[%s8459_s2 + $0x1a0] sm:$0xff] }
  0x14   : > { %643 = vmatpush.msra.mxu0 %v619_v12  ;;  %684 = vmatpush.msra.mxu1 %v620_v13  ;;  %v610_v21 = vld [vmem:[%s8459_s2 + $0x198] sm:$0xff]  ;;  %v617_v23 = vld [vmem:[%s8459_s2 + $0x1d0] sm:$0xff]  ;;  %v604_v24 = vld [vmem:[%s8459_s2 + $0x168] sm:$0xff]  ;;  %v5378_v12 = vadd.s32 16, %v5293_v48 }
  0x15   : > { %725 = vmatpush.msra.mxu2 %v621_v14  ;;  %765 = vmatpush.msra.mxu3 %v627_v15  ;;  %v605_v25 = vld [vmem:[%s8459_s2 + $0x170] sm:$0xff]  ;;  %v606_v26 = vld [vmem:[%s8459_s2 + $0x178] sm:$0xff]  ;;  %v612_v27 = vld [vmem:[%s8459_s2 + $0x1a8] sm:$0xff] }
  0x16   : > { %644 = vmatpush.msra.mxu0 %v614_v16  ;;  %685 = vmatpush.msra.mxu1 %v615_v17  ;;  %v599_v28 = vld [vmem:[%s8459_s2 + $0x140] sm:$0xff]  ;;  %v600_v29 = vld [vmem:[%s8459_s2 + $0x148] sm:$0xff]  ;;  %v601_v30 = vld [vmem:[%s8459_s2 + $0x150] sm:$0xff] }
  0x17   : > { %726 = vmatpush.msra.mxu2 %v616_v18  ;;  %766 = vmatpush.msra.mxu3 %v622_v19  ;;  %v607_v31 = vld [vmem:[%s8459_s2 + $0x180] sm:$0xff]  ;;  %v594_v32 = vld [vmem:[%s8459_s2 + $0x118] sm:$0xff]  ;;  %v596_v34 = vld [vmem:[%s8459_s2 + $0x128] sm:$0xff] }
  0x18   : > { %645 = vmatpush.msra.mxu0 %v609_v20  ;;  %686 = vmatpush.msra.mxu1 %v610_v21  ;;  %v595_v33 = vld [vmem:[%s8459_s2 + $0x120] sm:$0xff]  ;;  %v602_v35 = vld [vmem:[%s8459_s2 + $0x158] sm:$0xff]  ;;  %v589_v37 = vld [vmem:[%s8459_s2 + $0xf0] sm:$0xff]  ;;  %v5403_v20 = vadd.s32 24, %v5293_v48 }
  0x19   : > { %727 = vmatpush.msra.mxu2 %v611_v22  ;;  %767 = vmatpush.msra.mxu3 %v617_v23  ;;  %v590_v38 = vld [vmem:[%s8459_s2 + $0xf8] sm:$0xff]  ;;  %v591_v39 = vld [vmem:[%s8459_s2 + $0x100] sm:$0xff]  ;;  %v597_v40 = vld [vmem:[%s8459_s2 + $0x130] sm:$0xff] }
  0x1a   : > { %646 = vmatpush.msra.mxu0 %v604_v24  ;;  %687 = vmatpush.msra.mxu1 %v605_v25  ;;  %v584_v41 = vld [vmem:[%s8459_s2 + $0xc8] sm:$0xff]  ;;  %v585_v42 = vld [vmem:[%s8459_s2 + $0xd0] sm:$0xff]  ;;  %v586_v43 = vld [vmem:[%s8459_s2 + $0xd8] sm:$0xff] }
  0x1b   : > { %728 = vmatpush.msra.mxu2 %v606_v26  ;;  %768 = vmatpush.msra.mxu3 %v612_v27  ;;  %v592_v44 = vld [vmem:[%s8459_s2 + $0x108] sm:$0xff]  ;;  %v579_v45 = vld [vmem:[%s8459_s2 + $0xa0] sm:$0xff]  ;;  %v581_v47 = vld [vmem:[%s8459_s2 + $0xb0] sm:$0xff] }
  0x1c   : > { %647 = vmatpush.msra.mxu0 %v599_v28  ;;  %688 = vmatpush.msra.mxu1 %v600_v29  ;;  %v580_v46 = vld [vmem:[%s8459_s2 + $0xa8] sm:$0xff]  ;;  %v587_v49 = vld [vmem:[%s8459_s2 + $0xe0] sm:$0xff]  ;;  %v574_v50 = vld [vmem:[%s8459_s2 + $0x78] sm:$0xff]  ;;  %v5428_v28 = vadd.s32 32, %v5293_v48 }
  0x1d   : > { %729 = vmatpush.msra.mxu2 %v601_v30  ;;  %769 = vmatpush.msra.mxu3 %v607_v31  ;;  %v575_v51 = vld [vmem:[%s8459_s2 + $0x80] sm:$0xff]  ;;  %v576_v52 = vld [vmem:[%s8459_s2 + $0x88] sm:$0xff]  ;;  %v582_v54 = vld [vmem:[%s8459_s2 + $0xb8] sm:$0xff] }
  0x1e   : > { %648 = vmatpush.msra.mxu0 %v594_v32  ;;  %689 = vmatpush.msra.mxu1 %v595_v33  ;;  %v5308_v53 = vld [vmem:[%s5281_s19] ss:$0 sm:$0xff]  ;;  %v569_v55 = vld [vmem:[%s8459_s2 + $0x50] sm:$0xff]  ;;  %v570_v56 = vld [vmem:[%s8459_s2 + $0x58] sm:$0xff] }
  0x1f   : > { %730 = vmatpush.msra.mxu2 %v596_v34  ;;  %770 = vmatpush.msra.mxu3 %v602_v35  ;;  %v571_v57 = vld [vmem:[%s8459_s2 + $0x60] sm:$0xff]  ;;  %v577_v58 = vld [vmem:[%s8459_s2 + $0x90] sm:$0xff]  ;;  %vm527_vm0 = vcmp.lt.s32.totalorder %v5293_v48, %v5308_v53  ;;  %v564_v59 = vld [vmem:[%s8459_s2 + $0x28] sm:$0xff]  ;;  %vm528_vm1 = vcmp.lt.s32.totalorder %v5356_v5, %v5308_v53  ;;  %vm529_vm2 = vcmp.lt.s32.totalorder %v5378_v12, %v5308_v53 }
  0x20   : > { %649 = vmatpush.msra.mxu0 %v589_v37  ;;  %690 = vmatpush.msra.mxu1 %v590_v38  ;;  %v565_v60 = vld [vmem:[%s8459_s2 + $0x30] sm:$0xff]  ;;  %v566_v61 = vld [vmem:[%s8459_s2 + $0x38] sm:$0xff]  ;;  %v572_v62 = vld [vmem:[%s8459_s2 + $0x68] sm:$0xff]  ;;  %v4723_v1 = vsel %vm527_vm0, 1.0, %v5044_v0  ;;  %v4724_v10 = vsel %vm528_vm1, 1.0, %v5044_v0  ;;  %v4725_v18 = vsel %vm529_vm2, 1.0, %v5044_v0  ;;  %vm530_vm3 = vcmp.lt.s32.totalorder %v5403_v20, %v5308_v53 }
  0x21   : > { %731 = vmatpush.msra.mxu2 %v591_v39  ;;  %771 = vmatpush.msra.mxu3 %v597_v40  ;;  %v508_v63 = vld [vmem:[%s5322_s18] sm:$0xff]  ;;  %v560_v3 = vld [vmem:[%s8459_s2 + $0x8] sm:$0xff]  ;;  %v561_v4 = vld [vmem:[%s8459_s2 + $0x10] sm:$0xff]  ;;  %v4726_v26 = vsel %vm530_vm3, 1.0, %v5044_v0  ;;  %vm531_vm4 = vcmp.lt.s32.totalorder %v5428_v28, %v5308_v53  ;;  %vm532_vm5 = vcmp.lt.s32.totalorder %v5447_v36, %v5308_v53 }
  0x22   : > { %650 = vmatpush.msra.mxu0 %v584_v41  ;;  %691 = vmatpush.msra.mxu1 %v585_v42  ;;  %v559_v2 = vld [vmem:[%s8459_s2] sm:$0xff]  ;;  %v5361_v7 = vmul.f32 %v4723_v1, %v508_v63  ;;  %v562_v8 = vld [vmem:[%s8459_s2 + $0x18] sm:$0xff]  ;;  %v509_v9 = vld [vmem:[%s5322_s18 + $0x8] sm:$0xff]  ;;  %v4727_v34 = vsel %vm531_vm4, 1.0, %v5044_v0  ;;  %v4728_v42 = vsel %vm532_vm5, 1.0, %v5044_v0 }
  0x23   : > { %732 = vmatpush.msra.mxu2 %v586_v43  ;;  %772 = vmatpush.msra.mxu3 %v592_v44  ;;  %v567_v6 = vld [vmem:[%s8459_s2 + $0x40] sm:$0xff]  ;;  %v638_v11 = vld [vmem:[%s8459_s2 + $0x278] sm:$0xff]  ;;  %v633_v13 = vld [vmem:[%s8459_s2 + $0x250] sm:$0xff]  ;;  %v5386_v15 = vmul.f32 %v4724_v10, %v509_v9  ;;  %v5463_v43 = vadd.s32 48, %v5293_v48 }
  0x24   : > { %651 = vmatpush.msra.mxu0 %v579_v45  ;;  %692 = vmatpush.msra.mxu1 %v580_v46  ;;  %v628_v14 = vld [vmem:[%s8459_s2 + $0x228] sm:$0xff]  ;;  %v623_v16 = vld [vmem:[%s8459_s2 + $0x200] sm:$0xff]  ;;  %v510_v17 = vld [vmem:[%s5322_s18 + $0x10] sm:$0xff] }
  0x25   : > { %733 = vmatpush.msra.mxu2 %v581_v47  ;;  %773 = vmatpush.msra.mxu3 %v587_v49  ;;  %v618_v19 = vld [vmem:[%s8459_s2 + $0x1d8] sm:$0xff]  ;;  %v613_v21 = vld [vmem:[%s8459_s2 + $0x1b0] sm:$0xff]  ;;  %v5408_v22 = vmul.f32 %v4725_v18, %v510_v17  ;;  %v608_v23 = vld [vmem:[%s8459_s2 + $0x188] sm:$0xff]  ;;  %vm533_vm6 = vcmp.lt.s32.totalorder %v5463_v43, %v5308_v53  ;;  %v5470_v47 = vadd.s32 56, %v5293_v48 }
  0x26   : > { %652 = vmatpush.msra.mxu0 %v574_v50  ;;  %693 = vmatpush.msra.mxu1 %v575_v51  ;;  %v603_v24 = vld [vmem:[%s8459_s2 + $0x160] sm:$0xff]  ;;  %v511_v25 = vld [vmem:[%s5322_s18 + $0x18] sm:$0xff]  ;;  %v593_v29 = vld [vmem:[%s8459_s2 + $0x110] sm:$0xff]  ;;  %v4729_v46 = vsel %vm533_vm6, 1.0, %v5044_v0 }
  0x27   : > { %734 = vmatpush.msra.mxu2 %v576_v52  ;;  %774 = vmatpush.msra.mxu3 %v582_v54  ;;  %v598_v27 = vld [vmem:[%s8459_s2 + $0x138] sm:$0xff]  ;;  %v554_v30 = vmul.f32 %v4726_v26, %v511_v25  ;;  %v588_v31 = vld [vmem:[%s8459_s2 + $0xe8] sm:$0xff]  ;;  %v583_v32 = vld [vmem:[%s8459_s2 + $0xc0] sm:$0xff]  ;;  %vm534_vm7 = vcmp.lt.s32.totalorder %v5470_v47, %v5308_v53 }
  0x28   : > { %653 = vmatpush.msra.mxu0 %v569_v55  ;;  %694 = vmatpush.msra.mxu1 %v570_v56  ;;  %v512_v33 = vld [vmem:[%s5322_s18 + $0x20] sm:$0xff]  ;;  %v578_v35 = vld [vmem:[%s8459_s2 + $0x98] sm:$0xff]  ;;  %v573_v37 = vld [vmem:[%s8459_s2 + $0x70] sm:$0xff]  ;;  %v4730_v51 = vsel %vm534_vm7, 1.0, %v5044_v0 }
  0x29   : > { %735 = vmatpush.msra.mxu2 %v571_v57  ;;  %775 = vmatpush.msra.mxu3 %v577_v58  ;;  %v555_v38 = vmul.f32 %v4727_v34, %v512_v33  ;;  %v568_v39 = vld [vmem:[%s8459_s2 + $0x48] sm:$0xff]  ;;  %v563_v40 = vld [vmem:[%s8459_s2 + $0x20] sm:$0xff]  ;;  %v514_v45 = vld [vmem:[%s5322_s18 + $0x30] sm:$0xff] }
  0x2a   : > { %654 = vmatpush.msra.mxu0 %v564_v59  ;;  %695 = vmatpush.msra.mxu1 %v565_v60  ;;  %v513_v41 = vld [vmem:[%s5322_s18 + $0x28] sm:$0xff]  ;;  %v557_v49 = vmul.f32 %v4729_v46, %v514_v45  ;;  %v515_v50 = vld [vmem:[%s5322_s18 + $0x38] sm:$0xff]  ;;  %v5495_v57 = vld [vmem:[%s8461_s4 + $0x70] sm:$0xff] }
  0x2b   : > { %736 = vmatpush.msra.mxu2 %v566_v61  ;;  %776 = vmatpush.msra.mxu3 %v572_v62  ;;  %v556_v44 = vmul.f32 %v4728_v42, %v513_v41  ;;  %v558_v52 = vmul.f32 %v4730_v51, %v515_v50  ;;  %v5488_v56 = vld [vmem:[%s8461_s4 + $0x78] sm:$0xff]  ;;  %v5501_v58 = vld [vmem:[%s8461_s4 + $0x68] sm:$0xff]  ;;  %v5509_v59 = vld [vmem:[%s8461_s4 + $0x60] sm:$0xff] }
  0x2c   : > { %655 = vmatpush.msra.mxu0 %v559_v2  ;;  %696 = vmatpush.msra.mxu1 %v560_v3  ;;  %v5518_v61 = vld [vmem:[%s8461_s4 + $0x58] sm:$0xff]  ;;  %v5525_v62 = vld [vmem:[%s8461_s4 + $0x50] sm:$0xff]  ;;  %v5531_v63 = vld [vmem:[%s8461_s4 + $0x48] sm:$0xff] }
  0x2d   : > { %737 = vmatpush.msra.mxu2 %v561_v4  ;;  %777 = vmatpush.msra.mxu3 %v567_v6  ;;  %v5539_v1 = vld [vmem:[%s8461_s4 + $0x40] sm:$0xff]  ;;  %v5548_v3 = vld [vmem:[%s8461_s4 + $0x38] sm:$0xff]  ;;  %v5555_v4 = vld [vmem:[%s8461_s4 + $0x30] sm:$0xff] }
  0x2e   : > { %656 = vmatmul.f32.vlgmr.msra.gmra.mxu0 %v5361_v7  ;;  %697 = vmatmul.f32.vlgmr.msra.gmra.mxu1 %v5361_v7 }
  0x2f   : > { %738 = vmatmul.f32.vlgmr.msra.gmra.mxu2 %v5361_v7  ;;  %778 = vmatpush.msra.mxu3 %v562_v8  ;;  %v5567_v8 = vld [vmem:[%s8461_s4 + $0x20] sm:$0xff] }
  0x30   : > { %779 = vmatmul.f32.vlgmr.msra.gmra.mxu3 %v5361_v7  ;;  %804 = vmatpush.msrb.mxu0 %v638_v11  ;;  %v5578_v11 = vld [vmem:[%s8461_s4 + $0x18] sm:$0xff] }
  0x31   : > { %1016 = vmatpush.msrb.mxu1 %v5488_v56  ;;  %1073 = vmatpush.msrb.mxu2 %v5488_v56 }
  0x32   : > { %805 = vmatpush.msrb.mxu0 %v633_v13 }
  0x33   : > { %1017 = vmatpush.msrb.mxu1 %v5495_v57  ;;  %1074 = vmatpush.msrb.mxu2 %v5495_v57 }
  0x34   : > { %806 = vmatpush.msrb.mxu0 %v628_v14  ;;  %v5585_v14 = vld [vmem:[%s8461_s4 + $0x10] sm:$0xff] }
  0x35   : > { %1018 = vmatpush.msrb.mxu1 %v5501_v58  ;;  %1075 = vmatpush.msrb.mxu2 %v5501_v58 }
  0x36   : > { %659 = vmatmul.f32.gmra.mxu0 %v5386_v15  ;;  %700 = vmatmul.f32.gmra.mxu1 %v5386_v15 }
  0x37   : > { %741 = vmatmul.f32.gmra.mxu2 %v5386_v15  ;;  %807 = vmatpush.msrb.mxu0 %v623_v16  ;;  %v5597_v16 = vld [vmem:[%s8461_s4] sm:$0xff] }
  0x38   : > { %782 = vmatmul.f32.gmra.mxu3 %v5386_v15  ;;  %1019 = vmatpush.msrb.mxu1 %v5509_v59 }
  0x39   : > { %808 = vmatpush.msrb.mxu0 %v618_v19  ;;  %1076 = vmatpush.msrb.mxu2 %v5509_v59 }
  0x3a   : > { %1020 = vmatpush.msrb.mxu1 %v5518_v61 }
  0x3b   : > { %809 = vmatpush.msrb.mxu0 %v613_v21  ;;  %1077 = vmatpush.msrb.mxu2 %v5518_v61 }
  0x3c   : > { %1021 = vmatpush.msrb.mxu1 %v5525_v62 }
  0x3d   : > { %810 = vmatpush.msrb.mxu0 %v608_v23  ;;  %1078 = vmatpush.msrb.mxu2 %v5525_v62 }
  0x3e   : > { %662 = vmatmul.f32.gmra.mxu0 %v5408_v22  ;;  %703 = vmatmul.f32.gmra.mxu1 %v5408_v22 }
  0x3f   : > { %744 = vmatmul.f32.gmra.mxu2 %v5408_v22  ;;  %811 = vmatpush.msrb.mxu0 %v603_v24 }
  0x40   : > { %785 = vmatmul.f32.gmra.mxu3 %v5408_v22  ;;  %1022 = vmatpush.msrb.mxu1 %v5531_v63 }
  0x41   : > { %812 = vmatpush.msrb.mxu0 %v598_v27  ;;  %1079 = vmatpush.msrb.mxu2 %v5531_v63 }
  0x42   : > { %1023 = vmatpush.msrb.mxu1 %v5539_v1 }
  0x43   : > { %813 = vmatpush.msrb.mxu0 %v593_v29  ;;  %1080 = vmatpush.msrb.mxu2 %v5539_v1 }
  0x44   : > { %1024 = vmatpush.msrb.mxu1 %v5548_v3 }
  0x45   : > { %814 = vmatpush.msrb.mxu0 %v588_v31  ;;  %1081 = vmatpush.msrb.mxu2 %v5548_v3 }
  0x46   : > { %665 = vmatmul.f32.gmra.mxu0 %v554_v30  ;;  %706 = vmatmul.f32.gmra.mxu1 %v554_v30 }
  0x47   : > { %747 = vmatmul.f32.gmra.mxu2 %v554_v30  ;;  %815 = vmatpush.msrb.mxu0 %v583_v32 }
  0x48   : > { %788 = vmatmul.f32.gmra.mxu3 %v554_v30  ;;  %1025 = vmatpush.msrb.mxu1 %v5555_v4 }
  0x49   : > { %816 = vmatpush.msrb.mxu0 %v578_v35  ;;  %1082 = vmatpush.msrb.mxu2 %v5555_v4 }
  0x4b   : > { %817 = vmatpush.msrb.mxu0 %v573_v37 }
  0x4d   : > { %818 = vmatpush.msrb.mxu0 %v568_v39 }
  0x4e   : > { %668 = vmatmul.f32.gmra.mxu0 %v555_v38  ;;  %709 = vmatmul.f32.gmra.mxu1 %v555_v38 }
  0x4f   : > { %750 = vmatmul.f32.gmra.mxu2 %v555_v38  ;;  %819 = vmatpush.msrb.mxu0 %v563_v40 }
  0x50   : > { %791 = vmatmul.f32.gmra.mxu3 %v555_v38 }
  0x56   : > { %671 = vmatmul.f32.gmra.mxu0 %v556_v44  ;;  %712 = vmatmul.f32.gmra.mxu1 %v556_v44 }
  0x57   : > { %753 = vmatmul.f32.gmra.mxu2 %v556_v44 }
  0x58   : > { %794 = vmatmul.f32.gmra.mxu3 %v556_v44 }
  0x5e   : > { %674 = vmatmul.f32.gmra.mxu0 %v557_v49  ;;  %715 = vmatmul.f32.gmra.mxu1 %v557_v49 }
  0x5f   : > { %756 = vmatmul.f32.gmra.mxu2 %v557_v49 }
  0x60   : > { %797 = vmatmul.f32.gmra.mxu3 %v557_v49 }
  0x66   : > { %677 = vmatmul.f32.gmra.mxu0 %v558_v52  ;;  %718 = vmatmul.f32.gmra.mxu1 %v558_v52 }
  0x67   : > { %759 = vmatmul.f32.gmra.mxu2 %v558_v52 }
  0x68   : > { %800 = vmatmul.f32.gmra.mxu3 %v558_v52 }
  0x6e   : > { %820 = vmatmul.f32.vlgmr.msrb.gmra.mxu0 %v5361_v7  ;;  %v5561_v7 = vld [vmem:[%s8461_s4 + $0x28] sm:$0xff] }
  0x6f   : > { %1026 = vmatpush.msrb.mxu1 %v5561_v7  ;;  %1083 = vmatpush.msrb.mxu2 %v5561_v7 }
  0x71   : > { %1027 = vmatpush.msrb.mxu1 %v5567_v8  ;;  %1084 = vmatpush.msrb.mxu2 %v5567_v8 }
  0x73   : > { %1028 = vmatpush.msrb.mxu1 %v5578_v11  ;;  %1085 = vmatpush.msrb.mxu2 %v5578_v11 }
  0x75   : > { %1029 = vmatpush.msrb.mxu1 %v5585_v14  ;;  %1086 = vmatpush.msrb.mxu2 %v5585_v14 }
  0x76   : > { %823 = vmatmul.f32.gmra.mxu0 %v5386_v15  ;;  %v5590_v15 = vld [vmem:[%s8461_s4 + $0x8] sm:$0xff] }
  0x77   : > { %1030 = vmatpush.msrb.mxu1 %v5590_v15  ;;  %1087 = vmatpush.msrb.mxu2 %v5590_v15 }
  0x79   : > { %1031 = vmatpush.msrb.mxu1 %v5597_v16  ;;  %1088 = vmatpush.msrb.mxu2 %v5597_v16 }
  0x7e   : > { %826 = vmatmul.f32.gmra.mxu0 %v5408_v22 }
  0x86   : > { %829 = vmatmul.f32.gmra.mxu0 %v554_v30 }
  0x8e   : > { %832 = vmatmul.f32.gmra.mxu0 %v555_v38 }
  0x96   : > { %835 = vmatmul.f32.gmra.mxu0 %v556_v44 }
  0x9e   : > { %838 = vmatmul.f32.gmra.mxu0 %v557_v49 }
  0xa6   : > { %841 = vmatmul.f32.gmra.mxu0 %v558_v52 }
  0xab   : > { %v5479_v53 = vpop.f32.mrf.mxu0  ;;  %v698_v6 = vpop.f32.mrf.mxu1 }
  0xac   : > { %v854_v25 = vrot.slane %v698_v6, 1  ;;  %v5615_v6 = vld [vmem:[%s8460_s3] ss:$0 sm:$0xff] }
  0xb2   : > { %v739_v9 = vpop.f32.mrf.mxu2 }
  0xb3   : > { %v5481_v54 = vpop.f32.mrf.mxu0  ;;  %v780_v13 = vpop.f32.mrf.mxu3  ;;  %v894_v29 = vrot.slane %v739_v9, 2 }
  0xb4   : > { %v701_v17 = vpop.f32.mrf.mxu1  ;;  %v934_v34 = vrot.slane %v780_v13, 3 }
  0xb5   : > { %v855_v26 = vrot.slane %v701_v17, 1 }
  0xb7   : > { %v856_v32 = vsel %vm853_vm8, %v854_v25, %v855_v26 }
  0xb8   : > { %v877_v38 = vadd.f32 %v856_v32, %v5479_v53 }
  0xba   : > { %v742_v18 = vpop.f32.mrf.mxu2 }
  0xbb   : > { %v5483_v55 = vpop.f32.mrf.mxu0  ;;  %v783_v21 = vpop.f32.mrf.mxu3  ;;  %v895_v30 = vrot.slane %v742_v18, 2 }
  0xbc   : > { %v704_v22 = vpop.f32.mrf.mxu1  ;;  %v935_v37 = vrot.slane %v783_v21, 3 }
  0xbd   : > { %v896_v35 = vsel %vm893_vm9, %v894_v29, %v895_v30  ;;  %v857_v40 = vrot.slane %v704_v22, 1 }
  0xbe   : > { %v917_v41 = vadd.f32 %v896_v35, %v877_v38  ;;  %v936_v42 = vsel %vm933_vm10, %v934_v34, %v935_v37 }
  0xbf   : > { %v858_v49 = vsel %vm853_vm8, %v855_v26, %v857_v40 }
  0xc0   : > { %v957_v52 = vadd.f32 %v936_v42, %v917_v41  ;;  %v878_v17 = vadd.f32 %v858_v49, %v5481_v54 }
  0xc2   : > { %v745_v24 = vpop.f32.mrf.mxu2 }
  0xc3   : > { %v5511_v60 = vpop.f32.mrf.mxu0  ;;  %v786_v27 = vpop.f32.mrf.mxu3  ;;  %v897_v44 = vrot.slane %v745_v24, 2 }
  0xc4   : > { %v707_v33 = vpop.f32.mrf.mxu1  ;;  %v937_v9 = vrot.slane %v786_v27, 3 }
  0xc5   : > { %v898_v53 = vsel %vm893_vm9, %v895_v30, %v897_v44  ;;  %v859_v22 = vrot.slane %v707_v33, 1 }
  0xc6   : > { %v918_v24 = vadd.f32 %v898_v53, %v878_v17  ;;  %v938_v29 = vsel %vm933_vm10, %v935_v37, %v937_v9 }
  0xc7   : > { %v860_v27 = vsel %vm853_vm8, %v857_v40, %v859_v22 }
  0xc8   : > { %v958_v35 = vadd.f32 %v938_v29, %v918_v24  ;;  %v879_v41 = vadd.f32 %v860_v27, %v5483_v55 }
  0xca   : > { %v748_v39 = vpop.f32.mrf.mxu2 }
  0xcb   : > { %v5541_v2 = vpop.f32.mrf.mxu0  ;;  %v789_v45 = vpop.f32.mrf.mxu3 }
  0xcc   : > { %v710_v18 = vpop.f32.mrf.mxu1  ;;  %v939_v38 = vrot.slane %v789_v45, 3 }
  0xd2   : > { %v751_v25 = vpop.f32.mrf.mxu2 }
  0xd3   : > { %v5571_v10 = vpop.f32.mrf.mxu0  ;;  %v792_v34 = vpop.f32.mrf.mxu3  ;;  %v901_v40 = vrot.slane %v751_v25, 2 }
  0xd4   : > { %v713_v37 = vpop.f32.mrf.mxu1 }
  0xd5   : > { %v863_v29 = vrot.slane %v713_v37, 1 }
  0xdb   : > { %v5601_v19 = vpop.f32.mrf.mxu0 }
  0xe3   : > { %v5605_v23 = vpop.f32.mrf.mxu0 }
  0xeb   : > { %v821_v31 = vpop.f32.mrf.mxu0 }
  0xec   : > { %v974_v50 = vrot.slane %v821_v31, 4  ;;  %v899_v31 = vrot.slane %v748_v39, 2 }
  0xee   : > { %v900_v54 = vsel %vm893_vm9, %v897_v44, %v899_v31  ;;  %v902_v55 = vsel %vm893_vm9, %v899_v31, %v901_v40 }
  0xef   : > { %v919_v49 = vadd.f32 %v900_v54, %v879_v41 }
  0xf3   : > { %v824_v46 = vpop.f32.mrf.mxu0 }
  0xf4   : > { %v975_v51 = vrot.slane %v824_v46, 4  ;;  %v861_v46 = vrot.slane %v710_v18, 1 }
  0xf6   : > { %v976_v13 = vsel %vm973_vm11, %v974_v50, %v975_v51  ;;  %v940_v50 = vsel %vm933_vm10, %v937_v9, %v939_v38  ;;  %v862_v44 = vsel %vm853_vm8, %v859_v22, %v861_v46  ;;  %v716_v22 = vpop.f32.mrf.mxu1  ;;  %v864_v31 = vsel %vm853_vm8, %v861_v46, %v863_v29 }
  0xf7   : > { %v997_v21 = vadd.f32 %v976_v13, %v957_v52  ;;  %v754_v52 = vpop.f32.mrf.mxu2  ;;  %v941_v13 = vrot.slane %v792_v34, 3  ;;  %v880_v18 = vadd.f32 %v862_v44, %v5511_v60  ;;  %v865_v37 = vrot.slane %v716_v22, 1 }
  0xf8   : > { %v903_v27 = vrot.slane %v754_v52, 2 }
  0xf9   : > { %v5621_v26 = vadd.f32 %v5615_v6, %v997_v21  ;;  %v795_v21 = vpop.f32.mrf.mxu3  ;;  %v920_v9 = vadd.f32 %v902_v55, %v880_v18 }
  0xfa   : > { %v904_v60 = vsel %vm893_vm9, %v901_v40, %v903_v27 }
  0xfb   : > { %v827_v32 = vpop.f32.mrf.mxu0  ;;  %1032 = vmatmul.f32.vlgmr.msrb.gmra.mxu1 %v5621_v26 }
  0xfc   : > { %v977_v30 = vrot.slane %v827_v32, 4  ;;  %v942_v32 = vsel %vm933_vm10, %v939_v38, %v941_v13 }
  0xfd   : > { %v960_v54 = vadd.f32 %v942_v32, %v920_v9 }
  0xfe   : > { %v978_v33 = vsel %vm973_vm11, %v975_v51, %v977_v30  ;;  %v959_v51 = vadd.f32 %v940_v50, %v919_v49  ;;  %v719_v40 = vpop.f32.mrf.mxu1 }
  0xff   : > { %v998_v42 = vadd.f32 %v978_v33, %v958_v35  ;;  %v943_v33 = vrot.slane %v795_v21, 3  ;;  %v867_v32 = vrot.slane %v719_v40, 1 }
 0x101   : > { %v5630_v39 = vadd.f32 %v5615_v6, %v998_v42  ;;  %v881_v42 = vadd.f32 %v864_v31, %v5541_v2  ;;  %v798_v50 = vpop.f32.mrf.mxu3 }
 0x102   : > { %v945_v18 = vrot.slane %v798_v50, 3 }
 0x103   : > { %v830_v53 = vpop.f32.mrf.mxu0  ;;  %1035 = vmatmul.f32.gmra.mxu1 %v5630_v39  ;;  %v921_v38 = vadd.f32 %v904_v60, %v881_v42 }
 0x104   : > { %v979_v45 = vrot.slane %v830_v53, 4  ;;  %v944_v53 = vsel %vm933_vm10, %v941_v13, %v943_v33 }
 0x106   : > { %v980_v17 = vsel %vm973_vm11, %v977_v30, %v979_v45  ;;  %v757_v30 = vpop.f32.mrf.mxu2 }
 0x107   : > { %v999_v24 = vadd.f32 %v980_v17, %v959_v51  ;;  %v905_v44 = vrot.slane %v757_v30, 2  ;;  %v866_v51 = vsel %vm853_vm8, %v863_v29, %v865_v37  ;;  %v961_v17 = vadd.f32 %v944_v53, %v921_v38 }
 0x108   : > { %v882_v21 = vadd.f32 %v866_v51, %v5571_v10 }
 0x109   : > { %v5639_v25 = vadd.f32 %v5615_v6, %v999_v24  ;;  %v801_v29 = vpop.f32.mrf.mxu3 }
 0x10b   : > { %v833_v35 = vpop.f32.mrf.mxu0  ;;  %1038 = vmatmul.f32.gmra.mxu1 %v5639_v25 }
 0x10c   : > { %v981_v34 = vrot.slane %v833_v35, 4  ;;  %v946_v35 = vsel %vm933_vm10, %v943_v33, %v945_v18 }
 0x10e   : > { %v982_v41 = vsel %vm973_vm11, %v979_v45, %v981_v34  ;;  %v906_v45 = vsel %vm893_vm9, %v903_v27, %v905_v44  ;;  %v760_v24 = vpop.f32.mrf.mxu2 }
 0x10f   : > { %v1000_v49 = vadd.f32 %v982_v41, %v960_v54  ;;  %v922_v22 = vadd.f32 %v906_v45, %v882_v21  ;;  %v907_v31 = vrot.slane %v760_v24, 2  ;;  %v868_v54 = vsel %vm853_vm8, %v865_v37, %v867_v32 }
 0x110   : > { %v947_v41 = vrot.slane %v801_v29, 3  ;;  %v883_v42 = vadd.f32 %v868_v54, %v5601_v19  ;;  %v884_v37 = vadd.f32 %v867_v32, %v5605_v23 }
 0x111   : > { %v1011_v52 = vadd.f32 %v5615_v6, %v1000_v49  ;;  %v962_v60 = vadd.f32 %v946_v35, %v922_v22 }
 0x112   : > { %v948_v33 = vsel %vm933_vm10, %v945_v18, %v947_v41 }
 0x113   : > { %v836_v46 = vpop.f32.mrf.mxu0  ;;  %1041 = vmatmul.f32.gmra.mxu1 %v1011_v52 }
 0x114   : > { %v983_v55 = vrot.slane %v836_v46, 4 }
 0x116   : > { %v984_v2 = vsel %vm973_vm11, %v981_v34, %v983_v55  ;;  %v908_v34 = vsel %vm893_vm9, %v905_v44, %v907_v31  ;;  %v924_v44 = vadd.f32 %v907_v31, %v884_v37  ;;  %v1302_v37 = vld [vmem:[%s8464_s7 + $0x240] sm:$0xff] }
 0x117   : > { %v1001_v9 = vadd.f32 %v984_v2, %v961_v17  ;;  %v923_v38 = vadd.f32 %v908_v34, %v883_v42 }
 0x118   : > { %v964_v45 = vadd.f32 %v947_v41, %v924_v44  ;;  %v1296_v44 = vld [vmem:[%s8464_s7 + $0x210] sm:$0xff] }
 0x119   : > { %v1012_v13 = vadd.f32 %v5615_v6, %v1001_v9  ;;  %v963_v51 = vadd.f32 %v948_v33, %v923_v38 }
 0x11b   : > { %v839_v30 = vpop.f32.mrf.mxu0  ;;  %1044 = vmatmul.f32.gmra.mxu1 %v1012_v13 }
 0x11c   : > { %v985_v27 = vrot.slane %v839_v30, 4  ;;  %v1307_v30 = vld [vmem:[%s8464_s7 + $0x268] sm:$0xff] }
 0x11d   : > { %1392 = vmatpush.msra.mxu1 %v1307_v30  ;;  %v1276_v30 = vld [vmem:[%s8464_s7 + $0x170] sm:$0xff] }
 0x11e   : > { %v986_v10 = vsel %vm973_vm11, %v983_v55, %v985_v27 }
 0x11f   : > { %v1002_v49 = vadd.f32 %v986_v10, %v962_v60  ;;  %1393 = vmatpush.msra.mxu1 %v1302_v37  ;;  %v1261_v37 = vld [vmem:[%s8464_s7 + $0xf8] sm:$0xff] }
 0x121   : > { %v1013_v50 = vadd.f32 %v5615_v6, %v1002_v49 }
 0x123   : > { %v842_v53 = vpop.f32.mrf.mxu0  ;;  %1047 = vmatmul.f32.gmra.mxu1 %v1013_v50 }
 0x124   : > { %v987_v46 = vrot.slane %v842_v53, 4 }
 0x126   : > { %v988_v40 = vsel %vm973_vm11, %v985_v27, %v987_v46  ;;  %v1004_v19 = vadd.f32 %v987_v46, %v964_v45  ;;  %v1301_v46 = vld [vmem:[%s8464_s7 + $0x238] sm:$0xff]  ;;  %v1290_v45 = vld [vmem:[%s8464_s7 + $0x1e0] sm:$0xff] }
 0x127   : > { %v1003_v17 = vadd.f32 %v988_v40, %v963_v51  ;;  %v1303_v51 = vld [vmem:[%s8464_s7 + $0x248] sm:$0xff] }
 0x128   : > { %v1015_v2 = vadd.f32 %v5615_v6, %v1004_v19  ;;  %v1295_v40 = vld [vmem:[%s8464_s7 + $0x208] sm:$0xff] }
 0x129   : > { %v1014_v55 = vadd.f32 %v5615_v6, %v1003_v17  ;;  %v1297_v17 = vld [vmem:[%s8464_s7 + $0x218] sm:$0xff]  ;;  %v1291_v19 = vld [vmem:[%s8464_s7 + $0x1e8] sm:$0xff] }
 0x12a   : > { %1394 = vmatpush.msra.mxu1 %v1297_v17  ;;  %v1256_v17 = vld [vmem:[%s8464_s7 + $0xd0] sm:$0xff] }
 0x12b   : > { %1050 = vmatmul.f32.gmra.mxu1 %v1014_v55 }
 0x133   : > { %1053 = vmatmul.f32.gmra.mxu1 %v1015_v2 }
 0x178   : > { %v1033_v21 = vpop.f32.mrf.mxu1 }
 0x179   : > { %v5666_v18 = vsub.f32 %v5621_v26, %v1033_v21  ;;  %v1293_v21 = vld [vmem:[%s8464_s7 + $0x1f8] sm:$0xff] }
 0x17b   : > { %v1065_v23 = vmul.f32 %v5666_v18, %v5666_v18 }
 0x17d   : > { %1089 = vmatmul.f32.vlgmr.msrb.gmra.mxu2 %v1065_v23  ;;  %v1285_v23 = vld [vmem:[%s8464_s7 + $0x1b8] sm:$0xff] }
 0x180   : > { %v1036_v24 = vpop.f32.mrf.mxu1 }
 0x181   : > { %v5671_v9 = vsub.f32 %v5630_v39, %v1036_v24  ;;  %v1305_v39 = vld [vmem:[%s8464_s7 + $0x258] sm:$0xff]  ;;  %v1286_v24 = vld [vmem:[%s8464_s7 + $0x1c0] sm:$0xff] }
 0x182   : > { %1311 = vmatpush.msrb.mxu3 %v1305_v39  ;;  %v1283_v39 = vld [vmem:[%s8464_s7 + $0x1a8] sm:$0xff] }
 0x183   : > { %v1066_v32 = vmul.f32 %v5671_v9, %v5671_v9 }
 0x185   : > { %1092 = vmatmul.f32.gmra.mxu2 %v1066_v32  ;;  %v1287_v32 = vld [vmem:[%s8464_s7 + $0x1c8] sm:$0xff] }
 0x188   : > { %v1039_v22 = vpop.f32.mrf.mxu1 }
 0x189   : > { %v5676_v6 = vsub.f32 %v5639_v25, %v1039_v22  ;;  %v1306_v25 = vld [vmem:[%s8464_s7 + $0x260] sm:$0xff]  ;;  %v1288_v22 = vld [vmem:[%s8464_s7 + $0x1d0] sm:$0xff] }
 0x18a   : > { %1351 = vmatpush.msra.mxu0 %v1306_v25  ;;  %v1275_v25 = vld [vmem:[%s8464_s7 + $0x168] sm:$0xff] }
 0x18b   : > { %v1067_v26 = vmul.f32 %v5676_v6, %v5676_v6 }
 0x18c   : > { %1352 = vmatpush.msra.mxu0 %v1301_v46  ;;  %v1260_v46 = vld [vmem:[%s8464_s7 + $0xf0] sm:$0xff] }
 0x18d   : > { %1095 = vmatmul.f32.gmra.mxu2 %v1067_v26  ;;  %v1280_v26 = vld [vmem:[%s8464_s7 + $0x190] sm:$0xff] }
 0x18e   : > { %1353 = vmatpush.msra.mxu0 %v1296_v44  ;;  %v1255_v44 = vld [vmem:[%s8464_s7 + $0xc8] sm:$0xff] }
 0x190   : > { %v1042_v35 = vpop.f32.mrf.mxu1  ;;  %1354 = vmatpush.msra.mxu0 %v1291_v19  ;;  %v1250_v19 = vld [vmem:[%s8464_s7 + $0xa0] sm:$0xff] }
 0x191   : > { %v5680_v31 = vsub.f32 %v1011_v52, %v1042_v35  ;;  %v1308_v52 = vld [vmem:[%s8464_s7 + $0x270] sm:$0xff]  ;;  %v1281_v35 = vld [vmem:[%s8464_s7 + $0x198] sm:$0xff] }
 0x192   : > { %1433 = vmatpush.msra.mxu2 %v1308_v52  ;;  %1355 = vmatpush.msra.mxu0 %v1286_v24  ;;  %v1277_v52 = vld [vmem:[%s8464_s7 + $0x178] sm:$0xff] }
 0x193   : > { %v1068_v29 = vmul.f32 %v5680_v31, %v5680_v31  ;;  %v1245_v24 = vld [vmem:[%s8464_s7 + $0x78] sm:$0xff] }
 0x194   : > { %1434 = vmatpush.msra.mxu2 %v1303_v51  ;;  %1356 = vmatpush.msra.mxu0 %v1281_v35  ;;  %v1262_v51 = vld [vmem:[%s8464_s7 + $0x100] sm:$0xff]  ;;  %v1240_v35 = vld [vmem:[%s8464_s7 + $0x50] sm:$0xff] }
 0x195   : > { %1098 = vmatmul.f32.gmra.mxu2 %v1068_v29  ;;  %v1282_v29 = vld [vmem:[%s8464_s7 + $0x1a0] sm:$0xff] }
 0x196   : > { %1357 = vmatpush.msra.mxu0 %v1276_v30  ;;  %v1235_v30 = vld [vmem:[%s8464_s7 + $0x28] sm:$0xff] }
 0x198   : > { %v1045_v54 = vpop.f32.mrf.mxu1 }
 0x199   : > { %v5696_v27 = vsub.f32 %v1012_v13, %v1045_v54  ;;  %v1278_v54 = vld [vmem:[%s8464_s7 + $0x180] sm:$0xff] }
 0x19b   : > { %v1069_v60 = vmul.f32 %v5696_v27, %v5696_v27 }
 0x19d   : > { %1101 = vmatmul.f32.gmra.mxu2 %v1069_v60  ;;  %v1270_v60 = vld [vmem:[%s8464_s7 + $0x140] sm:$0xff] }
 0x1a0   : > { %v1048_v34 = vpop.f32.mrf.mxu1 }
 0x1a1   : > { %v5700_v41 = vsub.f32 %v1013_v50, %v1048_v34  ;;  %v1300_v50 = vld [vmem:[%s8464_s7 + $0x230] sm:$0xff]  ;;  %v1271_v34 = vld [vmem:[%s8464_s7 + $0x148] sm:$0xff] }
 0x1a2   : > { %1312 = vmatpush.msrb.mxu3 %v1300_v50  ;;  %1358 = vmatpush.msra.mxu0 %v1271_v34  ;;  %v1268_v50 = vld [vmem:[%s8464_s7 + $0x130] sm:$0xff]  ;;  %v1230_v34 = vld [vmem:[%s8464_s7] sm:$0xff] }
 0x1a3   : > { %v1070_v10 = vmul.f32 %v5700_v41, %v5700_v41 }
 0x1a4   : > { %1313 = vmatpush.msrb.mxu3 %v1295_v40  ;;  %v1263_v40 = vld [vmem:[%s8464_s7 + $0x108] sm:$0xff] }
 0x1a5   : > { %1104 = vmatmul.f32.gmra.mxu2 %v1070_v10  ;;  %v1272_v10 = vld [vmem:[%s8464_s7 + $0x150] sm:$0xff] }
 0x1a6   : > { %1314 = vmatpush.msrb.mxu3 %v1290_v45  ;;  %v1258_v45 = vld [vmem:[%s8464_s7 + $0xe0] sm:$0xff] }
 0x1a8   : > { %v1051_v42 = vpop.f32.mrf.mxu1  ;;  %1315 = vmatpush.msrb.mxu3 %v1285_v23  ;;  %v1253_v23 = vld [vmem:[%s8464_s7 + $0xb8] sm:$0xff] }
 0x1a9   : > { %v5704_v49 = vsub.f32 %v1014_v55, %v1051_v42  ;;  %v1298_v55 = vld [vmem:[%s8464_s7 + $0x220] sm:$0xff]  ;;  %v1273_v42 = vld [vmem:[%s8464_s7 + $0x158] sm:$0xff] }
 0x1aa   : > { %1435 = vmatpush.msra.mxu2 %v1298_v55  ;;  %1316 = vmatpush.msrb.mxu3 %v1280_v26  ;;  %v1257_v55 = vld [vmem:[%s8464_s7 + $0xd8] sm:$0xff]  ;;  %v1248_v26 = vld [vmem:[%s8464_s7 + $0x90] sm:$0xff] }
 0x1ab   : > { %v1071_v38 = vmul.f32 %v5704_v49, %v5704_v49 }
 0x1ac   : > { %1436 = vmatpush.msra.mxu2 %v1293_v21  ;;  %1317 = vmatpush.msrb.mxu3 %v1275_v25  ;;  %v1252_v21 = vld [vmem:[%s8464_s7 + $0xb0] sm:$0xff]  ;;  %v1243_v25 = vld [vmem:[%s8464_s7 + $0x68] sm:$0xff] }
 0x1ad   : > { %1107 = vmatmul.f32.gmra.mxu2 %v1071_v38  ;;  %v1265_v38 = vld [vmem:[%s8464_s7 + $0x118] sm:$0xff] }
 0x1ae   : > { %1437 = vmatpush.msra.mxu2 %v1288_v22  ;;  %1318 = vmatpush.msrb.mxu3 %v1270_v60  ;;  %v1247_v22 = vld [vmem:[%s8464_s7 + $0x88] sm:$0xff]  ;;  %v1238_v60 = vld [vmem:[%s8464_s7 + $0x40] sm:$0xff] }
 0x1b0   : > { %v1054_v13 = vpop.f32.mrf.mxu1  ;;  %1438 = vmatpush.msra.mxu2 %v1283_v39  ;;  %1319 = vmatpush.msrb.mxu3 %v1265_v38  ;;  %v1242_v39 = vld [vmem:[%s8464_s7 + $0x60] sm:$0xff]  ;;  %v1233_v38 = vld [vmem:[%s8464_s7 + $0x18] sm:$0xff] }
 0x1b1   : > { %v5708_v33 = vsub.f32 %v1015_v2, %v1054_v13  ;;  %v1292_v2 = vld [vmem:[%s8464_s7 + $0x1f0] sm:$0xff]  ;;  %v1266_v13 = vld [vmem:[%s8464_s7 + $0x120] sm:$0xff] }
 0x1b2   : > { %1395 = vmatpush.msra.mxu1 %v1292_v2  ;;  %1439 = vmatpush.msra.mxu2 %v1278_v54  ;;  %v1251_v2 = vld [vmem:[%s8464_s7 + $0xa8] sm:$0xff]  ;;  %v1237_v54 = vld [vmem:[%s8464_s7 + $0x38] sm:$0xff] }
 0x1b3   : > { %v1072_v53 = vmul.f32 %v5708_v33, %v5708_v33  ;;  %1359 = vmatpush.msra.mxu0 %v1266_v13  ;;  %1320 = vmatpush.msrb.mxu3 %v1260_v46 }
 0x1b4   : > { %1396 = vmatpush.msra.mxu1 %v1287_v32  ;;  %1440 = vmatpush.msra.mxu2 %v1273_v42  ;;  %v1246_v32 = vld [vmem:[%s8464_s7 + $0x80] sm:$0xff]  ;;  %v1232_v42 = vld [vmem:[%s8464_s7 + $0x10] sm:$0xff] }
 0x1b5   : > { %1110 = vmatmul.f32.gmra.mxu2 %v1072_v53  ;;  %v1267_v53 = vld [vmem:[%s8464_s7 + $0x128] sm:$0xff]  ;;  %1360 = vmatpush.msra.mxu0 %v1261_v37 }
 0x1b6   : > { %1397 = vmatpush.msra.mxu1 %v1282_v29  ;;  %1441 = vmatpush.msra.mxu2 %v1268_v50  ;;  %v1241_v29 = vld [vmem:[%s8464_s7 + $0x58] sm:$0xff] }
 0x1b7   : > { %1321 = vmatpush.msrb.mxu3 %v1255_v44  ;;  %1361 = vmatpush.msra.mxu0 %v1256_v17 }
 0x1b8   : > { %1398 = vmatpush.msra.mxu1 %v1277_v52  ;;  %1442 = vmatpush.msra.mxu2 %v1263_v40  ;;  %v1236_v52 = vld [vmem:[%s8464_s7 + $0x30] sm:$0xff] }
 0x1b9   : > { %1322 = vmatpush.msrb.mxu3 %v1250_v19  ;;  %1362 = vmatpush.msra.mxu0 %v1251_v2 }
 0x1ba   : > { %1399 = vmatpush.msra.mxu1 %v1272_v10  ;;  %1443 = vmatpush.msra.mxu2 %v1258_v45  ;;  %v1231_v10 = vld [vmem:[%s8464_s7 + $0x8] sm:$0xff] }
 0x1bb   : > { %1323 = vmatpush.msrb.mxu3 %v1245_v24  ;;  %1363 = vmatpush.msra.mxu0 %v1246_v32 }
 0x1bc   : > { %1400 = vmatpush.msra.mxu1 %v1267_v53  ;;  %1444 = vmatpush.msra.mxu2 %v1253_v23 }
 0x1bd   : > { %1324 = vmatpush.msrb.mxu3 %v1240_v35  ;;  %1364 = vmatpush.msra.mxu0 %v1241_v29  ;;  %v1304_v29 = vld [vmem:[%s8464_s7 + $0x250] sm:$0xff] }
 0x1be   : > { %1401 = vmatpush.msra.mxu1 %v1262_v51  ;;  %1445 = vmatpush.msra.mxu2 %v1248_v26  ;;  %v1309_v26 = vld [vmem:[%s8464_s7 + $0x278] sm:$0xff] }
 0x1bf   : > { %1325 = vmatpush.msrb.mxu3 %v1235_v30  ;;  %1365 = vmatpush.msra.mxu0 %v1236_v52 }
 0x1c0   : > { %1402 = vmatpush.msra.mxu1 %v1257_v55  ;;  %1446 = vmatpush.msra.mxu2 %v1243_v25 }
 0x1c1   : > { %1326 = vmatpush.msrb.mxu3 %v1230_v34  ;;  %1366 = vmatpush.msra.mxu0 %v1231_v10 }
 0x1c2   : > { %1403 = vmatpush.msra.mxu1 %v1252_v21  ;;  %1447 = vmatpush.msra.mxu2 %v1238_v60  ;;  %v1299_v60 = vld [vmem:[%s8464_s7 + $0x228] sm:$0xff] }
 0x1c3   : > { %1474 = vmatpush.msra.mxu3 %v1309_v26 }
 0x1c4   : > { %1404 = vmatpush.msra.mxu1 %v1247_v22  ;;  %1448 = vmatpush.msra.mxu2 %v1233_v38 }
 0x1c5   : > { %1475 = vmatpush.msra.mxu3 %v1304_v29 }
 0x1c6   : > { %1405 = vmatpush.msra.mxu1 %v1242_v39  ;;  %1791 = vmatpush.msrb.mxu2 %v5488_v56 }
 0x1c7   : > { %1476 = vmatpush.msra.mxu3 %v1299_v60 }
 0x1c8   : > { %1406 = vmatpush.msra.mxu1 %v1237_v54  ;;  %1792 = vmatpush.msrb.mxu2 %v5495_v57 }
 0x1ca   : > { %1407 = vmatpush.msra.mxu1 %v1232_v42  ;;  %1793 = vmatpush.msrb.mxu2 %v5501_v58  ;;  %v1294_v42 = vld [vmem:[%s8464_s7 + $0x200] sm:$0xff] }
 0x1cb   : > { %1477 = vmatpush.msra.mxu3 %v1294_v42  ;;  %v1249_v42 = vld [vmem:[%s8464_s7 + $0x98] sm:$0xff] }
 0x1cc   : > { %1754 = vmatpush.msrb.mxu1 %v5488_v56  ;;  %1794 = vmatpush.msrb.mxu2 %v5509_v59 }
 0x1ce   : > { %1755 = vmatpush.msrb.mxu1 %v5495_v57  ;;  %1795 = vmatpush.msrb.mxu2 %v5518_v61 }
 0x1d0   : > { %1756 = vmatpush.msrb.mxu1 %v5501_v58  ;;  %1796 = vmatpush.msrb.mxu2 %v5525_v62 }
 0x1d2   : > { %1757 = vmatpush.msrb.mxu1 %v5509_v59  ;;  %1797 = vmatpush.msrb.mxu2 %v5531_v63 }
 0x1d4   : > { %1758 = vmatpush.msrb.mxu1 %v5518_v61  ;;  %1798 = vmatpush.msrb.mxu2 %v5539_v1 }
 0x1d6   : > { %1759 = vmatpush.msrb.mxu1 %v5525_v62  ;;  %1799 = vmatpush.msrb.mxu2 %v5548_v3 }
 0x1d8   : > { %1760 = vmatpush.msrb.mxu1 %v5531_v63  ;;  %1800 = vmatpush.msrb.mxu2 %v5555_v4 }
 0x1da   : > { %1761 = vmatpush.msrb.mxu1 %v5539_v1  ;;  %v5915_v1 = vld [vmem:[%s8462_s5] ss:$0 sm:$0xff]  ;;  %1801 = vmatpush.msrb.mxu2 %v5561_v7 }
 0x1dc   : > { %1762 = vmatpush.msrb.mxu1 %v5548_v3  ;;  %1802 = vmatpush.msrb.mxu2 %v5567_v8 }
 0x1de   : > { %1763 = vmatpush.msrb.mxu1 %v5555_v4  ;;  %v5923_v4 = vld [vmem:[%s8463_s6] ss:$0 sm:$0xff]  ;;  %1803 = vmatpush.msrb.mxu2 %v5578_v11 }
 0x1e0   : > { %1764 = vmatpush.msrb.mxu1 %v5561_v7  ;;  %1804 = vmatpush.msrb.mxu2 %v5585_v14 }
 0x1e2   : > { %1765 = vmatpush.msrb.mxu1 %v5567_v8  ;;  %1805 = vmatpush.msrb.mxu2 %v5590_v15 }
 0x1e4   : > { %1766 = vmatpush.msrb.mxu1 %v5578_v11  ;;  %1806 = vmatpush.msrb.mxu2 %v5597_v16 }
 0x1e6   : > { %1767 = vmatpush.msrb.mxu1 %v5585_v14 }
 0x1e8   : > { %1768 = vmatpush.msrb.mxu1 %v5590_v15 }
 0x1ea   : > { %1769 = vmatpush.msrb.mxu1 %v5597_v16 }
 0x200   : > { %v1090_v13 = vpop.f32.mrf.mxu2 }
 0x201   : > { %v1091_v53 = vadd.f32 1e-05, %v1090_v13 }
 0x203   : > { %4964 = vrsqrt.f32 %v1091_v53  ;;  %vm1120_vm13 = vweird.f32 %v1091_v53 }
 0x208   : > { %v1093_v56 = vpop.f32.mrf.mxu2 }
 0x209   : > { %v4965_v50 = vpop.eup %4964  ;;  %v1094_v46 = vadd.f32 1e-05, %v1093_v56 }
 0x20a   : > { %v1115_v57 = vmul.f32 %v4965_v50, %v1091_v53  ;;  %vm1121_vm12 = vweird.f32 %v4965_v50  ;;  %v1289_v53 = vld [vmem:[%s8464_s7 + $0x1d8] sm:$0xff] }
 0x20b   : > { %4966 = vrsqrt.f32 %v1094_v46  ;;  %vm1122_vm14 = vmor %vm1120_vm13, %vm1121_vm12  ;;  %vm1130_vm0 = vweird.f32 %v1094_v46  ;;  %1478 = vmatpush.msra.mxu3 %v1289_v53  ;;  %v1244_v53 = vld [vmem:[%s8464_s7 + $0x70] sm:$0xff] }
 0x20c   : > { %v1116_v58 = vmul.f32 %v4965_v50, %v1115_v57 }
 0x20e   : > { %v1117_v59 = vmul.f32 0.5, %v1116_v58 }
 0x210   : > { %v1118_v61 = vsub.f32 1.5, %v1117_v59  ;;  %v1096_v37 = vpop.f32.mrf.mxu2 }
 0x211   : > { %v4967_v62 = vpop.eup %4966  ;;  %v1097_v51 = vadd.f32 1e-05, %v1096_v37 }
 0x212   : > { %v1119_v63 = vmul.f32 %v4965_v50, %v1118_v61  ;;  %v1125_v40 = vmul.f32 %v4967_v62, %v1094_v46  ;;  %vm1131_vm15 = vweird.f32 %v4967_v62 }
 0x213   : > { %4968 = vrsqrt.f32 %v1097_v51  ;;  %vm1132_vm1 = vmor %vm1130_vm0, %vm1131_vm15  ;;  %vm1140_vm3 = vweird.f32 %v1097_v51 }
 0x214   : > { %v1123_v3 = vsel %vm1122_vm14, %v4965_v50, %v1119_v63  ;;  %v1126_v44 = vmul.f32 %v4967_v62, %v1125_v40  ;;  %v1279_v40 = vld [vmem:[%s8464_s7 + $0x188] sm:$0xff] }
 0x215   : > { %v1194_v17 = vmul.f32 %v1123_v3, %v5666_v18 }
 0x216   : > { %v1127_v55 = vmul.f32 0.5, %v1126_v44 }
 0x217   : > { %v1204_v45 = vmul.f32 %v5915_v1, %v1194_v17  ;;  %v1274_v17 = vld [vmem:[%s8464_s7 + $0x160] sm:$0xff] }
 0x218   : > { %v1128_v7 = vsub.f32 1.5, %v1127_v55  ;;  %v1099_v19 = vpop.f32.mrf.mxu2 }
 0x219   : > { %v4969_v18 = vpop.eup %4968  ;;  %v5930_v2 = vadd.f32 1e-05, %v1099_v19  ;;  %v1214_v21 = vadd.f32 %v5923_v4, %v1204_v45 }
 0x21a   : > { %v1129_v8 = vmul.f32 %v4967_v62, %v1128_v7  ;;  %v1135_v23 = vmul.f32 %v4969_v18, %v1097_v51  ;;  %vm1141_vm2 = vweird.f32 %v4969_v18 }
 0x21b   : > { %4970 = vrsqrt.f32 %v5930_v2  ;;  %v5936_v24 = vmax.f32 %v1214_v21, 0.0  ;;  %vm1142_vm4 = vmor %vm1140_vm3, %vm1141_vm2  ;;  %vm1150_vm6 = vweird.f32 %v5930_v2 }
 0x21c   : > { %v1133_v11 = vsel %vm1132_vm1, %v4967_v62, %v1129_v8  ;;  %v1136_v32 = vmul.f32 %v4969_v18, %v1135_v23 }
 0x21d   : > { %v1195_v22 = vmul.f32 %v1133_v11, %v5671_v9  ;;  %1327 = vmatmul.f32.vlgmr.msrb.gmra.mxu3 %v5936_v24  ;;  %1367 = vmatmul.f32.vlgmr.msra.gmra.mxu0 %v5936_v24 }
 0x21e   : > { %v1137_v14 = vmul.f32 0.5, %v1136_v32  ;;  %1408 = vmatmul.f32.vlgmr.msra.gmra.mxu1 %v5936_v24  ;;  %1449 = vmatmul.f32.vlgmr.msra.gmra.mxu2 %v5936_v24 }
 0x21f   : > { %v1205_v35 = vmul.f32 %v5915_v1, %v1195_v22  ;;  %v1264_v22 = vld [vmem:[%s8464_s7 + $0x110] sm:$0xff] }
 0x220   : > { %v1138_v15 = vsub.f32 1.5, %v1137_v14  ;;  %v1102_v9 = vpop.f32.mrf.mxu2 }
 0x221   : > { %v4971_v39 = vpop.eup %4970  ;;  %v1103_v25 = vadd.f32 1e-05, %v1102_v9  ;;  %v1215_v30 = vadd.f32 %v5923_v4, %v1205_v35  ;;  %v1259_v35 = vld [vmem:[%s8464_s7 + $0xe8] sm:$0xff] }
 0x222   : > { %v1139_v52 = vmul.f32 %v4969_v18, %v1138_v15  ;;  %v1145_v54 = vmul.f32 %v4971_v39, %v5930_v2  ;;  %vm1151_vm5 = vweird.f32 %v4971_v39 }
 0x223   : > { %4972 = vrsqrt.f32 %v1103_v25  ;;  %v5959_v34 = vmax.f32 %v1215_v30, 0.0  ;;  %vm1152_vm7 = vmor %vm1150_vm6, %vm1151_vm5  ;;  %vm1160_vm13 = vweird.f32 %v1103_v25 }
 0x224   : > { %v1143_v10 = vsel %vm1142_vm4, %v4969_v18, %v1139_v52  ;;  %v1146_v16 = vmul.f32 %v4971_v39, %v1145_v54 }
 0x225   : > { %v1196_v38 = vmul.f32 %v1143_v10, %v5676_v6  ;;  %1330 = vmatmul.f32.gmra.mxu3 %v5959_v34  ;;  %1370 = vmatmul.f32.gmra.mxu0 %v5959_v34  ;;  %v1284_v6 = vld [vmem:[%s8464_s7 + $0x1b0] sm:$0xff] }
 0x226   : > { %v1147_v13 = vmul.f32 0.5, %v1146_v16  ;;  %1411 = vmatmul.f32.gmra.mxu1 %v5959_v34  ;;  %1452 = vmatmul.f32.gmra.mxu2 %v5959_v34 }
 0x227   : > { %v1206_v56 = vmul.f32 %v5915_v1, %v1196_v38  ;;  %1479 = vmatpush.msra.mxu3 %v1284_v6 }
 0x228   : > { %v1148_v50 = vsub.f32 1.5, %v1147_v13  ;;  %v1105_v46 = vpop.f32.mrf.mxu2 }
 0x229   : > { %v4973_v57 = vpop.eup %4972  ;;  %v1106_v58 = vadd.f32 1e-05, %v1105_v46  ;;  %v1216_v59 = vadd.f32 %v5923_v4, %v1206_v56  ;;  %1480 = vmatpush.msra.mxu3 %v1279_v40  ;;  %v1239_v46 = vld [vmem:[%s8464_s7 + $0x48] sm:$0xff] }
 0x22a   : > { %v1149_v61 = vmul.f32 %v4971_v39, %v1148_v50  ;;  %v1155_v37 = vmul.f32 %v4973_v57, %v1103_v25  ;;  %vm1161_vm12 = vweird.f32 %v4973_v57 }
 0x22b   : > { %4974 = vrsqrt.f32 %v1106_v58  ;;  %v5978_v62 = vmax.f32 %v1216_v59, 0.0  ;;  %1481 = vmatpush.msra.mxu3 %v1274_v17  ;;  %vm1162_vm14 = vmor %vm1160_vm13, %vm1161_vm12  ;;  %vm1170_vm0 = vweird.f32 %v1106_v58  ;;  %vm1709_vm12 = vcmask 449536  }
 0x22c   : > { %v1153_v51 = vsel %vm1152_vm7, %v4971_v39, %v1149_v61  ;;  %v1156_v63 = vmul.f32 %v4973_v57, %v1155_v37 }
 0x22d   : > { %v1197_v3 = vmul.f32 %v1153_v51, %v5680_v31  ;;  %1333 = vmatmul.f32.gmra.mxu3 %v5978_v62  ;;  %1373 = vmatmul.f32.gmra.mxu0 %v5978_v62  ;;  %v1269_v31 = vld [vmem:[%s8464_s7 + $0x138] sm:$0xff]  ;;  %v1234_v51 = vld [vmem:[%s8464_s7 + $0x20] sm:$0xff] }
 0x22e   : > { %v1157_v44 = vmul.f32 0.5, %v1156_v63  ;;  %1414 = vmatmul.f32.gmra.mxu1 %v5978_v62  ;;  %1455 = vmatmul.f32.gmra.mxu2 %v5978_v62 }
 0x22f   : > { %v1207_v55 = vmul.f32 %v5915_v1, %v1197_v3  ;;  %1482 = vmatpush.msra.mxu3 %v1269_v31 }
 0x230   : > { %v1158_v45 = vsub.f32 1.5, %v1157_v44  ;;  %v1108_v7 = vpop.f32.mrf.mxu2 }
 0x231   : > { %v4975_v19 = vpop.eup %4974  ;;  %v1109_v18 = vadd.f32 1e-05, %v1108_v7  ;;  %v1217_v2 = vadd.f32 %v5923_v4, %v1207_v55  ;;  %1483 = vmatpush.msra.mxu3 %v1264_v22 }
 0x232   : > { %v1159_v21 = vmul.f32 %v4973_v57, %v1158_v45  ;;  %v1165_v8 = vmul.f32 %v4975_v19, %v1106_v58  ;;  %vm1171_vm15 = vweird.f32 %v4975_v19 }
 0x233   : > { %4976 = vrsqrt.f32 %v1109_v18  ;;  %v5996_v23 = vmax.f32 %v1217_v2, 0.0  ;;  %1484 = vmatpush.msra.mxu3 %v1259_v35  ;;  %vm1172_vm1 = vmor %vm1170_vm0, %vm1171_vm15  ;;  %vm1180_vm3 = vweird.f32 %v1109_v18 }
 0x234   : > { %v1163_v11 = vsel %vm1162_vm14, %v4973_v57, %v1159_v21  ;;  %v1166_v32 = vmul.f32 %v4975_v19, %v1165_v8 }
 0x235   : > { %v1198_v14 = vmul.f32 %v1163_v11, %v5696_v27  ;;  %1336 = vmatmul.f32.gmra.mxu3 %v5996_v23  ;;  %1376 = vmatmul.f32.gmra.mxu0 %v5996_v23  ;;  %v1254_v27 = vld [vmem:[%s8464_s7 + $0xc0] sm:$0xff] }
 0x236   : > { %v1167_v26 = vmul.f32 0.5, %v1166_v32  ;;  %1417 = vmatmul.f32.gmra.mxu1 %v5996_v23  ;;  %1458 = vmatmul.f32.gmra.mxu2 %v5996_v23 }
 0x237   : > { %v1208_v15 = vmul.f32 %v5915_v1, %v1198_v14  ;;  %1485 = vmatpush.msra.mxu3 %v1254_v27 }
 0x238   : > { %v1168_v9 = vsub.f32 1.5, %v1167_v26  ;;  %v1111_v29 = vpop.f32.mrf.mxu2 }
 0x239   : > { %v4977_v39 = vpop.eup %4976  ;;  %v1112_v25 = vadd.f32 1e-05, %v1111_v29  ;;  %v1218_v30 = vadd.f32 %v5923_v4, %v1208_v15  ;;  %1486 = vmatpush.msra.mxu3 %v1249_v42 }
 0x23a   : > { %v1169_v52 = vmul.f32 %v4975_v19, %v1168_v9  ;;  %v1175_v54 = vmul.f32 %v4977_v39, %v1109_v18  ;;  %vm1181_vm2 = vweird.f32 %v4977_v39 }
 0x23b   : > { %4978 = vrsqrt.f32 %v1112_v25  ;;  %v1226_v60 = vmax.f32 %v1218_v30, 0.0  ;;  %1487 = vmatpush.msra.mxu3 %v1244_v53  ;;  %vm1182_vm4 = vmor %vm1180_vm3, %vm1181_vm2  ;;  %vm1190_vm6 = vweird.f32 %v1112_v25 }
 0x23c   : > { %v1173_v10 = vsel %vm1172_vm1, %v4975_v19, %v1169_v52  ;;  %v1176_v16 = vmul.f32 %v4977_v39, %v1175_v54 }
 0x23d   : > { %v1199_v38 = vmul.f32 %v1173_v10, %v5700_v41  ;;  %1339 = vmatmul.f32.gmra.mxu3 %v1226_v60  ;;  %1379 = vmatmul.f32.gmra.mxu0 %v1226_v60 }
 0x23e   : > { %v1177_v13 = vmul.f32 0.5, %v1176_v16  ;;  %1420 = vmatmul.f32.gmra.mxu1 %v1226_v60  ;;  %1461 = vmatmul.f32.gmra.mxu2 %v1226_v60 }
 0x23f   : > { %v1209_v56 = vmul.f32 %v5915_v1, %v1199_v38  ;;  %1488 = vmatpush.msra.mxu3 %v1239_v46 }
 0x240   : > { %v1178_v50 = vsub.f32 1.5, %v1177_v13 }
 0x241   : > { %v4979_v6 = vpop.eup %4978  ;;  %v1219_v41 = vadd.f32 %v5923_v4, %v1209_v56  ;;  %1489 = vmatpush.msra.mxu3 %v1234_v51 }
 0x242   : > { %v1179_v57 = vmul.f32 %v4977_v39, %v1178_v50  ;;  %v1185_v58 = vmul.f32 %v4979_v6, %v1112_v25  ;;  %vm1191_vm5 = vweird.f32 %v4979_v6 }
 0x243   : > { %v1227_v59 = vmax.f32 %v1219_v41, 0.0  ;;  %vm1192_vm7 = vmor %vm1190_vm6, %vm1191_vm5 }
 0x244   : > { %v1183_v61 = vsel %vm1182_vm4, %v4977_v39, %v1179_v57  ;;  %v1186_v37 = vmul.f32 %v4979_v6, %v1185_v58 }
 0x245   : > { %v1200_v63 = vmul.f32 %v1183_v61, %v5704_v49  ;;  %1342 = vmatmul.f32.gmra.mxu3 %v1227_v59  ;;  %1382 = vmatmul.f32.gmra.mxu0 %v1227_v59 }
 0x246   : > { %v1187_v40 = vmul.f32 0.5, %v1186_v37  ;;  %1423 = vmatmul.f32.gmra.mxu1 %v1227_v59  ;;  %1464 = vmatmul.f32.gmra.mxu2 %v1227_v59 }
 0x247   : > { %v1210_v3 = vmul.f32 %v5915_v1, %v1200_v63 }
 0x248   : > { %v1188_v44 = vsub.f32 1.5, %v1187_v40 }
 0x249   : > { %v1220_v17 = vadd.f32 %v5923_v4, %v1210_v3 }
 0x24a   : > { %v1189_v55 = vmul.f32 %v4979_v6, %v1188_v44 }
 0x24b   : > { %v1228_v45 = vmax.f32 %v1220_v17, 0.0 }
 0x24c   : > { %v1193_v7 = vsel %vm1192_vm7, %v4979_v6, %v1189_v55 }
 0x24d   : > { %v1201_v31 = vmul.f32 %v1193_v7, %v5708_v33  ;;  %1345 = vmatmul.f32.gmra.mxu3 %v1228_v45  ;;  %1385 = vmatmul.f32.gmra.mxu0 %v1228_v45 }
 0x24e   : > { %1426 = vmatmul.f32.gmra.mxu1 %v1228_v45  ;;  %1467 = vmatmul.f32.gmra.mxu2 %v1228_v45 }
 0x24f   : > { %v1211_v49 = vmul.f32 %v5915_v1, %v1201_v31 }
 0x251   : > { %v1221_v19 = vadd.f32 %v5923_v4, %v1211_v49 }
 0x253   : > { %v1229_v18 = vmax.f32 %v1221_v19, 0.0 }
 0x255   : > { %1348 = vmatmul.f32.gmra.mxu3 %v1229_v18  ;;  %1388 = vmatmul.f32.gmra.mxu0 %v1229_v18 }
 0x256   : > { %1429 = vmatmul.f32.gmra.mxu1 %v1229_v18  ;;  %1470 = vmatmul.f32.gmra.mxu2 %v1229_v18 }
 0x25d   : > { %1490 = vmatmul.f32.vlgmr.msra.gmra.mxu3 %v5936_v24 }
 0x265   : > { %1493 = vmatmul.f32.gmra.mxu3 %v5959_v34 }
 0x26d   : > { %1496 = vmatmul.f32.gmra.mxu3 %v5978_v62 }
 0x275   : > { %1499 = vmatmul.f32.gmra.mxu3 %v5996_v23 }
 0x27d   : > { %1502 = vmatmul.f32.gmra.mxu3 %v1226_v60 }
 0x285   : > { %1505 = vmatmul.f32.gmra.mxu3 %v1227_v59 }
 0x28d   : > { %1508 = vmatmul.f32.gmra.mxu3 %v1228_v45 }
 0x295   : > { %1511 = vmatmul.f32.gmra.mxu3 %v1229_v18 }
 0x29a   : > { %v1368_v8 = vpop.f32.mrf.mxu0 }
 0x29b   : > { %v1409_v11 = vpop.f32.mrf.mxu1  ;;  %v1523_v57 = vrot.slane %v1368_v8, 1 }
 0x29c   : > { %v1560_v3 = vrot.slane %v1409_v11, 2 }
 0x2a0   : > { %v1328_v33 = vpop.f32.mrf.mxu3 }
 0x2a1   : > { %v6045_v34 = vpop.f32.mrf.mxu2 }
 0x2a2   : > { %v1371_v62 = vpop.f32.mrf.mxu0  ;;  %v1597_v45 = vrot.slane %v6045_v34, 3 }
 0x2a3   : > { %v1412_v23 = vpop.f32.mrf.mxu1  ;;  %v1524_v50 = vrot.slane %v1371_v62, 1 }
 0x2a4   : > { %v1561_v58 = vrot.slane %v1412_v23, 2 }
 0x2a5   : > { %v1525_v51 = vsel %vm853_vm8, %v1523_v57, %v1524_v50 }
 0x2a6   : > { %v6081_v7 = vadd.f32 %v1525_v51, %v1328_v33  ;;  %v6084_v31 = vsel %vm893_vm9, %v1560_v3, %v1561_v58 }
 0x2a8   : > { %v1331_v1 = vpop.f32.mrf.mxu3 }
 0x2a9   : > { %v6049_v22 = vpop.f32.mrf.mxu2 }
 0x2aa   : > { %v1374_v14 = vpop.f32.mrf.mxu0  ;;  %v1598_v18 = vrot.slane %v6049_v22, 3 }
 0x2ab   : > { %v6051_v35 = vpop.f32.mrf.mxu1  ;;  %v1526_v56 = vrot.slane %v1374_v14, 1 }
 0x2ac   : > { %v1563_v59 = vrot.slane %v6051_v35, 2 }
 0x2ad   : > { %v1527_v6 = vsel %vm853_vm8, %v1524_v50, %v1526_v56 }
 0x2ae   : > { %v1546_v63 = vadd.f32 %v1527_v6, %v1331_v1  ;;  %v1564_v49 = vsel %vm893_vm9, %v1561_v58, %v1563_v59 }
 0x2b0   : > { %v6039_v4 = vpop.f32.mrf.mxu3  ;;  %v6089_v8 = vadd.f32 %v1564_v49, %v1546_v63 }
 0x2b1   : > { %v6053_v15 = vpop.f32.mrf.mxu2 }
 0x2b2   : > { %v1377_v29 = vpop.f32.mrf.mxu0 }
 0x2b3   : > { %v6057_v27 = vpop.f32.mrf.mxu1  ;;  %v1528_v40 = vrot.slane %v1377_v29, 1 }
 0x2b4   : > { %v1565_v35 = vrot.slane %v6057_v27, 2 }
 0x2b5   : > { %v1529_v1 = vsel %vm853_vm8, %v1526_v56, %v1528_v40 }
 0x2b8   : > { %v6041_v2 = vpop.f32.mrf.mxu3 }
 0x2b9   : > { %v6059_v39 = vpop.f32.mrf.mxu2 }
 0x2ba   : > { %v1380_v30 = vpop.f32.mrf.mxu0  ;;  %v1602_v56 = vrot.slane %v6059_v39, 3 }
 0x2bb   : > { %v6065_v54 = vpop.f32.mrf.mxu1  ;;  %v1530_v44 = vrot.slane %v1380_v30, 1 }
 0x2bc   : > { %v1567_v50 = vrot.slane %v6065_v54, 2 }
 0x2bd   : > { %v1531_v62 = vsel %vm853_vm8, %v1528_v40, %v1530_v44 }
 0x2be   : > { %v1568_v3 = vsel %vm893_vm9, %v1565_v35, %v1567_v50 }
 0x2c0   : > { %v6043_v21 = vpop.f32.mrf.mxu3 }
 0x2c1   : > { %v6067_v60 = vpop.f32.mrf.mxu2 }
 0x2c2   : > { %v1383_v10 = vpop.f32.mrf.mxu0  ;;  %v1604_v27 = vrot.slane %v6067_v60, 3  ;;  %v1566_v60 = vsel %vm893_vm9, %v1563_v59, %v1565_v35 }
 0x2c3   : > { %v1424_v42 = vpop.f32.mrf.mxu1  ;;  %v1532_v17 = vrot.slane %v1383_v10, 1 }
 0x2c4   : > { %v1569_v29 = vrot.slane %v1424_v42, 2 }
 0x2c5   : > { %v1533_v23 = vsel %vm853_vm8, %v1530_v44, %v1532_v17 }
 0x2c6   : > { %v1570_v39 = vsel %vm893_vm9, %v1567_v50, %v1569_v29 }
 0x2c8   : > { %v1343_v24 = vpop.f32.mrf.mxu3 }
 0x2c9   : > { %v1465_v38 = vpop.f32.mrf.mxu2 }
 0x2ca   : > { %v1386_v13 = vpop.f32.mrf.mxu0  ;;  %v1606_v6 = vrot.slane %v1465_v38, 3 }
 0x2cb   : > { %v6073_v46 = vpop.f32.mrf.mxu1  ;;  %v1534_v61 = vrot.slane %v1386_v13, 1  ;;  %v1547_v13 = vadd.f32 %v1529_v1, %v6039_v4 }
 0x2cc   : > { %v1571_v33 = vrot.slane %v6073_v46, 2  ;;  %v1548_v46 = vadd.f32 %v1531_v62, %v6041_v2  ;;  %v1607_v40 = vsel %vm933_vm10, %v1604_v27, %v1606_v6 }
 0x2cd   : > { %v1535_v19 = vsel %vm853_vm8, %v1532_v17, %v1534_v61 }
 0x2ce   : > { %v1550_v30 = vadd.f32 %v1535_v19, %v1343_v24  ;;  %v1572_v24 = vsel %vm893_vm9, %v1569_v29, %v1571_v33 }
 0x2d0   : > { %v6047_v32 = vpop.f32.mrf.mxu3  ;;  %v1587_v54 = vadd.f32 %v1572_v24, %v1550_v30  ;;  %v1584_v30 = vadd.f32 %v1566_v60, %v1547_v13 }
 0x2d1   : > { %v6076_v41 = vpop.f32.mrf.mxu2 }
 0x2d2   : > { %v1389_v55 = vpop.f32.mrf.mxu0  ;;  %v1608_v14 = vrot.slane %v6076_v41, 3  ;;  %v1549_v41 = vadd.f32 %v1533_v23, %v6043_v21 }
 0x2d3   : > { %v1536_v11 = vrot.slane %v1389_v55, 1  ;;  %v1430_v10 = vpop.f32.mrf.mxu1  ;;  %v1605_v55 = vsel %vm933_vm10, %v1602_v56, %v1604_v27 }
 0x2d4   : > { %v1609_v4 = vsel %vm933_vm10, %v1606_v6, %v1608_v14  ;;  %v1573_v38 = vrot.slane %v1430_v10, 2  ;;  %v1586_v44 = vadd.f32 %v1570_v39, %v1549_v41  ;;  %v4952_v6 = vld [vmem:[%s8465_s8] ss:$0 sm:$0xff]  ;;  %v1599_v41 = vsel %vm933_vm10, %v1597_v45, %v1598_v18 }
 0x2d5   : > { %v1624_v17 = vadd.f32 %v1609_v4, %v1587_v54 }
 0x2d6   : > { %v1623_v1 = vadd.f32 %v1607_v40, %v1586_v44 }
 0x2d8   : > { %v1349_v26 = vpop.f32.mrf.mxu3 }
 0x2d9   : > { %v1600_v26 = vrot.slane %v6053_v15, 3  ;;  %v1471_v57 = vpop.f32.mrf.mxu2  ;;  %v1537_v15 = vsel %vm853_vm8, %v1534_v61, %v1536_v11 }
 0x2da   : > { %v1610_v63 = vrot.slane %v1471_v57, 3  ;;  %v1551_v2 = vadd.f32 %v1537_v15, %v6047_v32  ;;  %v1574_v32 = vsel %vm893_vm9, %v1571_v33, %v1573_v38 }
 0x2db   : > { %v1603_v62 = vsel %vm933_vm10, %v1600_v26, %v1602_v56  ;;  %v1601_v33 = vsel %vm933_vm10, %v1598_v18, %v1600_v26 }
 0x2dc   : > { %v1588_v59 = vadd.f32 %v1574_v32, %v1551_v2  ;;  %v1621_v57 = vadd.f32 %v1603_v62, %v1584_v30  ;;  %v1620_v24 = vadd.f32 %v1601_v33, %v6089_v8  ;;  %v1705_v62 = vld [vmem:[%s8466_s9] sm:$0xff]  ;;  %v4813_v33 = vld [vmem:[%s8464_s7 + $0x4e8] sm:$0xff] }
 0x2dd   : > { %2019 = vmatpush.msra.mxu1 %v4813_v33  ;;  %v4757_v33 = vld [vmem:[%s8464_s7 + $0x328] sm:$0xff] }
 0x2e0   : > { %v6055_v9 = vpop.f32.mrf.mxu3 }
 0x2e1   : > { %v1634_v15 = vrot.slane %v6055_v9, 4 }
 0x2e8   : > { %v6061_v25 = vpop.f32.mrf.mxu3 }
 0x2e9   : > { %v1635_v56 = vrot.slane %v6061_v25, 4  ;;  %v1582_v25 = vadd.f32 %v6084_v31, %v6081_v7 }
 0x2eb   : > { %v1619_v22 = vadd.f32 %v1599_v41, %v1582_v25 }
 0x2f0   : > { %v6063_v52 = vpop.f32.mrf.mxu3 }
 0x2f1   : > { %v1637_v23 = vrot.slane %v6063_v52, 4 }
 0x2f3   : > { %v1638_v26 = vsel %vm973_vm11, %v1635_v56, %v1637_v23 }
 0x2f4   : > { %v1657_v54 = vadd.f32 %v1638_v26, %v1620_v24 }
 0x2f6   : > { %v1665_v8 = vadd.f32 %v4952_v6, %v1657_v54  ;;  %v4802_v54 = vld [vmem:[%s8464_s7 + $0x490] sm:$0xff] }
 0x2f8   : > { %v6069_v16 = vpop.f32.mrf.mxu3 }
 0x2f9   : > { %v1639_v49 = vrot.slane %v6069_v16, 4 }
 0x2fb   : > { %v1640_v52 = vsel %vm973_vm11, %v1637_v23, %v1639_v49  ;;  %v1707_v23 = vld [vmem:[%s8466_s9 + $0x10] sm:$0xff] }
 0x2fc   : > { %v1658_v4 = vadd.f32 %v1640_v52, %v1621_v57 }
 0x300   : > { %v6071_v53 = vpop.f32.mrf.mxu3 }
 0x301   : > { %v1641_v21 = vrot.slane %v6071_v53, 4  ;;  %v1611_v53 = vsel %vm933_vm10, %v1608_v14, %v1610_v63  ;;  %v1666_v63 = vadd.f32 %v4952_v6, %v1658_v4  ;;  %v4806_v4 = vld [vmem:[%s8464_s7 + $0x4b0] sm:$0xff] }
 0x302   : > { %v1625_v14 = vadd.f32 %v1611_v53, %v1588_v59  ;;  %v1706_v59 = vld [vmem:[%s8466_s9 + $0x8] sm:$0xff] }
 0x303   : > { %v1642_v35 = vsel %vm973_vm11, %v1639_v49, %v1641_v21  ;;  %v1681_v60 = vrot.slane %v1666_v63, 1 }
 0x308   : > { %v1506_v37 = vpop.f32.mrf.mxu3 }
 0x309   : > { %v1643_v42 = vrot.slane %v1506_v37, 4  ;;  %v1585_v37 = vadd.f32 %v1568_v3, %v1548_v46 }
 0x30b   : > { %v1644_v19 = vsel %vm973_vm11, %v1641_v21, %v1643_v42  ;;  %v1622_v10 = vadd.f32 %v1605_v55, %v1585_v37  ;;  %v1679_v37 = vrot.slane %v1665_v8, 1 }
 0x30c   : > { %v1660_v50 = vadd.f32 %v1644_v19, %v1623_v1 }
 0x30d   : > { %v1682_v49 = vsel %vm853_vm8, %v1679_v37, %v1681_v60 }
 0x30e   : > { %v1699_v53 = vmax.f32 %v1665_v8, %v1682_v49  ;;  %v4787_v8 = vld [vmem:[%s8464_s7 + $0x418] sm:$0xff]  ;;  %v4777_v49 = vld [vmem:[%s8464_s7 + $0x3c8] sm:$0xff] }
 0x310   : > { %v1509_v58 = vpop.f32.mrf.mxu3 }
 0x311   : > { %v1645_v51 = vrot.slane %v1509_v58, 4  ;;  %v1659_v58 = vadd.f32 %v1642_v35, %v1622_v10  ;;  %v1708_v35 = vld [vmem:[%s8466_s9 + $0x18] sm:$0xf] }
 0x313   : > { %v1646_v61 = vsel %vm973_vm11, %v1643_v42, %v1645_v51  ;;  %v1668_v42 = vadd.f32 %v4952_v6, %v1660_v50  ;;  %v1667_v38 = vadd.f32 %v4952_v6, %v1659_v58 }
 0x314   : > { %v1661_v11 = vadd.f32 %v1646_v61, %v1624_v17 }
 0x315   : > { %v1685_v9 = vrot.slane %v1668_v42, 1  ;;  %v1683_v31 = vrot.slane %v1667_v38, 1 }
 0x316   : > { %v1669_v46 = vadd.f32 %v4952_v6, %v1661_v11 }
 0x317   : > { %v1686_v61 = vsel %vm853_vm8, %v1683_v31, %v1685_v9  ;;  %v1684_v17 = vsel %vm853_vm8, %v1681_v60, %v1683_v31  ;;  %v4786_v31 = vld [vmem:[%s8464_s7 + $0x410] sm:$0xff]  ;;  %v4789_v60 = vld [vmem:[%s8464_s7 + $0x428] sm:$0xff] }
 0x318   : > { %v1512_v29 = vpop.f32.mrf.mxu3  ;;  %v1687_v34 = vrot.slane %v1669_v46, 1  ;;  %v1701_v55 = vmax.f32 %v1667_v38, %v1686_v61  ;;  %v1700_v1 = vmax.f32 %v1666_v63, %v1684_v17  ;;  %v4804_v38 = vld [vmem:[%s8464_s7 + $0x4a0] sm:$0xff]  ;;  %v4799_v63 = vld [vmem:[%s8464_s7 + $0x478] sm:$0xff] }
 0x319   : > { %v1647_v16 = vrot.slane %v1512_v29, 4  ;;  %v4788_v61 = vld [vmem:[%s8464_s7 + $0x420] sm:$0xff]  ;;  %v4783_v17 = vld [vmem:[%s8464_s7 + $0x3f8] sm:$0xff] }
 0x31a   : > { %v1688_v7 = vsel %vm853_vm8, %v1685_v9, %v1687_v34  ;;  %v4798_v9 = vld [vmem:[%s8464_s7 + $0x470] sm:$0xff] }
 0x31b   : > { %v1648_v13 = vsel %vm973_vm11, %v1645_v51, %v1647_v16  ;;  %v1636_v51 = vsel %vm973_vm11, %v1634_v15, %v1635_v56  ;;  %v1702_v44 = vmax.f32 %v1668_v42, %v1688_v7  ;;  %v4811_v16 = vld [vmem:[%s8464_s7 + $0x4d8] sm:$0xff]  ;;  %v4794_v7 = vld [vmem:[%s8464_s7 + $0x450] sm:$0xff] }
 0x31c   : > { %v1662_v27 = vadd.f32 %v1648_v13, %v1625_v14  ;;  %v1656_v18 = vadd.f32 %v1636_v51, %v1619_v22  ;;  %1962 = vmatpush.msrb.mxu3 %v4811_v16  ;;  %v4814_v14 = vld [vmem:[%s8464_s7 + $0x4f0] sm:$0xff]  ;;  %v4807_v42 = vld [vmem:[%s8464_s7 + $0x4b8] sm:$0xff]  ;;  %v4808_v51 = vld [vmem:[%s8464_s7 + $0x4c0] sm:$0xff] }
 0x31d   : > { %2048 = vmatpush.msra.mxu2 %v4814_v14  ;;  %2020 = vmatpush.msra.mxu1 %v4808_v51  ;;  %v4801_v22 = vld [vmem:[%s8464_s7 + $0x488] sm:$0xff]  ;;  %v4764_v16 = vld [vmem:[%s8464_s7 + $0x360] sm:$0xff]  ;;  %v4758_v14 = vld [vmem:[%s8464_s7 + $0x330] sm:$0xff] }
 0x31e   : > { %v1670_v39 = vadd.f32 %v4952_v6, %v1662_v27  ;;  %v1664_v3 = vadd.f32 %v4952_v6, %v1656_v18  ;;  %v4812_v6 = vld [vmem:[%s8464_s7 + $0x4e0] sm:$0xff]  ;;  %1963 = vmatpush.msrb.mxu3 %v4806_v4  ;;  %v4797_v18 = vld [vmem:[%s8464_s7 + $0x468] sm:$0xff]  ;;  %v4742_v51 = vld [vmem:[%s8464_s7 + $0x2b0] sm:$0xff] }
 0x31f   : > { %v4749_v4 = vld [vmem:[%s8464_s7 + $0x2e8] sm:$0xff] }
 0x320   : > { %v1689_v45 = vrot.slane %v1670_v39, 1  ;;  %v1678_v19 = vrot.slane %v1664_v3, 1  ;;  %1964 = vmatpush.msrb.mxu3 %v4801_v22  ;;  %v4744_v22 = vld [vmem:[%s8464_s7 + $0x2c0] sm:$0xff] }
 0x322   : > { %v1704_v40 = vmax.f32 %v1670_v39, %v1689_v45  ;;  %v1690_v2 = vsel %vm853_vm8, %v1687_v34, %v1689_v45  ;;  %v1680_v32 = vsel %vm853_vm8, %v1678_v19, %v1679_v37  ;;  %v4809_v39 = vld [vmem:[%s8464_s7 + $0x4c8] sm:$0xff]  ;;  %v4803_v34 = vld [vmem:[%s8464_s7 + $0x498] sm:$0xff]  ;;  %v4796_v45 = vld [vmem:[%s8464_s7 + $0x460] sm:$0xff] }
 0x323   : > { %v1703_v21 = vmax.f32 %v1669_v46, %v1690_v2  ;;  %v1698_v11 = vmax.f32 %v1664_v3, %v1680_v32  ;;  %2049 = vmatpush.msra.mxu2 %v4809_v39  ;;  %2021 = vmatpush.msra.mxu1 %v4803_v34  ;;  %v4792_v2 = vld [vmem:[%s8464_s7 + $0x440] sm:$0xff]  ;;  %v4781_v3 = vld [vmem:[%s8464_s7 + $0x3e8] sm:$0xff]  ;;  %v4778_v19 = vld [vmem:[%s8464_s7 + $0x3d0] sm:$0xff] }
 0x324   : > { %4731 = vmatpush.msk.msrb.mxu0 %vm853_vm8, %v1704_v40  ;;  %1965 = vmatpush.msrb.mxu3 %v4796_v45  ;;  %v4791_v40 = vld [vmem:[%s8464_s7 + $0x438] sm:$0xff]  ;;  %v4784_v37 = vld [vmem:[%s8464_s7 + $0x400] sm:$0xff]  ;;  %v4737_v34 = vld [vmem:[%s8464_s7 + $0x288] sm:$0xff] }
 0x325   : > { %2050 = vmatpush.msra.mxu2 %v4804_v38  ;;  %2022 = vmatpush.msra.mxu1 %v4798_v9  ;;  %v4771_v32 = vld [vmem:[%s8464_s7 + $0x398] sm:$0xff]  ;;  %v4738_v38 = vld [vmem:[%s8464_s7 + $0x290] sm:$0xff] }
 0x326   : > { %1735 = vmatpush.msrb.mxu0 %v1703_v21  ;;  %v4793_v21 = vld [vmem:[%s8464_s7 + $0x448] sm:$0xff]  ;;  %1966 = vmatpush.msrb.mxu3 %v4791_v40  ;;  %v4743_v39 = vld [vmem:[%s8464_s7 + $0x2b8] sm:$0xff] }
 0x327   : > { %2051 = vmatpush.msra.mxu2 %v4799_v63  ;;  %2023 = vmatpush.msra.mxu1 %v4793_v21  ;;  %v4739_v45 = vld [vmem:[%s8464_s7 + $0x298] sm:$0xff]  ;;  %v4810_v63 = vld [vmem:[%s8464_s7 + $0x4d0] sm:$0xff]  ;;  %v4800_v21 = vld [vmem:[%s8464_s7 + $0x480] sm:$0xff] }
 0x328   : > { %1736 = vmatpush.msrb.mxu0 %v1702_v44  ;;  %1967 = vmatpush.msrb.mxu3 %v4786_v31  ;;  %v4782_v44 = vld [vmem:[%s8464_s7 + $0x3f0] sm:$0xff] }
 0x329   : > { %2052 = vmatpush.msra.mxu2 %v4794_v7  ;;  %2024 = vmatpush.msra.mxu1 %v4788_v61  ;;  %v4795_v7 = vld [vmem:[%s8464_s7 + $0x458] sm:$0xff] }
 0x32a   : > { %1737 = vmatpush.msrb.mxu0 %v1701_v55  ;;  %1968 = vmatpush.msrb.mxu3 %v4781_v3  ;;  %v4776_v55 = vld [vmem:[%s8464_s7 + $0x3c0] sm:$0xff] }
 0x32b   : > { %2053 = vmatpush.msra.mxu2 %v4789_v60  ;;  %2025 = vmatpush.msra.mxu1 %v4783_v17 }
 0x32c   : > { %1738 = vmatpush.msrb.mxu0 %v1700_v1  ;;  %1969 = vmatpush.msrb.mxu3 %v4776_v55  ;;  %v4779_v1 = vld [vmem:[%s8464_s7 + $0x3d8] sm:$0xff] }
 0x32d   : > { %2054 = vmatpush.msra.mxu2 %v4784_v37  ;;  %2026 = vmatpush.msra.mxu1 %v4778_v19  ;;  %v4780_v37 = vld [vmem:[%s8464_s7 + $0x3e0] sm:$0xff]  ;;  %v4770_v19 = vld [vmem:[%s8464_s7 + $0x390] sm:$0xff] }
 0x32e   : > { %1739 = vmatpush.msrb.mxu0 %v1699_v53  ;;  %v4772_v53 = vld [vmem:[%s8464_s7 + $0x3a0] sm:$0xff]  ;;  %1970 = vmatpush.msrb.mxu3 %v4771_v32 }
 0x32f   : > { %2055 = vmatpush.msra.mxu2 %v4779_v1 }
 0x330   : > { %1740 = vmatpush.msrb.mxu0 %v1698_v11  ;;  %v4773_v11 = vld [vmem:[%s8464_s7 + $0x3a8] sm:$0xff] }
 0x331   : > { %4732 = vmatmul.msk.f32.vlgmr.msrb.gmra.mxu0 %vm1709_vm12, %v1705_v62  ;;  %v4774_v62 = vld [vmem:[%s8464_s7 + $0x3b0] sm:$0xff]  ;;  %2027 = vmatpush.msra.mxu1 %v4773_v11 }
 0x332   : > { %1990 = vmatpush.msra.mxu0 %v4812_v6  ;;  %2056 = vmatpush.msra.mxu2 %v4774_v62  ;;  %v4756_v6 = vld [vmem:[%s8464_s7 + $0x320] sm:$0xff] }
 0x334   : > { %1991 = vmatpush.msra.mxu0 %v4807_v42  ;;  %v4741_v42 = vld [vmem:[%s8464_s7 + $0x2a8] sm:$0xff] }
 0x336   : > { %1992 = vmatpush.msra.mxu0 %v4802_v54  ;;  %v4736_v54 = vld [vmem:[%s8464_s7 + $0x280] sm:$0xff] }
 0x338   : > { %1993 = vmatpush.msra.mxu0 %v4797_v18  ;;  %v4815_v18 = vld [vmem:[%s8464_s7 + $0x4f8] sm:$0xff] }
 0x339   : > { %4733 = vmatmul.msk.f32.gmra.mxu0 %vm1709_vm12, %v1706_v59  ;;  %v4766_v59 = vld [vmem:[%s8464_s7 + $0x370] sm:$0xff] }
 0x33a   : > { %1994 = vmatpush.msra.mxu0 %v4792_v2  ;;  %1971 = vmatpush.msrb.mxu3 %v4766_v59  ;;  %v4805_v2 = vld [vmem:[%s8464_s7 + $0x4a8] sm:$0xff] }
 0x33c   : > { %1995 = vmatpush.msra.mxu0 %v4787_v8  ;;  %v4790_v8 = vld [vmem:[%s8464_s7 + $0x430] sm:$0xff] }
 0x33e   : > { %1996 = vmatpush.msra.mxu0 %v4782_v44  ;;  %v4785_v44 = vld [vmem:[%s8464_s7 + $0x408] sm:$0xff] }
 0x340   : > { %1997 = vmatpush.msra.mxu0 %v4777_v49  ;;  %v4775_v49 = vld [vmem:[%s8464_s7 + $0x3b8] sm:$0xff] }
 0x341   : > { %4734 = vmatmul.msk.f32.gmra.mxu0 %vm1709_vm12, %v1707_v23  ;;  %v4767_v23 = vld [vmem:[%s8464_s7 + $0x378] sm:$0xff] }
 0x342   : > { %1998 = vmatpush.msra.mxu0 %v4772_v53  ;;  %v4765_v53 = vld [vmem:[%s8464_s7 + $0x368] sm:$0xff] }
 0x344   : > { %1999 = vmatpush.msra.mxu0 %v4767_v23 }
 0x349   : > { %4735 = vmatmul.msk.f32.gmra.mxu0 %vm1709_vm12, %v1708_v35  ;;  %v4768_v35 = vld [vmem:[%s8464_s7 + $0x380] sm:$0xff] }
 0x34a   : > { %2028 = vmatpush.msra.mxu1 %v4768_v35  ;;  %v4760_v35 = vld [vmem:[%s8464_s7 + $0x340] sm:$0xff] }
 0x3ae   : > { %v1742_v29 = vpop.f32.mrf.mxu0 }
 0x3af   : > { %1770 = vmatmul.f32.vlgmr.msrb.gmra.mxu1 %v1742_v29 }
 0x3b6   : > { %v1745_v30 = vpop.f32.mrf.mxu0 }
 0x3b7   : > { %1773 = vmatmul.f32.gmra.mxu1 %v1745_v30 }
 0x3be   : > { %v1748_v10 = vpop.f32.mrf.mxu0 }
 0x3bf   : > { %1776 = vmatmul.f32.gmra.mxu1 %v1748_v10 }
 0x3c6   : > { %v1751_v50 = vpop.f32.mrf.mxu0 }
 0x3c7   : > { %1779 = vmatmul.f32.gmra.mxu1 %v1751_v50 }
 0x42c   : > { %v1771_v56 = vpop.f32.mrf.mxu1 }
 0x42d   : > { %v6177_v52 = vsub.f32 %v1742_v29, %v1771_v56  ;;  %v4769_v29 = vld [vmem:[%s8464_s7 + $0x388] sm:$0xff]  ;;  %v4759_v56 = vld [vmem:[%s8464_s7 + $0x338] sm:$0xff] }
 0x42e   : > { %2057 = vmatpush.msra.mxu2 %v4769_v29  ;;  %v6412_v29 = vld [vmem:[%s8462_s5 + $0x1] ss:$0 sm:$0xff] }
 0x42f   : > { %v1787_v57 = vmul.f32 %v6177_v52, %v6177_v52 }
 0x430   : > { %2058 = vmatpush.msra.mxu2 %v4764_v16  ;;  %v6418_v16 = vld [vmem:[%s8463_s6 + $0x1] ss:$0 sm:$0xff] }
 0x431   : > { %1807 = vmatmul.f32.vlgmr.msrb.gmra.mxu2 %v1787_v57  ;;  %v4751_v57 = vld [vmem:[%s8464_s7 + $0x2f8] sm:$0xff] }
 0x432   : > { %2059 = vmatpush.msra.mxu2 %v4759_v56 }
 0x434   : > { %v1774_v58 = vpop.f32.mrf.mxu1 }
 0x435   : > { %v6181_v13 = vsub.f32 %v1745_v30, %v1774_v58  ;;  %v4761_v30 = vld [vmem:[%s8464_s7 + $0x348] sm:$0xff]  ;;  %v4752_v58 = vld [vmem:[%s8464_s7 + $0x300] sm:$0xff] }
 0x436   : > { %1972 = vmatpush.msrb.mxu3 %v4761_v30 }
 0x437   : > { %v1788_v46 = vmul.f32 %v6181_v13, %v6181_v13 }
 0x438   : > { %1973 = vmatpush.msrb.mxu3 %v4756_v6 }
 0x439   : > { %1810 = vmatmul.f32.gmra.mxu2 %v1788_v46  ;;  %v4753_v46 = vld [vmem:[%s8464_s7 + $0x308] sm:$0xff] }
 0x43a   : > { %1974 = vmatpush.msrb.mxu3 %v4751_v57 }
 0x43c   : > { %v1777_v41 = vpop.f32.mrf.mxu1 }
 0x43d   : > { %v6185_v15 = vsub.f32 %v1748_v10, %v1777_v41  ;;  %v4762_v10 = vld [vmem:[%s8464_s7 + $0x350] sm:$0xff] }
 0x43e   : > { %2000 = vmatpush.msra.mxu0 %v4762_v10  ;;  %v4754_v41 = vld [vmem:[%s8464_s7 + $0x310] sm:$0xff] }
 0x43f   : > { %v1789_v26 = vmul.f32 %v6185_v15, %v6185_v15  ;;  %2060 = vmatpush.msra.mxu2 %v4754_v41 }
 0x440   : > { %2001 = vmatpush.msra.mxu0 %v4757_v33  ;;  %v4755_v33 = vld [vmem:[%s8464_s7 + $0x318] sm:$0xff] }
 0x441   : > { %1813 = vmatmul.f32.gmra.mxu2 %v1789_v26  ;;  %v4746_v26 = vld [vmem:[%s8464_s7 + $0x2d0] sm:$0xff] }
 0x442   : > { %2002 = vmatpush.msra.mxu0 %v4752_v58  ;;  %1975 = vmatpush.msrb.mxu3 %v4746_v26  ;;  %v4745_v58 = vld [vmem:[%s8464_s7 + $0x2c8] sm:$0xff] }
 0x443   : > { %2061 = vmatpush.msra.mxu2 %v4749_v4 }
 0x444   : > { %v1780_v27 = vpop.f32.mrf.mxu1  ;;  %1976 = vmatpush.msrb.mxu3 %v4741_v42 }
 0x445   : > { %v6189_v25 = vsub.f32 %v1751_v50, %v1780_v27  ;;  %v4763_v50 = vld [vmem:[%s8464_s7 + $0x358] sm:$0xff]  ;;  %2062 = vmatpush.msra.mxu2 %v4744_v22 }
 0x446   : > { %2029 = vmatpush.msra.mxu1 %v4763_v50  ;;  %v4747_v27 = vld [vmem:[%s8464_s7 + $0x2d8] sm:$0xff]  ;;  %1977 = vmatpush.msrb.mxu3 %v4736_v54 }
 0x447   : > { %v1790_v24 = vmul.f32 %v6189_v25, %v6189_v25  ;;  %2003 = vmatpush.msra.mxu0 %v4747_v27  ;;  %2063 = vmatpush.msra.mxu2 %v4739_v45 }
 0x448   : > { %2030 = vmatpush.msra.mxu1 %v4758_v14  ;;  %2077 = vmatpush.msra.mxu3 %v4815_v18  ;;  %v4750_v14 = vld [vmem:[%s8464_s7 + $0x2f0] sm:$0xff] }
 0x449   : > { %1816 = vmatmul.f32.gmra.mxu2 %v1790_v24  ;;  %v4748_v24 = vld [vmem:[%s8464_s7 + $0x2e0] sm:$0xff]  ;;  %2004 = vmatpush.msra.mxu0 %v4742_v51 }
 0x44a   : > { %2031 = vmatpush.msra.mxu1 %v4753_v46  ;;  %2078 = vmatpush.msra.mxu3 %v4810_v63 }
 0x44b   : > { %2005 = vmatpush.msra.mxu0 %v4737_v34 }
 0x44c   : > { %2032 = vmatpush.msra.mxu1 %v4748_v24  ;;  %2079 = vmatpush.msra.mxu3 %v4805_v2 }
 0x44e   : > { %2033 = vmatpush.msra.mxu1 %v4743_v39  ;;  %2080 = vmatpush.msra.mxu3 %v4800_v21  ;;  %v4740_v39 = vld [vmem:[%s8464_s7 + $0x2a0] sm:$0xff] }
 0x450   : > { %2034 = vmatpush.msra.mxu1 %v4738_v38  ;;  %2081 = vmatpush.msra.mxu3 %v4795_v7 }
 0x452   : > { %2082 = vmatpush.msra.mxu3 %v4790_v8 }
 0x454   : > { %2083 = vmatpush.msra.mxu3 %v4785_v44 }
 0x456   : > { %2084 = vmatpush.msra.mxu3 %v4780_v37 }
 0x458   : > { %2085 = vmatpush.msra.mxu3 %v4775_v49 }
 0x45a   : > { %2086 = vmatpush.msra.mxu3 %v4770_v19 }
 0x45c   : > { %2087 = vmatpush.msra.mxu3 %v4765_v53 }
 0x45e   : > { %2088 = vmatpush.msra.mxu3 %v4760_v35 }
 0x460   : > { %2089 = vmatpush.msra.mxu3 %v4755_v33 }
 0x462   : > { %2090 = vmatpush.msra.mxu3 %v4750_v14 }
 0x464   : > { %2091 = vmatpush.msra.mxu3 %v4745_v58 }
 0x466   : > { %2092 = vmatpush.msra.mxu3 %v4740_v39 }
 0x4b4   : > { %v1808_v9 = vpop.f32.mrf.mxu2 }
 0x4b5   : > { %v1809_v40 = vadd.f32 1e-05, %v1808_v9 }
 0x4b7   : > { %4980 = vrsqrt.f32 %v1809_v40  ;;  %vm1826_vm14 = vweird.f32 %v1809_v40 }
 0x4bc   : > { %v1811_v31 = vpop.f32.mrf.mxu2 }
 0x4bd   : > { %v4981_v61 = vpop.eup %4980  ;;  %v1812_v60 = vadd.f32 1e-05, %v1811_v31 }
 0x4be   : > { %v1821_v3 = vmul.f32 %v4981_v61, %v1809_v40  ;;  %vm1827_vm13 = vweird.f32 %v4981_v61 }
 0x4bf   : > { %4982 = vrsqrt.f32 %v1812_v60  ;;  %vm1828_vm15 = vmor %vm1826_vm14, %vm1827_vm13  ;;  %vm1836_vm1 = vweird.f32 %v1812_v60  ;;  %vm2195_vm14 = vcmask 187392  }
 0x4c0   : > { %v1822_v17 = vmul.f32 %v4981_v61, %v1821_v3 }
 0x4c2   : > { %v1823_v55 = vmul.f32 0.5, %v1822_v17 }
 0x4c4   : > { %v1824_v1 = vsub.f32 1.5, %v1823_v55  ;;  %v1814_v32 = vpop.f32.mrf.mxu2 }
 0x4c5   : > { %v4983_v11 = vpop.eup %4982  ;;  %v1815_v62 = vadd.f32 1e-05, %v1814_v32 }
 0x4c6   : > { %v1825_v59 = vmul.f32 %v4981_v61, %v1824_v1  ;;  %v1831_v23 = vmul.f32 %v4983_v11, %v1812_v60  ;;  %vm1837_vm0 = vweird.f32 %v4983_v11 }
 0x4c7   : > { %4984 = vrsqrt.f32 %v1815_v62  ;;  %vm1838_vm2 = vmor %vm1836_vm1, %vm1837_vm0  ;;  %vm1846_vm4 = vweird.f32 %v1815_v62 }
 0x4c8   : > { %v1829_v30 = vsel %vm1828_vm15, %v4981_v61, %v1825_v59  ;;  %v1832_v10 = vmul.f32 %v4983_v11, %v1831_v23 }
 0x4c9   : > { %v1860_v50 = vmul.f32 %v1829_v30, %v6177_v52 }
 0x4ca   : > { %v1833_v6 = vmul.f32 0.5, %v1832_v10 }
 0x4cb   : > { %v1866_v56 = vmul.f32 %v6412_v29, %v1860_v50 }
 0x4cc   : > { %v1834_v57 = vsub.f32 1.5, %v1833_v6  ;;  %v1817_v52 = vpop.f32.mrf.mxu2 }
 0x4cd   : > { %v4985_v46 = vpop.eup %4984  ;;  %v1818_v41 = vadd.f32 1e-05, %v1817_v52  ;;  %v1872_v26 = vadd.f32 %v6418_v16, %v1866_v56 }
 0x4ce   : > { %v1835_v27 = vmul.f32 %v4983_v11, %v1834_v57  ;;  %v1841_v24 = vmul.f32 %v4985_v46, %v1815_v62  ;;  %vm1847_vm3 = vweird.f32 %v4985_v46 }
 0x4cf   : > { %4986 = vrsqrt.f32 %v1818_v41  ;;  %v1876_v4 = vmax.f32 %v1872_v26, 0.0  ;;  %vm1848_vm5 = vmor %vm1846_vm4, %vm1847_vm3  ;;  %vm1856_vm7 = vweird.f32 %v1818_v41  ;;  %vm2543_vm3 = vcmask 523264  }
 0x4d0   : > { %v1839_v42 = vsel %vm1838_vm2, %v4983_v11, %v1835_v27  ;;  %v1842_v51 = vmul.f32 %v4985_v46, %v1841_v24 }
 0x4d1   : > { %v1861_v22 = vmul.f32 %v1839_v42, %v6181_v13  ;;  %1978 = vmatmul.f32.vlgmr.msrb.gmra.mxu3 %v1876_v4  ;;  %2006 = vmatmul.f32.vlgmr.msra.gmra.mxu0 %v1876_v4 }
 0x4d2   : > { %v1843_v54 = vmul.f32 0.5, %v1842_v51  ;;  %2035 = vmatmul.f32.vlgmr.msra.gmra.mxu1 %v1876_v4  ;;  %2064 = vmatmul.f32.vlgmr.msra.gmra.mxu2 %v1876_v4 }
 0x4d3   : > { %v1867_v34 = vmul.f32 %v6412_v29, %v1861_v22 }
 0x4d4   : > { %v1844_v38 = vsub.f32 1.5, %v1843_v54 }
 0x4d5   : > { %v4987_v45 = vpop.eup %4986  ;;  %v1873_v18 = vadd.f32 %v6418_v16, %v1867_v34  ;;  %v2318_v34 = vld [vmem:[%s8467_s10 + $0x2d0] sm:$0xff] }
 0x4d6   : > { %v1845_v9 = vmul.f32 %v4985_v46, %v1844_v38  ;;  %v1851_v63 = vmul.f32 %v4987_v45, %v1818_v41  ;;  %vm1857_vm6 = vweird.f32 %v4987_v45  ;;  %v2319_v38 = vld [vmem:[%s8467_s10 + $0x2d8] sm:$0xff]  ;;  %2324 = vmatpush.msrb.mxu1 %v2318_v34 }
 0x4d7   : > { %v1877_v40 = vmax.f32 %v1873_v18, 0.0  ;;  %vm1858_vm13 = vmor %vm1856_vm7, %vm1857_vm6  ;;  %2346 = vmatpush.msrb.mxu2 %v2319_v38  ;;  %v2284_v38 = vld [vmem:[%s8467_s10 + $0x1c0] sm:$0xff] }
 0x4d8   : > { %v1849_v2 = vsel %vm1848_vm5, %v4985_v46, %v1845_v9  ;;  %v1852_v13 = vmul.f32 %v4987_v45, %v1851_v63 }
 0x4d9   : > { %v1862_v21 = vmul.f32 %v1849_v2, %v6185_v15  ;;  %1981 = vmatmul.f32.gmra.mxu3 %v1877_v40  ;;  %2009 = vmatmul.f32.gmra.mxu0 %v1877_v40  ;;  %v2313_v2 = vld [vmem:[%s8467_s10 + $0x2a8] sm:$0xff] }
 0x4da   : > { %v1853_v7 = vmul.f32 0.5, %v1852_v13  ;;  %2038 = vmatmul.f32.gmra.mxu1 %v1877_v40  ;;  %2067 = vmatmul.f32.gmra.mxu2 %v1877_v40 }
 0x4db   : > { %v1868_v31 = vmul.f32 %v6412_v29, %v1862_v21  ;;  %2347 = vmatpush.msrb.mxu2 %v2313_v2  ;;  %v2278_v2 = vld [vmem:[%s8467_s10 + $0x190] sm:$0xff] }
 0x4dc   : > { %v1854_v8 = vsub.f32 1.5, %v1853_v7 }
 0x4dd   : > { %v1874_v61 = vadd.f32 %v6418_v16, %v1868_v31 }
 0x4de   : > { %v1855_v60 = vmul.f32 %v4987_v45, %v1854_v8  ;;  %v2306_v8 = vld [vmem:[%s8467_s10 + $0x270] sm:$0xff] }
 0x4df   : > { %v1878_v3 = vmax.f32 %v1874_v61, 0.0  ;;  %v2307_v61 = vld [vmem:[%s8467_s10 + $0x278] sm:$0xff] }
 0x4e0   : > { %v1859_v44 = vsel %vm1858_vm13, %v4987_v45, %v1855_v60  ;;  %v2312_v45 = vld [vmem:[%s8467_s10 + $0x2a0] sm:$0xff]  ;;  %2348 = vmatpush.msrb.mxu2 %v2307_v61 }
 0x4e1   : > { %v1863_v17 = vmul.f32 %v1859_v44, %v6189_v25  ;;  %1984 = vmatmul.f32.gmra.mxu3 %v1878_v3  ;;  %2012 = vmatmul.f32.gmra.mxu0 %v1878_v3  ;;  %v2252_v61 = vld [vmem:[%s8467_s10 + $0xc0] sm:$0xff] }
 0x4e2   : > { %2041 = vmatmul.f32.gmra.mxu1 %v1878_v3  ;;  %2070 = vmatmul.f32.gmra.mxu2 %v1878_v3 }
 0x4e3   : > { %v1869_v15 = vmul.f32 %v6412_v29, %v1863_v17  ;;  %2325 = vmatpush.msrb.mxu1 %v2312_v45 }
 0x4e5   : > { %v1875_v37 = vadd.f32 %v6418_v16, %v1869_v15  ;;  %2326 = vmatpush.msrb.mxu1 %v2306_v8  ;;  %v2272_v8 = vld [vmem:[%s8467_s10 + $0x160] sm:$0xff] }
 0x4e7   : > { %v1879_v55 = vmax.f32 %v1875_v37, 0.0 }
 0x4e9   : > { %1987 = vmatmul.f32.gmra.mxu3 %v1879_v55  ;;  %2015 = vmatmul.f32.gmra.mxu0 %v1879_v55 }
 0x4ea   : > { %2044 = vmatmul.f32.gmra.mxu1 %v1879_v55  ;;  %2073 = vmatmul.f32.gmra.mxu2 %v1879_v55 }
 0x4f1   : > { %2093 = vmatmul.f32.vlgmr.msra.gmra.mxu3 %v1876_v4 }
 0x4f9   : > { %2096 = vmatmul.f32.gmra.mxu3 %v1877_v40 }
 0x501   : > { %2099 = vmatmul.f32.gmra.mxu3 %v1878_v3 }
 0x509   : > { %2102 = vmatmul.f32.gmra.mxu3 %v1879_v55  ;;  %v2300_v55 = vld [vmem:[%s8467_s10 + $0x240] sm:$0xff] }
 0x50a   : > { %2327 = vmatpush.msrb.mxu1 %v2300_v55  ;;  %v2266_v55 = vld [vmem:[%s8467_s10 + $0x130] sm:$0xff] }
 0x54e   : > { %v2007_v25 = vpop.f32.mrf.mxu0 }
 0x54f   : > { %v2036_v32 = vpop.f32.mrf.mxu1  ;;  %v2110_v14 = vrot.slane %v2007_v25, 1  ;;  %v2320_v25 = vld [vmem:[%s8467_s10 + $0x2e0] sm:$0xff] }
 0x550   : > { %v2127_v51 = vrot.slane %v2036_v32, 2  ;;  %2368 = vmatpush.msrb.mxu3 %v2320_v25  ;;  %v2241_v25 = vld [vmem:[%s8467_s10 + $0x68] sm:$0xff] }
 0x554   : > { %v1979_v49 = vpop.f32.mrf.mxu3 }
 0x555   : > { %v2065_v53 = vpop.f32.mrf.mxu2 }
 0x556   : > { %v2010_v11 = vpop.f32.mrf.mxu0  ;;  %v2144_v18 = vrot.slane %v2065_v53, 3 }
 0x557   : > { %v2039_v59 = vpop.f32.mrf.mxu1  ;;  %v2111_v6 = vrot.slane %v2010_v11, 1 }
 0x558   : > { %v2128_v41 = vrot.slane %v2039_v59, 2  ;;  %v2295_v59 = vld [vmem:[%s8467_s10 + $0x218] sm:$0xff] }
 0x559   : > { %v2112_v52 = vsel %vm853_vm8, %v2110_v14, %v2111_v6 }
 0x55a   : > { %v2120_v39 = vadd.f32 %v2112_v52, %v1979_v49  ;;  %v2129_v13 = vsel %vm893_vm9, %v2127_v51, %v2128_v41  ;;  %v2301_v49 = vld [vmem:[%s8467_s10 + $0x248] sm:$0xff]  ;;  %v2290_v51 = vld [vmem:[%s8467_s10 + $0x1f0] sm:$0xff] }
 0x55b   : > { %2349 = vmatpush.msrb.mxu2 %v2301_v49  ;;  %v2315_v49 = vld [vmem:[%s8467_s10 + $0x2b8] sm:$0xff] }
 0x55c   : > { %v1982_v19 = vpop.f32.mrf.mxu3  ;;  %v2137_v15 = vadd.f32 %v2129_v13, %v2120_v39 }
 0x55d   : > { %v2068_v23 = vpop.f32.mrf.mxu2  ;;  %2350 = vmatpush.msrb.mxu2 %v2295_v59  ;;  %v2303_v59 = vld [vmem:[%s8467_s10 + $0x258] sm:$0xff] }
 0x55e   : > { %v2013_v35 = vpop.f32.mrf.mxu0  ;;  %v2145_v24 = vrot.slane %v2068_v23, 3  ;;  %v2314_v23 = vld [vmem:[%s8467_s10 + $0x2b0] sm:$0xff] }
 0x55f   : > { %v2042_v30 = vpop.f32.mrf.mxu1  ;;  %v2113_v50 = vrot.slane %v2013_v35, 1  ;;  %2369 = vmatpush.msrb.mxu3 %v2314_v23  ;;  %v2228_v23 = vld [vmem:[%s8467_s10] sm:$0xff] }
 0x560   : > { %v2130_v58 = vrot.slane %v2042_v30, 2  ;;  %v2146_v60 = vsel %vm933_vm10, %v2144_v18, %v2145_v24  ;;  %v4955_v30 = vld [vmem:[%s8465_s8 + $0x1] ss:$0 sm:$0xff] }
 0x561   : > { %v2114_v56 = vsel %vm853_vm8, %v2111_v6, %v2113_v50  ;;  %v2289_v6 = vld [vmem:[%s8467_s10 + $0x1e8] sm:$0xff]  ;;  %v2264_v18 = vld [vmem:[%s8467_s10 + $0x120] sm:$0xff] }
 0x562   : > { %v2121_v26 = vadd.f32 %v2114_v56, %v1982_v19  ;;  %v2131_v9 = vsel %vm893_vm9, %v2128_v41, %v2130_v58  ;;  %v2302_v56 = vld [vmem:[%s8467_s10 + $0x250] sm:$0xff]  ;;  %2351 = vmatpush.msrb.mxu2 %v2289_v6  ;;  %v2291_v6 = vld [vmem:[%s8467_s10 + $0x1f8] sm:$0xff] }
 0x564   : > { %v1985_v1 = vpop.f32.mrf.mxu3  ;;  %v2138_v21 = vadd.f32 %v2131_v9, %v2121_v26  ;;  %v2296_v26 = vld [vmem:[%s8467_s10 + $0x220] sm:$0xff] }
 0x565   : > { %v2071_v10 = vpop.f32.mrf.mxu2 }
 0x566   : > { %v2016_v33 = vpop.f32.mrf.mxu0  ;;  %v2147_v46 = vrot.slane %v2071_v10, 3 }
 0x567   : > { %v2115_v57 = vrot.slane %v2016_v33, 1  ;;  %v2045_v27 = vpop.f32.mrf.mxu1  ;;  %v2308_v33 = vld [vmem:[%s8467_s10 + $0x280] sm:$0xff] }
 0x568   : > { %v2148_v63 = vsel %vm933_vm10, %v2145_v24, %v2147_v46  ;;  %v2132_v7 = vrot.slane %v2045_v27, 2  ;;  %2370 = vmatpush.msrb.mxu3 %v2308_v33  ;;  %v2276_v24 = vld [vmem:[%s8467_s10 + $0x180] sm:$0xff] }
 0x569   : > { %v2116_v22 = vsel %vm853_vm8, %v2113_v50, %v2115_v57  ;;  %v2155_v37 = vadd.f32 %v2148_v63, %v2138_v21  ;;  %v2316_v33 = vld [vmem:[%s8467_s10 + $0x2c0] sm:$0xff] }
 0x56a   : > { %v2122_v3 = vadd.f32 %v2116_v22, %v1985_v1  ;;  %v2154_v1 = vadd.f32 %v2146_v60, %v2137_v15  ;;  %v2133_v32 = vsel %vm893_vm9, %v2130_v58, %v2132_v7  ;;  %v2282_v58 = vld [vmem:[%s8467_s10 + $0x1b0] sm:$0xff]  ;;  %2371 = vmatpush.msrb.mxu3 %v2302_v56 }
 0x56b   : > { %v2270_v22 = vld [vmem:[%s8467_s10 + $0x150] sm:$0xff] }
 0x56c   : > { %v1988_v62 = vpop.f32.mrf.mxu3  ;;  %v2139_v35 = vadd.f32 %v2133_v32, %v2122_v3  ;;  %2372 = vmatpush.msrb.mxu3 %v2296_v26  ;;  %v2258_v7 = vld [vmem:[%s8467_s10 + $0xf0] sm:$0xff]  ;;  %v4816_v3 = vld [vmem:[%s8466_s9 + $0x20] sm:$0xff]  ;;  %v2309_v32 = vld [vmem:[%s8467_s10 + $0x288] sm:$0xff] }
 0x56d   : > { %v2074_v4 = vpop.f32.mrf.mxu2  ;;  %v2294_v62 = vld [vmem:[%s8467_s10 + $0x210] sm:$0xff]  ;;  %v2304_v26 = vld [vmem:[%s8467_s10 + $0x260] sm:$0xff] }
 0x56e   : > { %v2149_v31 = vrot.slane %v2074_v4, 3  ;;  %2328 = vmatpush.msrb.mxu1 %v2294_v62  ;;  %v2277_v4 = vld [vmem:[%s8467_s10 + $0x188] sm:$0xff]  ;;  %2373 = vmatpush.msrb.mxu3 %v2290_v51  ;;  %v2246_v15 = vld [vmem:[%s8467_s10 + $0x90] sm:$0xff]  ;;  %v2267_v51 = vld [vmem:[%s8467_s10 + $0x138] sm:$0xff] }
 0x56f   : > { %v2254_v62 = vld [vmem:[%s8467_s10 + $0xd0] sm:$0xff] }
 0x570   : > { %v2150_v53 = vsel %vm933_vm10, %v2147_v46, %v2149_v31  ;;  %v2283_v46 = vld [vmem:[%s8467_s10 + $0x1b8] sm:$0xff]  ;;  %2374 = vmatpush.msrb.mxu3 %v2284_v38  ;;  %v2242_v56 = vld [vmem:[%s8467_s10 + $0x70] sm:$0xff] }
 0x571   : > { %v2156_v14 = vadd.f32 %v2150_v53, %v2139_v35  ;;  %2352 = vmatpush.msrb.mxu2 %v2283_v46  ;;  %v2259_v31 = vld [vmem:[%s8467_s10 + $0xf8] sm:$0xff]  ;;  %v2234_v53 = vld [vmem:[%s8467_s10 + $0x30] sm:$0xff]  ;;  %v4817_v35 = vld [vmem:[%s8466_s9 + $0x28] sm:$0xf] }
 0x572   : > { %2375 = vmatpush.msrb.mxu3 %v2278_v2  ;;  %v2236_v46 = vld [vmem:[%s8467_s10 + $0x40] sm:$0xff]  ;;  %v2287_v38 = vld [vmem:[%s8467_s10 + $0x1d8] sm:$0xff] }
 0x573   : > { %2353 = vmatpush.msrb.mxu2 %v2277_v4  ;;  %v2298_v4 = vld [vmem:[%s8467_s10 + $0x230] sm:$0xff]  ;;  %v2231_v2 = vld [vmem:[%s8467_s10 + $0x18] sm:$0xff] }
 0x574   : > { %v2094_v29 = vpop.f32.mrf.mxu3  ;;  %2376 = vmatpush.msrb.mxu3 %v2272_v8  ;;  %v2268_v8 = vld [vmem:[%s8467_s10 + $0x140] sm:$0xff] }
 0x575   : > { %v2161_v44 = vrot.slane %v2094_v29, 4 }
 0x576   : > { %2377 = vmatpush.msrb.mxu3 %v2266_v55  ;;  %v2244_v55 = vld [vmem:[%s8467_s10 + $0x80] sm:$0xff] }
 0x57c   : > { %v2097_v16 = vpop.f32.mrf.mxu3 }
 0x57d   : > { %v2162_v40 = vrot.slane %v2097_v16, 4  ;;  %v2288_v16 = vld [vmem:[%s8467_s10 + $0x1e0] sm:$0xff] }
 0x57e   : > { %2329 = vmatpush.msrb.mxu1 %v2288_v16  ;;  %v2248_v16 = vld [vmem:[%s8467_s10 + $0xa0] sm:$0xff] }
 0x57f   : > { %v2163_v19 = vsel %vm973_vm11, %v2161_v44, %v2162_v40  ;;  %v2253_v44 = vld [vmem:[%s8467_s10 + $0xc8] sm:$0xff] }
 0x580   : > { %v2171_v10 = vadd.f32 %v2163_v19, %v2154_v1  ;;  %2330 = vmatpush.msrb.mxu1 %v2282_v58  ;;  %v2240_v19 = vld [vmem:[%s8467_s10 + $0x60] sm:$0xff]  ;;  %v2311_v58 = vld [vmem:[%s8467_s10 + $0x298] sm:$0xff] }
 0x581   : > { %v2260_v1 = vld [vmem:[%s8467_s10 + $0x100] sm:$0xff] }
 0x582   : > { %v2175_v27 = vadd.f32 %v4955_v30, %v2171_v10  ;;  %2331 = vmatpush.msrb.mxu1 %v2276_v24  ;;  %2378 = vmatpush.msrb.mxu3 %v2260_v1  ;;  %v2322_v10 = vld [vmem:[%s8467_s10 + $0x2f0] sm:$0xff]  ;;  %v2273_v24 = vld [vmem:[%s8467_s10 + $0x168] sm:$0xff]  ;;  %v2232_v1 = vld [vmem:[%s8467_s10 + $0x20] sm:$0xff] }
 0x584   : > { %v2100_v42 = vpop.f32.mrf.mxu3  ;;  %v2181_v45 = vrot.slane %v2175_v27, 1  ;;  %2332 = vmatpush.msrb.mxu1 %v2270_v22  ;;  %2379 = vmatpush.msrb.mxu3 %v2254_v62  ;;  %v2293_v22 = vld [vmem:[%s8467_s10 + $0x208] sm:$0xff] }
 0x585   : > { %v2164_v54 = vrot.slane %v2100_v42, 4 }
 0x586   : > { %2333 = vmatpush.msrb.mxu1 %v2264_v18  ;;  %2380 = vmatpush.msrb.mxu3 %v2248_v16  ;;  %v2249_v18 = vld [vmem:[%s8467_s10 + $0xa8] sm:$0xff] }
 0x587   : > { %v2165_v17 = vsel %vm973_vm11, %v2162_v40, %v2164_v54  ;;  %v2265_v40 = vld [vmem:[%s8467_s10 + $0x128] sm:$0xff] }
 0x588   : > { %v2172_v11 = vadd.f32 %v2165_v17, %v2155_v37  ;;  %2334 = vmatpush.msrb.mxu1 %v2258_v7  ;;  %v2321_v17 = vld [vmem:[%s8467_s10 + $0x2e8] sm:$0xff]  ;;  %v2247_v37 = vld [vmem:[%s8467_s10 + $0x98] sm:$0xff]  ;;  %2381 = vmatpush.msrb.mxu3 %v2242_v56  ;;  %v2274_v7 = vld [vmem:[%s8467_s10 + $0x170] sm:$0xff] }
 0x58a   : > { %v2176_v52 = vadd.f32 %v4955_v30, %v2172_v11  ;;  %2335 = vmatpush.msrb.mxu1 %v2252_v61  ;;  %v2235_v11 = vld [vmem:[%s8467_s10 + $0x38] sm:$0xff]  ;;  %2382 = vmatpush.msrb.mxu3 %v2236_v46  ;;  %v2269_v61 = vld [vmem:[%s8467_s10 + $0x148] sm:$0xff] }
 0x58c   : > { %v2103_v29 = vpop.f32.mrf.mxu3  ;;  %v2182_v39 = vrot.slane %v2176_v52, 1  ;;  %2336 = vmatpush.msrb.mxu1 %v2246_v15  ;;  %v2250_v15 = vld [vmem:[%s8467_s10 + $0xb0] sm:$0xff] }
 0x58d   : > { %v2166_v50 = vrot.slane %v2103_v29, 4  ;;  %v2229_v29 = vld [vmem:[%s8467_s10 + $0x8] sm:$0xff] }
 0x58e   : > { %v2183_v21 = vsel %vm853_vm8, %v2181_v45, %v2182_v39  ;;  %2337 = vmatpush.msrb.mxu1 %v2240_v19  ;;  %v2255_v45 = vld [vmem:[%s8467_s10 + $0xd8] sm:$0xff]  ;;  %v2238_v19 = vld [vmem:[%s8467_s10 + $0x50] sm:$0xff] }
 0x58f   : > { %v2167_v57 = vsel %vm973_vm11, %v2164_v54, %v2166_v50  ;;  %v2271_v54 = vld [vmem:[%s8467_s10 + $0x158] sm:$0xff]  ;;  %v2189_v60 = vmax.f32 %v2175_v27, %v2183_v21  ;;  %v2305_v27 = vld [vmem:[%s8467_s10 + $0x268] sm:$0xff] }
 0x590   : > { %v2173_v41 = vadd.f32 %v2167_v57, %v2156_v14  ;;  %2354 = vmatpush.msrb.mxu2 %v2271_v54  ;;  %2338 = vmatpush.msrb.mxu1 %v2234_v53  ;;  %v2323_v50 = vld [vmem:[%s8467_s10 + $0x2f8] sm:$0xff]  ;;  %v2317_v14 = vld [vmem:[%s8467_s10 + $0x2c8] sm:$0xff] }
 0x591   : > { %v2285_v57 = vld [vmem:[%s8467_s10 + $0x1c8] sm:$0xff] }
 0x592   : > { %v2177_v42 = vadd.f32 %v4955_v30, %v2173_v41  ;;  %2355 = vmatpush.msrb.mxu2 %v2265_v40  ;;  %v2297_v30 = vld [vmem:[%s8467_s10 + $0x228] sm:$0xff]  ;;  %2339 = vmatpush.msrb.mxu1 %v2228_v23  ;;  %v2279_v41 = vld [vmem:[%s8467_s10 + $0x198] sm:$0xff]  ;;  %v2230_v40 = vld [vmem:[%s8467_s10 + $0x10] sm:$0xff] }
 0x593   : > { %v2261_v54 = vld [vmem:[%s8467_s10 + $0x108] sm:$0xff]  ;;  %2383 = vmatpush.msrb.mxu3 %v2230_v40 }
 0x594   : > { %v2184_v34 = vrot.slane %v2177_v42, 1  ;;  %2356 = vmatpush.msrb.mxu2 %v2259_v31  ;;  %2412 = vmatpush.msra.mxu1 %v2322_v10  ;;  %v2281_v21 = vld [vmem:[%s8467_s10 + $0x1a8] sm:$0xff]  ;;  %v2275_v31 = vld [vmem:[%s8467_s10 + $0x178] sm:$0xff] }
 0x595   : > { %v2709_v40 = vld [vmem:[%s8459_s2 + $0x268] sm:$0xff] }
 0x596   : > { %v2191_v9 = vmax.f32 %v2177_v42, %v2184_v34  ;;  %v2185_v63 = vsel %vm853_vm8, %v2182_v39, %v2184_v34  ;;  %2357 = vmatpush.msrb.mxu2 %v2253_v44  ;;  %2413 = vmatpush.msra.mxu1 %v2316_v33  ;;  %v2299_v42 = vld [vmem:[%s8467_s10 + $0x238] sm:$0xff]  ;;  %v2292_v39 = vld [vmem:[%s8467_s10 + $0x200] sm:$0xff]  ;;  %v2286_v34 = vld [vmem:[%s8467_s10 + $0x1d0] sm:$0xff] }
 0x597   : > { %v2190_v13 = vmax.f32 %v2176_v52, %v2185_v63  ;;  %v2310_v52 = vld [vmem:[%s8467_s10 + $0x290] sm:$0xff]  ;;  %v2237_v63 = vld [vmem:[%s8467_s10 + $0x48] sm:$0xff]  ;;  %v2256_v44 = vld [vmem:[%s8467_s10 + $0xe0] sm:$0xff] }
 0x598   : > { %4818 = vmatpush.msk.msrb.mxu0 %vm853_vm8, %v2191_v9  ;;  %2358 = vmatpush.msrb.mxu2 %v2247_v37  ;;  %v2243_v9 = vld [vmem:[%s8467_s10 + $0x78] sm:$0xff] }
 0x599   : > { %2414 = vmatpush.msra.mxu1 %v2310_v52  ;;  %v2251_v37 = vld [vmem:[%s8467_s10 + $0xb8] sm:$0xff] }
 0x59a   : > { %2219 = vmatpush.msrb.mxu0 %v2190_v13  ;;  %2359 = vmatpush.msrb.mxu2 %v2241_v25  ;;  %v2280_v13 = vld [vmem:[%s8467_s10 + $0x1a0] sm:$0xff]  ;;  %v2239_v25 = vld [vmem:[%s8467_s10 + $0x58] sm:$0xff] }
 0x59b   : > { %2415 = vmatpush.msra.mxu1 %v2304_v26 }
 0x59c   : > { %2220 = vmatpush.msrb.mxu0 %v2189_v60  ;;  %2360 = vmatpush.msrb.mxu2 %v2235_v11  ;;  %v2262_v60 = vld [vmem:[%s8467_s10 + $0x110] sm:$0xff] }
 0x59d   : > { %4819 = vmatmul.msk.f32.vlgmr.msrb.gmra.mxu0 %vm2195_vm14, %v4816_v3  ;;  %2416 = vmatpush.msra.mxu1 %v2298_v4  ;;  %v2263_v3 = vld [vmem:[%s8467_s10 + $0x118] sm:$0xff] }
 0x59e   : > { %2390 = vmatpush.msra.mxu0 %v2321_v17  ;;  %2361 = vmatpush.msrb.mxu2 %v2229_v29  ;;  %v2257_v17 = vld [vmem:[%s8467_s10 + $0xe8] sm:$0xff] }
 0x59f   : > { %2417 = vmatpush.msra.mxu1 %v2292_v39  ;;  %v2710_v39 = vld [vmem:[%s8459_s2 + $0x270] sm:$0xff] }
 0x5a0   : > { %2391 = vmatpush.msra.mxu0 %v2315_v49  ;;  %2434 = vmatpush.msra.mxu2 %v2323_v50  ;;  %v2245_v49 = vld [vmem:[%s8467_s10 + $0x88] sm:$0xff] }
 0x5a1   : > { %2418 = vmatpush.msra.mxu1 %v2286_v34  ;;  %v2531_v34 = vld [vmem:[%s8469_s12 + $0x18] sm:$0xff] }
 0x5a2   : > { %2392 = vmatpush.msra.mxu0 %v2309_v32  ;;  %2435 = vmatpush.msra.mxu2 %v2317_v14  ;;  %v2233_v32 = vld [vmem:[%s8467_s10 + $0x28] sm:$0xff] }
 0x5a3   : > { %2419 = vmatpush.msra.mxu1 %v2280_v13  ;;  %v2528_v13 = vld [vmem:[%s8469_s12] sm:$0xff] }
 0x5a4   : > { %2393 = vmatpush.msra.mxu0 %v2303_v59  ;;  %2436 = vmatpush.msra.mxu2 %v2311_v58 }
 0x5a5   : > { %4820 = vmatmul.msk.f32.gmra.mxu0 %vm2195_vm14, %v4817_v35  ;;  %2420 = vmatpush.msra.mxu1 %v2274_v7  ;;  %v2704_v7 = vld [vmem:[%s8459_s2 + $0x240] sm:$0xff] }
 0x5a6   : > { %2394 = vmatpush.msra.mxu0 %v2297_v30  ;;  %2437 = vmatpush.msra.mxu2 %v2305_v27 }
 0x5a7   : > { %2421 = vmatpush.msra.mxu1 %v2268_v8  ;;  %v2707_v8 = vld [vmem:[%s8459_s2 + $0x258] sm:$0xff] }
 0x5a8   : > { %2395 = vmatpush.msra.mxu0 %v2291_v6  ;;  %2438 = vmatpush.msra.mxu2 %v2299_v42  ;;  %v2535_v42 = vld [vmem:[%s8469_s12 + $0x38] sm:$0xff] }
 0x5a9   : > { %2422 = vmatpush.msra.mxu1 %v2262_v60  ;;  %2555 = vmatpush.msra.mxu3 %v2535_v42  ;;  %v2699_v60 = vld [vmem:[%s8459_s2 + $0x218] sm:$0xff] }
 0x5aa   : > { %2396 = vmatpush.msra.mxu0 %v2285_v57  ;;  %2439 = vmatpush.msra.mxu2 %v2293_v22  ;;  %v2533_v22 = vld [vmem:[%s8469_s12 + $0x28] sm:$0xff]  ;;  %v2667_v42 = vld [vmem:[%s8459_s2 + $0x118] sm:$0xff] }
 0x5ab   : > { %2423 = vmatpush.msra.mxu1 %v2256_v44  ;;  %v2702_v44 = vld [vmem:[%s8459_s2 + $0x230] sm:$0xff] }
 0x5ac   : > { %2397 = vmatpush.msra.mxu0 %v2279_v41  ;;  %2440 = vmatpush.msra.mxu2 %v2287_v38  ;;  %v2530_v38 = vld [vmem:[%s8469_s12 + $0x10] sm:$0xff] }
 0x5ad   : > { %2424 = vmatpush.msra.mxu1 %v2250_v15  ;;  %v2694_v15 = vld [vmem:[%s8459_s2 + $0x1f0] sm:$0xff] }
 0x5ae   : > { %2398 = vmatpush.msra.mxu0 %v2273_v24  ;;  %2441 = vmatpush.msra.mxu2 %v2281_v21  ;;  %v2698_v21 = vld [vmem:[%s8459_s2 + $0x210] sm:$0xff] }
 0x5af   : > { %2425 = vmatpush.msra.mxu1 %v2244_v55  ;;  %v2697_v55 = vld [vmem:[%s8459_s2 + $0x208] sm:$0xff] }
 0x5b0   : > { %2399 = vmatpush.msra.mxu0 %v2267_v51  ;;  %2442 = vmatpush.msra.mxu2 %v2275_v31  ;;  %v2534_v51 = vld [vmem:[%s8469_s12 + $0x30] sm:$0xff]  ;;  %v2695_v31 = vld [vmem:[%s8459_s2 + $0x1f8] sm:$0xff] }
 0x5b1   : > { %2426 = vmatpush.msra.mxu1 %v2238_v19  ;;  %2556 = vmatpush.msra.mxu3 %v2534_v51  ;;  %v2689_v19 = vld [vmem:[%s8459_s2 + $0x1c8] sm:$0xff] }
 0x5b2   : > { %2400 = vmatpush.msra.mxu0 %v2261_v54  ;;  %2443 = vmatpush.msra.mxu2 %v2269_v61  ;;  %v2532_v54 = vld [vmem:[%s8469_s12 + $0x20] sm:$0xff]  ;;  %v2693_v61 = vld [vmem:[%s8459_s2 + $0x1e8] sm:$0xff] }
 0x5b3   : > { %2427 = vmatpush.msra.mxu1 %v2232_v1  ;;  %2557 = vmatpush.msra.mxu3 %v2533_v22  ;;  %v2692_v1 = vld [vmem:[%s8459_s2 + $0x1e0] sm:$0xff]  ;;  %v2653_v51 = vld [vmem:[%s8459_s2 + $0xa8] sm:$0xff]  ;;  %v2650_v22 = vld [vmem:[%s8459_s2 + $0x90] sm:$0xff] }
 0x5b4   : > { %2401 = vmatpush.msra.mxu0 %v2255_v45  ;;  %2444 = vmatpush.msra.mxu2 %v2263_v3  ;;  %v2708_v45 = vld [vmem:[%s8459_s2 + $0x260] sm:$0xff]  ;;  %v2690_v3 = vld [vmem:[%s8459_s2 + $0x1d0] sm:$0xff] }
 0x5b5   : > { %2558 = vmatpush.msra.mxu3 %v2532_v54  ;;  %v2662_v54 = vld [vmem:[%s8459_s2 + $0xf0] sm:$0xff] }
 0x5b6   : > { %2402 = vmatpush.msra.mxu0 %v2249_v18  ;;  %2445 = vmatpush.msra.mxu2 %v2257_v17  ;;  %v2705_v18 = vld [vmem:[%s8459_s2 + $0x248] sm:$0xff]  ;;  %v2688_v17 = vld [vmem:[%s8459_s2 + $0x1c0] sm:$0xff] }
 0x5b7   : > { %2559 = vmatpush.msra.mxu3 %v2531_v34  ;;  %v2648_v34 = vld [vmem:[%s8459_s2 + $0x80] sm:$0xff] }
 0x5b8   : > { %2403 = vmatpush.msra.mxu0 %v2243_v9  ;;  %2446 = vmatpush.msra.mxu2 %v2251_v37  ;;  %v2529_v9 = vld [vmem:[%s8469_s12 + $0x8] sm:$0xff] }
 0x5b9   : > { %2560 = vmatpush.msra.mxu3 %v2530_v38  ;;  %v2685_v37 = vld [vmem:[%s8459_s2 + $0x1a8] sm:$0xff]  ;;  %v2654_v38 = vld [vmem:[%s8459_s2 + $0xb0] sm:$0xff] }
 0x5ba   : > { %2404 = vmatpush.msra.mxu0 %v2237_v63  ;;  %2447 = vmatpush.msra.mxu2 %v2245_v49  ;;  %v2703_v63 = vld [vmem:[%s8459_s2 + $0x238] sm:$0xff] }
 0x5bb   : > { %2561 = vmatpush.msra.mxu3 %v2529_v9  ;;  %v2683_v49 = vld [vmem:[%s8459_s2 + $0x198] sm:$0xff] }
 0x5bc   : > { %2405 = vmatpush.msra.mxu0 %v2231_v2  ;;  %2448 = vmatpush.msra.mxu2 %v2239_v25  ;;  %v2700_v2 = vld [vmem:[%s8459_s2 + $0x220] sm:$0xff] }
 0x5bd   : > { %2562 = vmatpush.msra.mxu3 %v2528_v13  ;;  %v2680_v25 = vld [vmem:[%s8459_s2 + $0x180] sm:$0xff]  ;;  %v2649_v13 = vld [vmem:[%s8459_s2 + $0x88] sm:$0xff] }
 0x5be   : > { %2449 = vmatpush.msra.mxu2 %v2233_v32  ;;  %2754 = vmatpush.msrb.mxu0 %v2708_v45  ;;  %v2678_v32 = vld [vmem:[%s8459_s2 + $0x170] sm:$0xff]  ;;  %v2645_v45 = vld [vmem:[%s8459_s2 + $0x68] sm:$0xff] }
 0x5c0   : > { %2755 = vmatpush.msrb.mxu0 %v2703_v63  ;;  %v2657_v63 = vld [vmem:[%s8459_s2 + $0xc8] sm:$0xff] }
 0x5c2   : > { %2756 = vmatpush.msrb.mxu0 %v2698_v21  ;;  %v2640_v21 = vld [vmem:[%s8459_s2 + $0x40] sm:$0xff] }
 0x5c4   : > { %2757 = vmatpush.msrb.mxu0 %v2693_v61  ;;  %v2638_v61 = vld [vmem:[%s8459_s2 + $0x30] sm:$0xff] }
 0x5c6   : > { %2758 = vmatpush.msrb.mxu0 %v2688_v17  ;;  %v2633_v17 = vld [vmem:[%s8459_s2 + $0x8] sm:$0xff] }
 0x5c8   : > { %2759 = vmatpush.msrb.mxu0 %v2683_v49  ;;  %v2634_v49 = vld [vmem:[%s8459_s2 + $0x10] sm:$0xff] }
 0x5ca   : > { %2760 = vmatpush.msrb.mxu0 %v2678_v32 }
 0x61a   : > { %v2222_v53 = vpop.f32.mrf.mxu0 }
 0x61b   : > { %2340 = vmatmul.f32.vlgmr.msrb.gmra.mxu1 %v2222_v53  ;;  %2362 = vmatmul.f32.vlgmr.msrb.gmra.mxu2 %v2222_v53 }
 0x61c   : > { %2384 = vmatmul.f32.vlgmr.msrb.gmra.mxu3 %v2222_v53  ;;  %2406 = vmatmul.f32.vlgmr.msra.gmra.mxu0 %v2222_v53 }
 0x61d   : > { %2836 = vmatpush.msrb.mxu2 %v2710_v39  ;;  %2795 = vmatpush.msrb.mxu1 %v2709_v40  ;;  %v2659_v39 = vld [vmem:[%s8459_s2 + $0xd8] sm:$0xff]  ;;  %v6955_v40 = vld [vmem:[%s5281_s19 + $0x1] ss:$0 sm:$0xff]  ;;  %s4722_s19 = sshll.u32 %s8476_s16, 1 }
 0x61e   : > { %2713 = vmatpush.msrb.mxu3 %v2707_v8  ;;  %vm2600_vm15 = vcmp.lt.s32.totalorder %v5293_v48, %v6955_v40  ;;  %v2647_v48 = vld [vmem:[%s8459_s2 + $0x78] sm:$0xff]  ;;  %vm2601_vm0 = vcmp.lt.s32.totalorder %v5356_v5, %v6955_v40  ;;  %v7026_v5 = vld [vmem:[%s8461_s4 + $0x70] sm:$0xff]  ;;  %vm2602_vm1 = vcmp.lt.s32.totalorder %v5378_v12, %v6955_v40  ;;  %vm2603_vm2 = vcmp.lt.s32.totalorder %v5403_v20, %v6955_v40  ;;  %s8448_s27 = scalar_lea.vmem %s8471_s14, %s4722_s19 }
 0x61f   : > { %2837 = vmatpush.msrb.mxu2 %v2705_v18  ;;  %2796 = vmatpush.msrb.mxu1 %v2704_v7  ;;  %v2456_v18 = vld [vmem:[%s8468_s11] sm:$0x1]  ;;  %v7057_v12 = vld [vmem:[%s8461_s4 + $0x58] sm:$0xff]  ;;  %vm2604_vm4 = vcmp.lt.s32.totalorder %v5428_v28, %v6955_v40  ;;  %vm2605_vm5 = vcmp.lt.s32.totalorder %v5447_v36, %v6955_v40  ;;  %vm2606_vm6 = vcmp.lt.s32.totalorder %v5463_v43, %v6955_v40  ;;  %v2681_v43 = vld [vmem:[%s8459_s2 + $0x188] sm:$0xff] }
 0x620   : > { %2714 = vmatpush.msrb.mxu3 %v2702_v44  ;;  %v2652_v7 = vld [vmem:[%s8459_s2 + $0xa0] sm:$0xff]  ;;  %v4832_v44 = vsel %vm2600_vm15, 1.0, %v5044_v0  ;;  %v7096_v20 = vld [vmem:[%s8461_s4 + $0x38] sm:$0xff]  ;;  %vm2607_vm7 = vcmp.lt.s32.totalorder %v5470_v47, %v6955_v40  ;;  %v2661_v47 = vld [vmem:[%s8459_s2 + $0xe8] sm:$0xff] }
 0x621   : > { %2838 = vmatpush.msrb.mxu2 %v2700_v2  ;;  %2797 = vmatpush.msrb.mxu1 %v2699_v60  ;;  %v2643_v2 = vld [vmem:[%s8459_s2 + $0x58] sm:$0xff]  ;;  %v2644_v60 = vld [vmem:[%s8459_s2 + $0x60] sm:$0xff] }
 0x622   : > { %v2225_v11 = vpop.f32.mrf.mxu0  ;;  %2715 = vmatpush.msrb.mxu3 %v2697_v55  ;;  %v2642_v55 = vld [vmem:[%s8459_s2 + $0x50] sm:$0xff]  ;;  %v7135_v28 = vld [vmem:[%s8461_s4 + $0x18] sm:$0xff] }
 0x623   : > { %2343 = vmatmul.f32.gmra.mxu1 %v2225_v11  ;;  %2365 = vmatmul.f32.gmra.mxu2 %v2225_v11  ;;  %v2711_v36 = vld [vmem:[%s8459_s2 + $0x278] sm:$0xff] }
 0x624   : > { %2387 = vmatmul.f32.gmra.mxu3 %v2225_v11  ;;  %2409 = vmatmul.f32.gmra.mxu0 %v2225_v11  ;;  %v2651_v40 = vld [vmem:[%s8459_s2 + $0x98] sm:$0xff] }
 0x625   : > { %2839 = vmatpush.msrb.mxu2 %v2695_v31  ;;  %2798 = vmatpush.msrb.mxu1 %v2694_v15  ;;  %v4823_v31 = vld [vmem:[%s5322_s18 + $0x40] sm:$0xff]  ;;  %v2639_v15 = vld [vmem:[%s8459_s2 + $0x38] sm:$0xff] }
 0x626   : > { %2716 = vmatpush.msrb.mxu3 %v2692_v1  ;;  %v2632_v1 = vld [vmem:[%s8459_s2] sm:$0xff] }
 0x627   : > { %2840 = vmatpush.msrb.mxu2 %v2690_v3  ;;  %2799 = vmatpush.msrb.mxu1 %v2689_v19  ;;  %v2635_v3 = vld [vmem:[%s8459_s2 + $0x18] sm:$0xff]  ;;  %v2637_v19 = vld [vmem:[%s8459_s2 + $0x28] sm:$0xff] }
 0x629   : > { %2841 = vmatpush.msrb.mxu2 %v2685_v37 }
 0x62b   : > { %2428 = vmatmul.f32.vlgmr.msra.gmra.mxu1 %v2222_v53  ;;  %2450 = vmatmul.f32.vlgmr.msra.gmra.mxu2 %v2222_v53  ;;  %v2684_v53 = vld [vmem:[%s8459_s2 + $0x1a0] sm:$0xff] }
 0x62c   : > { %2842 = vmatpush.msrb.mxu2 %v2680_v25  ;;  %2800 = vmatpush.msrb.mxu1 %v2684_v53  ;;  %v4824_v53 = vld [vmem:[%s5322_s18 + $0x48] sm:$0xff] }
 0x633   : > { %2430 = vmatmul.f32.gmra.mxu1 %v2225_v11  ;;  %2452 = vmatmul.f32.gmra.mxu2 %v2225_v11  ;;  %v2675_v11 = vld [vmem:[%s8459_s2 + $0x158] sm:$0xff] }
 0x634   : > { %2843 = vmatpush.msrb.mxu2 %v2675_v11  ;;  %v4833_v11 = vsel %vm2601_vm0, 1.0, %v5044_v0 }
 0x698   : > { %v6757_v62 = vpop.f32.mrf.mxu1 }
 0x699   : > { %2459 = vst [vmem:[#allocation1] sm:$0xff] %v6757_v62  ;;  %v2407_v59 = vpop.f32.mrf.mxu0  ;;  %v2457_v8 = vadd.f32 %v2456_v18, %v6757_v62  ;;  %v6986_v62 = vmul.f32 %v4832_v44, %v4823_v31  ;;  %v7122_v18 = vld [vmem:[%s8461_s4 + $0x20] sm:$0xff]  ;;  %v4828_v31 = vld [vmem:[%s5322_s18 + $0x68] sm:$0xff] }
 0x69a   : > { %v2696_v44 = vld [vmem:[%s8459_s2 + $0x200] sm:$0xff] }
 0x69e   : > { %v2363_v23 = vpop.f32.mrf.mxu2 }
 0x69f   : > { %v2385_v35 = vpop.f32.mrf.mxu3 }
 0x6a0   : > { %v2461_v29 = vld [vmem:[#allocation1 + $0x1] ss:$9 sm:$0xff]  ;;  %v2344_v30 = vpop.f32.mrf.mxu1 }
 0x6a1   : > { %2467 = vst [vmem:[#allocation1] sm:$0xff] %v2363_v23  ;;  %2462 = vrot.lane.b32.xlu0 %v2461_v29, %s5045_s22  ;;  %v2410_v10 = vpop.f32.mrf.mxu0  ;;  %v2670_v29 = vld [vmem:[%s8459_s2 + $0x130] sm:$0xff] }
 0x6a2   : > { %v2682_v30 = vld [vmem:[%s8459_s2 + $0x190] sm:$0xff]  ;;  %2844 = vmatpush.msrb.mxu2 %v2670_v29  ;;  %v2668_v10 = vld [vmem:[%s8459_s2 + $0x120] sm:$0xff]  ;;  %v7034_v29 = vld [vmem:[%s8461_s4 + $0x68] sm:$0xff] }
 0x6a6   : > { %v2366_v50 = vpop.f32.mrf.mxu2 }
 0x6a7   : > { %v2388_v16 = vpop.f32.mrf.mxu3  ;;  %v2674_v50 = vld [vmem:[%s8459_s2 + $0x150] sm:$0xff] }
 0x6a8   : > { %v6761_v6 = vld [vmem:[#allocation1 + $0x2] ss:$9 sm:$0xff]  ;;  %v2429_v33 = vpop.f32.mrf.mxu1 }
 0x6a9   : > { %2472 = vst [vmem:[#allocation1] sm:$0xff] %v2363_v23  ;;  %v2673_v23 = vld [vmem:[%s8459_s2 + $0x148] sm:$0xff] }
 0x6aa   : > { %2761 = vmatpush.msrb.mxu0 %v2673_v23  ;;  %v2665_v16 = vld [vmem:[%s8459_s2 + $0x108] sm:$0xff] }
 0x6ab   : > { %v2677_v33 = vld [vmem:[%s8459_s2 + $0x168] sm:$0xff]  ;;  %2845 = vmatpush.msrb.mxu2 %v2665_v16  ;;  %v4834_v16 = vsel %vm2602_vm1, 1.0, %v5044_v0 }
 0x6ac   : > { %2762 = vmatpush.msrb.mxu0 %v2668_v10 }
 0x6ae   : > { %v2451_v14 = vpop.f32.mrf.mxu2 }
 0x6af   : > { %v2663_v14 = vld [vmem:[%s8459_s2 + $0xf8] sm:$0xff] }
 0x6b0   : > { %v2474_v56 = vld [vmem:[#allocation1 + $0x3] ss:$9 sm:$0xff]  ;;  %v6769_v46 = vpop.f32.mrf.mxu1  ;;  %2763 = vmatpush.msrb.mxu0 %v2663_v14 }
 0x6b1   : > { %2480 = vst [vmem:[#allocation1] sm:$0xff] %v2385_v35  ;;  %2475 = vrot.lane.b32.xlu0 %v2474_v56, %s5045_s22  ;;  %v2669_v56 = vld [vmem:[%s8459_s2 + $0x128] sm:$0xff] }
 0x6b6   : > { %v2453_v27 = vpop.f32.mrf.mxu2 }
 0x6b8   : > { %v6764_v57 = vld [vmem:[#allocation1 + $0x4] ss:$9 sm:$0xff] }
 0x6b9   : > { %2485 = vst [vmem:[#allocation1] sm:$0xff] %v2385_v35  ;;  %v2679_v35 = vld [vmem:[%s8459_s2 + $0x178] sm:$0xff] }
 0x6ba   : > { %2801 = vmatpush.msrb.mxu1 %v2679_v35 }
 0x6bc   : > { %2802 = vmatpush.msrb.mxu1 %v2674_v50  ;;  %v7045_v50 = vld [vmem:[%s8461_s4 + $0x60] sm:$0xff] }
 0x6be   : > { %2803 = vmatpush.msrb.mxu1 %v2669_v56  ;;  %v7065_v56 = vld [vmem:[%s8461_s4 + $0x50] sm:$0xff] }
 0x6c0   : > { %v2487_v52 = vld [vmem:[#allocation1 + $0x5] ss:$9 sm:$0xff] }
 0x6c1   : > { %2493 = vst [vmem:[#allocation1] sm:$0xff] %v2407_v59  ;;  %2488 = vrot.lane.b32.xlu1 %v2487_v52, %s5045_s22  ;;  %v2660_v52 = vld [vmem:[%s8459_s2 + $0xe0] sm:$0xff] }
 0x6c2   : > { %2846 = vmatpush.msrb.mxu2 %v2660_v52 }
 0x6c8   : > { %v6767_v58 = vld [vmem:[#allocation1 + $0x6] ss:$9 sm:$0xff] }
 0x6c9   : > { %2498 = vst [vmem:[#allocation1] sm:$0xff] %v2407_v59  ;;  %v2687_v59 = vld [vmem:[%s8459_s2 + $0x1b8] sm:$0xff] }
 0x6ca   : > { %2717 = vmatpush.msrb.mxu3 %v2687_v59  ;;  %v7017_v59 = vld [vmem:[%s8461_s4 + $0x78] sm:$0xff] }
 0x6cc   : > { %2718 = vmatpush.msrb.mxu3 %v2682_v30 }
 0x6ce   : > { %2719 = vmatpush.msrb.mxu3 %v2677_v33 }
 0x6d0   : > { %v2500_v41 = vld [vmem:[#allocation1 + $0x7] ss:$9 sm:$0xff] }
 0x6d1   : > { %2507 = vst [vmem:[#allocation1] sm:$0xff] %v6769_v46  ;;  %2501 = vrot.lane.b32.xlu1 %v2500_v41, %s5045_s22  ;;  %v2672_v41 = vld [vmem:[%s8459_s2 + $0x140] sm:$0xff] }
 0x6d2   : > { %2720 = vmatpush.msrb.mxu3 %v2672_v41 }
 0x6d4   : > { %2721 = vmatpush.msrb.mxu3 %v2667_v42  ;;  %v4826_v42 = vld [vmem:[%s5322_s18 + $0x58] sm:$0xff] }
 0x6d6   : > { %2722 = vmatpush.msrb.mxu3 %v2662_v54  ;;  %v7104_v54 = vld [vmem:[%s8461_s4 + $0x30] sm:$0xff] }
 0x6d8   : > { %v2509_v26 = vld [vmem:[#allocation1 + $0x1] ss:$9 sm:$0xff]  ;;  %2723 = vmatpush.msrb.mxu3 %v2657_v63  ;;  %v4836_v63 = vsel %vm2604_vm4, 1.0, %v5044_v0 }
 0x6d9   : > { %2515 = vst [vmem:[#allocation1] sm:$0xff] %v2453_v27  ;;  %2510 = vrot.lane.b32.xlu2 %v2509_v26, %s5045_s22  ;;  %v2658_v26 = vld [vmem:[%s8459_s2 + $0xd0] sm:$0xff] }
 0x6da   : > { %2764 = vmatpush.msrb.mxu0 %v2658_v26  ;;  %2724 = vmatpush.msrb.mxu3 %v2652_v7  ;;  %v7160_v7 = vld [vmem:[%s8461_s4] sm:$0xff] }
 0x6dc   : > { %2765 = vmatpush.msrb.mxu0 %v2653_v51  ;;  %2725 = vmatpush.msrb.mxu3 %v2647_v48  ;;  %v4835_v51 = vsel %vm2603_vm2, 1.0, %v5044_v0  ;;  %v4829_v48 = vld [vmem:[%s5322_s18 + $0x70] sm:$0xff] }
 0x6de   : > { %2766 = vmatpush.msrb.mxu0 %v2648_v34  ;;  %2726 = vmatpush.msrb.mxu3 %v2642_v55  ;;  %v2686_v55 = vld [vmem:[%s8459_s2 + $0x1b0] sm:$0xff] }
 0x6e0   : > { %v6774_v24 = vld [vmem:[#allocation1 + $0x2] ss:$9 sm:$0xff]  ;;  %2767 = vmatpush.msrb.mxu0 %v2643_v2  ;;  %2727 = vmatpush.msrb.mxu3 %v2637_v19 }
 0x6e1   : > { %2520 = vst [vmem:[#allocation1] sm:$0xff] %v2453_v27  ;;  %v2664_v27 = vld [vmem:[%s8459_s2 + $0x100] sm:$0xff]  ;;  %v4830_v19 = vld [vmem:[%s5322_s18 + $0x78] sm:$0xff] }
 0x6e2   : > { %2804 = vmatpush.msrb.mxu1 %v2664_v27  ;;  %2768 = vmatpush.msrb.mxu0 %v2638_v61  ;;  %v7073_v27 = vld [vmem:[%s8461_s4 + $0x48] sm:$0xff] }
 0x6e3   : > { %2728 = vmatpush.msrb.mxu3 %v2632_v1 }
 0x6e4   : > { %2805 = vmatpush.msrb.mxu1 %v2659_v39  ;;  %2769 = vmatpush.msrb.mxu0 %v2633_v17  ;;  %v4838_v17 = vsel %vm2606_vm6, 1.0, %v5044_v0 }
 0x6e5   : > { %2770 = vmatmul.f32.vlgmr.msrb.gmra.mxu0 %v6986_v62 }
 0x6e6   : > { %2806 = vmatpush.msrb.mxu1 %v2654_v38  ;;  %3085 = vmatpush.msra.mxu0 %v7017_v59 }
 0x6e8   : > { %v2522_v4 = vld [vmem:[#allocation1 + $0x3] ss:$9 sm:$0xff]  ;;  %2807 = vmatpush.msrb.mxu1 %v2649_v13  ;;  %3086 = vmatpush.msra.mxu0 %v7026_v5 }
 0x6e9   : > { %2523 = vrot.lane.b32.xlu2 %v2522_v4, %s5045_s22  ;;  %v2655_v4 = vld [vmem:[%s8459_s2 + $0xb8] sm:$0xff]  ;;  %v7142_v13 = vld [vmem:[%s8461_s4 + $0x10] sm:$0xff] }
 0x6ea   : > { %2847 = vmatpush.msrb.mxu2 %v2655_v4  ;;  %2808 = vmatpush.msrb.mxu1 %v2644_v60  ;;  %v7084_v4 = vld [vmem:[%s8461_s4 + $0x40] sm:$0xff]  ;;  %v2706_v60 = vld [vmem:[%s8459_s2 + $0x250] sm:$0xff] }
 0x6eb   : > { %3087 = vmatpush.msra.mxu0 %v7034_v29 }
 0x6ec   : > { %2848 = vmatpush.msrb.mxu2 %v2650_v22  ;;  %2809 = vmatpush.msrb.mxu1 %v2639_v15  ;;  %v7091_v22 = vmul.f32 %v4835_v51, %v4826_v42  ;;  %v2630_v15 = vmul.f32 %v4838_v17, %v4829_v48 }
 0x6ed   : > { %3088 = vmatpush.msra.mxu0 %v7045_v50 }
 0x6ee   : > { %2849 = vmatpush.msrb.mxu2 %v2645_v45  ;;  %2810 = vmatpush.msrb.mxu1 %v2634_v49  ;;  %v7112_v45 = vld [vmem:[%s8461_s4 + $0x28] sm:$0xff]  ;;  %v2676_v49 = vld [vmem:[%s8459_s2 + $0x160] sm:$0xff] }
 0x6ef   : > { %2811 = vmatmul.f32.vlgmr.msrb.gmra.mxu1 %v6986_v62  ;;  %3089 = vmatpush.msra.mxu0 %v7057_v12 }
 0x6f0   : > { %2850 = vmatpush.msrb.mxu2 %v2640_v21  ;;  %3142 = vmatpush.msra.mxu1 %v7017_v59  ;;  %v7150_v21 = vld [vmem:[%s8461_s4 + $0x8] sm:$0xff] }
 0x6f1   : > { %3090 = vmatpush.msra.mxu0 %v7065_v56 }
 0x6f2   : > { %2851 = vmatpush.msrb.mxu2 %v2635_v3  ;;  %3143 = vmatpush.msra.mxu1 %v7026_v5  ;;  %v2701_v3 = vld [vmem:[%s8459_s2 + $0x228] sm:$0xff] }
 0x6f3   : > { %2852 = vmatmul.f32.vlgmr.msrb.gmra.mxu2 %v6986_v62  ;;  %3091 = vmatpush.msra.mxu0 %v7073_v27 }
 0x6f4   : > { %3144 = vmatpush.msra.mxu1 %v7034_v29 }
 0x6f5   : > { %3092 = vmatpush.msra.mxu0 %v7084_v4 }
 0x6f6   : > { %3145 = vmatpush.msra.mxu1 %v7045_v50 }
 0x6f7   : > { %3093 = vmatpush.msra.mxu0 %v7096_v20 }
 0x6f8   : > { %3146 = vmatpush.msra.mxu1 %v7057_v12 }
 0x6f9   : > { %3094 = vmatpush.msra.mxu0 %v7104_v54 }
 0x6fa   : > { %3147 = vmatpush.msra.mxu1 %v7065_v56 }
 0x6fb   : > { %3095 = vmatpush.msra.mxu0 %v7112_v45 }
 0x6fc   : > { %3148 = vmatpush.msra.mxu1 %v7073_v27 }
 0x6fd   : > { %3096 = vmatpush.msra.mxu0 %v7122_v18 }
 0x6fe   : > { %3149 = vmatpush.msra.mxu1 %v7084_v4 }
 0x6ff   : > { %3097 = vmatpush.msra.mxu0 %v7135_v28 }
 0x700   : > { %3150 = vmatpush.msra.mxu1 %v7096_v20 }
 0x701   : > { %3098 = vmatpush.msra.mxu0 %v7142_v13 }
 0x702   : > { %3151 = vmatpush.msra.mxu1 %v7104_v54 }
 0x703   : > { %3099 = vmatpush.msra.mxu0 %v7150_v21 }
 0x704   : > { %3152 = vmatpush.msra.mxu1 %v7112_v45 }
 0x705   : > { %3100 = vmatpush.msra.mxu0 %v7160_v7 }
 0x706   : > { %3153 = vmatpush.msra.mxu1 %v7122_v18 }
 0x708   : > { %3154 = vmatpush.msra.mxu1 %v7135_v28 }
 0x70a   : > { %3155 = vmatpush.msra.mxu1 %v7142_v13 }
 0x70c   : > { %3156 = vmatpush.msra.mxu1 %v7150_v21 }
 0x70e   : > { %3157 = vmatpush.msra.mxu1 %v7160_v7 }
 0x713   : > { %v2463_v9 = vpop.permute.xlu0 %2462 }
 0x714   : > { %v2465_v37 = vadd.f32 %v2463_v9, %v2457_v8  ;;  %v4827_v9 = vld [vmem:[%s5322_s18 + $0x60] sm:$0xff]  ;;  %v4837_v8 = vsel %vm2605_vm5, 1.0, %v5044_v0 }
 0x715   : > { %v7130_v2 = vmul.f32 %v4836_v63, %v4827_v9  ;;  %v2629_v61 = vmul.f32 %v4837_v8, %v4828_v31 }
 0x716   : > { %v2471_v32 = vadd.f32 %v6761_v6, %v2465_v37  ;;  %v7020_v6 = vmul.f32 %v4833_v11, %v4824_v53  ;;  %v2691_v37 = vld [vmem:[%s8459_s2 + $0x1d8] sm:$0xff]  ;;  %v2666_v53 = vld [vmem:[%s8459_s2 + $0x110] sm:$0xff] }
 0x717   : > { %v2646_v11 = vld [vmem:[%s8459_s2 + $0x70] sm:$0xff] }
 0x718   : > { %2855 = vmatmul.f32.gmra.mxu2 %v7020_v6  ;;  %2773 = vmatmul.f32.gmra.mxu0 %v7020_v6 }
 0x719   : > { %2814 = vmatmul.f32.gmra.mxu1 %v7020_v6 }
 0x723   : > { %v2476_v25 = vpop.permute.xlu0 %2475 }
 0x724   : > { %v2478_v23 = vadd.f32 %v2476_v25, %v2471_v32  ;;  %v4839_v25 = vsel %vm2607_vm7, 1.0, %v5044_v0  ;;  %v2671_v32 = vld [vmem:[%s8459_s2 + $0x138] sm:$0xff]  ;;  %v2656_v0 = vld [vmem:[%s8459_s2 + $0xc0] sm:$0xff] }
 0x725   : > { %v2631_v1 = vmul.f32 %v4839_v25, %v4830_v19 }
 0x726   : > { %v2484_v30 = vadd.f32 %v6764_v57, %v2478_v23  ;;  %v4825_v57 = vld [vmem:[%s5322_s18 + $0x50] sm:$0xff]  ;;  %v2641_v23 = vld [vmem:[%s8459_s2 + $0x48] sm:$0xff] }
 0x727   : > { %v7052_v33 = vmul.f32 %v4834_v16, %v4825_v57 }
 0x729   : > { %2858 = vmatmul.f32.gmra.mxu2 %v7052_v33  ;;  %2776 = vmatmul.f32.gmra.mxu0 %v7052_v33 }
 0x72a   : > { %2817 = vmatmul.f32.gmra.mxu1 %v7052_v33 }
 0x731   : > { %2861 = vmatmul.f32.gmra.mxu2 %v7091_v22  ;;  %2779 = vmatmul.f32.gmra.mxu0 %v7091_v22 }
 0x732   : > { %2820 = vmatmul.f32.gmra.mxu1 %v7091_v22 }
 0x733   : > { %v2489_v35 = vpop.permute.xlu1 %2488  ;;  %v2511_v52 = vpop.permute.xlu2 %2510 }
 0x734   : > { %v2491_v10 = vadd.f32 %v2489_v35, %v2484_v30  ;;  %v2636_v35 = vld [vmem:[%s8459_s2 + $0x20] sm:$0xff] }
 0x736   : > { %v2497_v14 = vadd.f32 %v6767_v58, %v2491_v10 }
 0x739   : > { %2864 = vmatmul.f32.gmra.mxu2 %v7130_v2  ;;  %2782 = vmatmul.f32.gmra.mxu0 %v7130_v2 }
 0x73a   : > { %2823 = vmatmul.f32.gmra.mxu1 %v7130_v2 }
 0x741   : > { %2867 = vmatmul.f32.gmra.mxu2 %v2629_v61  ;;  %2785 = vmatmul.f32.gmra.mxu0 %v2629_v61 }
 0x742   : > { %2826 = vmatmul.f32.gmra.mxu1 %v2629_v61 }
 0x743   : > { %v2502_v41 = vpop.permute.xlu1 %2501  ;;  %v2524_v34 = vpop.permute.xlu2 %2523 }
 0x744   : > { %v2504_v26 = vadd.f32 %v2502_v41, %v2497_v14 }
 0x746   : > { %v2505_v58 = vadd.f32 %v2504_v26, %v6769_v46 }
 0x748   : > { %v2513_v39 = vadd.f32 %v2511_v52, %v2505_v58 }
 0x749   : > { %2870 = vmatmul.f32.gmra.mxu2 %v2630_v15  ;;  %2788 = vmatmul.f32.gmra.mxu0 %v2630_v15 }
 0x74a   : > { %v2519_v46 = vadd.f32 %v6774_v24, %v2513_v39  ;;  %2829 = vmatmul.f32.gmra.mxu1 %v2630_v15 }
 0x74c   : > { %v2526_v38 = vadd.f32 %v2524_v34, %v2519_v46 }
 0x74e   : > { %v2527_v24 = vmax.f32 %v2526_v38, 0.0 }
 0x750   : > { %4821 = vmatmul.msk.f32.vlgmr.msra.gmra.mxu3 %vm2543_vm3, %v2527_v24 }
 0x751   : > { %2877 = vmatpush.msra.mxu3 %v2711_v36  ;;  %2873 = vmatmul.f32.gmra.mxu2 %v2631_v1 }
 0x752   : > { %2791 = vmatmul.f32.gmra.mxu0 %v2631_v1  ;;  %2832 = vmatmul.f32.gmra.mxu1 %v2631_v1 }
 0x753   : > { %2878 = vmatpush.msra.mxu3 %v2706_v60 }
 0x755   : > { %2879 = vmatpush.msra.mxu3 %v2701_v3 }
 0x757   : > { %2880 = vmatpush.msra.mxu3 %v2696_v44 }
 0x758   : > { %2729 = vmatmul.f32.vlgmr.msrb.gmra.mxu3 %v6986_v62 }
 0x759   : > { %2881 = vmatpush.msra.mxu3 %v2691_v37 }
 0x75b   : > { %2882 = vmatpush.msra.mxu3 %v2686_v55 }
 0x75d   : > { %2883 = vmatpush.msra.mxu3 %v2681_v43 }
 0x75f   : > { %2884 = vmatpush.msra.mxu3 %v2676_v49 }
 0x760   : > { %2732 = vmatmul.f32.gmra.mxu3 %v7020_v6 }
 0x761   : > { %2885 = vmatpush.msra.mxu3 %v2671_v32 }
 0x763   : > { %2886 = vmatpush.msra.mxu3 %v2666_v53 }
 0x765   : > { %2887 = vmatpush.msra.mxu3 %v2661_v47  ;;  %v7252_v47 = vld [vmem:[%s8460_s3] ss:$0 sm:$0xff] }
 0x767   : > { %2888 = vmatpush.msra.mxu3 %v2656_v0 }
 0x768   : > { %2735 = vmatmul.f32.gmra.mxu3 %v7052_v33 }
 0x769   : > { %2889 = vmatpush.msra.mxu3 %v2651_v40 }
 0x76b   : > { %2890 = vmatpush.msra.mxu3 %v2646_v11 }
 0x76d   : > { %2891 = vmatpush.msra.mxu3 %v2641_v23 }
 0x76f   : > { %2892 = vmatpush.msra.mxu3 %v2636_v35 }
 0x770   : > { %2738 = vmatmul.f32.gmra.mxu3 %v7091_v22 }
 0x778   : > { %2741 = vmatmul.f32.gmra.mxu3 %v7130_v2 }
 0x780   : > { %2744 = vmatmul.f32.gmra.mxu3 %v2629_v61 }
 0x788   : > { %2747 = vmatmul.f32.gmra.mxu3 %v2630_v15 }
 0x790   : > { %2750 = vmatmul.f32.gmra.mxu3 %v2631_v1 }
 0x798   : > { %2893 = vmatmul.f32.vlgmr.msra.gmra.mxu3 %v6986_v62  ;;  %v2771_v62 = vpop.f32.mrf.mxu0 }
 0x799   : > { %v2926_v34 = vrot.slane %v2771_v62, 1 }
 0x7a0   : > { %2896 = vmatmul.f32.gmra.mxu3 %v7020_v6  ;;  %v2812_v6 = vpop.f32.mrf.mxu1  ;;  %v2774_v26 = vpop.f32.mrf.mxu0 }
 0x7a1   : > { %v2927_v38 = vrot.slane %v2774_v26, 1  ;;  %v2965_v9 = vrot.slane %v2812_v6, 2 }
 0x7a8   : > { %2899 = vmatmul.f32.gmra.mxu3 %v7052_v33  ;;  %v2853_v33 = vpop.f32.mrf.mxu2  ;;  %v2815_v58 = vpop.f32.mrf.mxu1 }
 0x7a9   : > { %v2777_v39 = vpop.f32.mrf.mxu0  ;;  %v2966_v63 = vrot.slane %v2815_v58, 2  ;;  %v3004_v36 = vrot.slane %v2853_v33, 3 }
 0x7aa   : > { %v2929_v44 = vrot.slane %v2777_v39, 1 }
 0x7ab   : > { %v2967_v60 = vsel %vm893_vm9, %v2965_v9, %v2966_v63 }
 0x7ac   : > { %v2930_v55 = vsel %vm853_vm8, %v2927_v38, %v2929_v44 }
 0x7b0   : > { %2902 = vmatmul.f32.gmra.mxu3 %v7091_v22  ;;  %v2856_v51 = vpop.f32.mrf.mxu2  ;;  %v2818_v46 = vpop.f32.mrf.mxu1 }
 0x7b1   : > { %v2780_v31 = vpop.f32.mrf.mxu0  ;;  %v3005_v3 = vrot.slane %v2856_v51, 3  ;;  %v2968_v37 = vrot.slane %v2818_v46, 2 }
 0x7b2   : > { %v2931_v11 = vrot.slane %v2780_v31, 1 }
 0x7b3   : > { %v2969_v0 = vsel %vm893_vm9, %v2966_v63, %v2968_v37 }
 0x7b4   : > { %v2932_v26 = vsel %vm853_vm8, %v2929_v44, %v2931_v11 }
 0x7b8   : > { %2905 = vmatmul.f32.gmra.mxu3 %v7130_v2  ;;  %v2859_v24 = vpop.f32.mrf.mxu2  ;;  %v2928_v2 = vsel %vm853_vm8, %v2926_v34, %v2927_v38  ;;  %v2821_v48 = vpop.f32.mrf.mxu1 }
 0x7b9   : > { %v2783_v53 = vpop.f32.mrf.mxu0  ;;  %v3007_v40 = vrot.slane %v2859_v24, 3  ;;  %v2970_v33 = vrot.slane %v2821_v48, 2 }
 0x7ba   : > { %v2933_v9 = vrot.slane %v2783_v53, 1 }
 0x7bb   : > { %v2971_v38 = vsel %vm893_vm9, %v2968_v37, %v2970_v33 }
 0x7c0   : > { %2908 = vmatmul.f32.gmra.mxu3 %v2629_v61  ;;  %v2862_v43 = vpop.f32.mrf.mxu2  ;;  %v2824_v62 = vpop.f32.mrf.mxu1 }
 0x7c1   : > { %v3009_v24 = vrot.slane %v2862_v43, 3 }
 0x7c8   : > { %2911 = vmatmul.f32.gmra.mxu3 %v2630_v15  ;;  %v3006_v15 = vsel %vm933_vm10, %v3004_v36, %v3005_v3  ;;  %v2865_v34 = vpop.f32.mrf.mxu2  ;;  %v3010_v36 = vsel %vm933_vm10, %v3007_v40, %v3009_v24  ;;  %v2827_v44 = vpop.f32.mrf.mxu1 }
 0x7d0   : > { %2914 = vmatmul.f32.gmra.mxu3 %v2631_v1 }
 0x7d3   : > { %v7233_v30 = vpop.f32.mrf.mxu3 }
 0x7db   : > { %v2730_v10 = vpop.f32.mrf.mxu3 }
 0x7dc   : > { %v2949_v61 = vadd.f32 %v2928_v2, %v2730_v10  ;;  %v2786_v2 = vpop.f32.mrf.mxu0 }
 0x7dd   : > { %v2935_v43 = vrot.slane %v2786_v2, 1 }
 0x7de   : > { %v2988_v17 = vadd.f32 %v2967_v60, %v2949_v61  ;;  %v2972_v60 = vrot.slane %v2824_v62, 2  ;;  %v2830_v62 = vpop.f32.mrf.mxu1 }
 0x7e0   : > { %v3027_v1 = vadd.f32 %v3006_v15, %v2988_v17  ;;  %v2973_v37 = vsel %vm893_vm9, %v2970_v33, %v2972_v60 }
 0x7e3   : > { %v2733_v57 = vpop.f32.mrf.mxu3 }
 0x7e4   : > { %v2950_v32 = vadd.f32 %v2930_v55, %v2733_v57  ;;  %v3008_v57 = vsel %vm933_vm10, %v3005_v3, %v3007_v40  ;;  %v2934_v3 = vsel %vm853_vm8, %v2931_v11, %v2933_v9  ;;  %v3011_v55 = vrot.slane %v2865_v34, 3 }
 0x7e5   : > { %v2974_v40 = vrot.slane %v2827_v44, 2  ;;  %v2936_v11 = vsel %vm853_vm8, %v2933_v9, %v2935_v43 }
 0x7e6   : > { %v2989_v10 = vadd.f32 %v2969_v0, %v2950_v32  ;;  %v2789_v32 = vpop.f32.mrf.mxu0  ;;  %v3012_v0 = vsel %vm933_vm10, %v3009_v24, %v3011_v55  ;;  %v2976_v24 = vrot.slane %v2830_v62, 2 }
 0x7e8   : > { %v3028_v39 = vadd.f32 %v3008_v57, %v2989_v10  ;;  %v2975_v57 = vsel %vm893_vm9, %v2972_v60, %v2974_v40 }
 0x7eb   : > { %v2736_v16 = vpop.f32.mrf.mxu3 }
 0x7ec   : > { %v2951_v46 = vadd.f32 %v2932_v26, %v2736_v16  ;;  %v2937_v26 = vrot.slane %v2789_v32, 1 }
 0x7ee   : > { %v2938_v9 = vsel %vm853_vm8, %v2935_v43, %v2937_v26 }
 0x7f3   : > { %v7235_v14 = vpop.f32.mrf.mxu3 }
 0x7f4   : > { %v2952_v15 = vadd.f32 %v2934_v3, %v7235_v14 }
 0x7fb   : > { %v7237_v52 = vpop.f32.mrf.mxu3 }
 0x7fc   : > { %v2953_v10 = vadd.f32 %v2936_v11, %v7237_v52 }
 0x803   : > { %v7239_v41 = vpop.f32.mrf.mxu3 }
 0x80b   : > { %v7241_v42 = vpop.f32.mrf.mxu3 }
 0x813   : > { %v7243_v22 = vpop.f32.mrf.mxu3 }
 0x81b   : > { %v2894_v8 = vpop.f32.mrf.mxu3 }
 0x81c   : > { %v3043_v19 = vrot.slane %v2894_v8, 4  ;;  %v2990_v8 = vadd.f32 %v2971_v38, %v2951_v46 }
 0x81e   : > { %v3029_v17 = vadd.f32 %v3010_v36, %v2990_v8  ;;  %v2954_v8 = vadd.f32 %v2938_v9, %v7239_v41  ;;  %v2977_v36 = vsel %vm893_vm9, %v2974_v40, %v2976_v24 }
 0x823   : > { %v2897_v49 = vpop.f32.mrf.mxu3 }
 0x824   : > { %v3044_v25 = vrot.slane %v2897_v49, 4 }
 0x826   : > { %v3045_v23 = vsel %vm973_vm11, %v3043_v19, %v3044_v25  ;;  %v2868_v19 = vpop.f32.mrf.mxu2 }
 0x827   : > { %v3066_v35 = vadd.f32 %v3045_v23, %v3027_v1  ;;  %v2991_v1 = vadd.f32 %v2973_v37, %v2952_v15  ;;  %v3013_v33 = vrot.slane %v2868_v19, 3 }
 0x829   : > { %v7257_v6 = vadd.f32 %v7252_v47, %v3066_v35  ;;  %v3030_v35 = vadd.f32 %v3012_v0, %v2991_v1  ;;  %v3014_v38 = vsel %vm933_vm10, %v3011_v55, %v3013_v33 }
 0x82b   : > { %v2900_v58 = vpop.f32.mrf.mxu3  ;;  %3101 = vmatmul.f32.vlgmr.msra.gmra.mxu0 %v7257_v6 }
 0x82c   : > { %v3046_v51 = vrot.slane %v2900_v58, 4 }
 0x82e   : > { %v3047_v63 = vsel %vm973_vm11, %v3044_v25, %v3046_v51  ;;  %v2871_v46 = vpop.f32.mrf.mxu2 }
 0x82f   : > { %v3067_v31 = vadd.f32 %v3047_v63, %v3028_v39  ;;  %v2992_v39 = vadd.f32 %v2975_v57, %v2953_v10  ;;  %v2792_v63 = vpop.f32.mrf.mxu0  ;;  %v3015_v60 = vrot.slane %v2871_v46, 3 }
 0x830   : > { %v2939_v3 = vrot.slane %v2792_v63, 1 }
 0x831   : > { %v7265_v61 = vadd.f32 %v7252_v47, %v3067_v31  ;;  %v3031_v31 = vadd.f32 %v3014_v38, %v2992_v39  ;;  %v3016_v37 = vsel %vm933_vm10, %v3013_v33, %v3015_v60 }
 0x832   : > { %v2940_v43 = vsel %vm853_vm8, %v2937_v26, %v2939_v3  ;;  %v2956_v10 = vadd.f32 %v2939_v3, %v7243_v22  ;;  %v3376_v3 = vld [vmem:[%s8464_s7 + $0x268] sm:$0xff] }
 0x833   : > { %v2903_v16 = vpop.f32.mrf.mxu3  ;;  %3104 = vmatmul.f32.gmra.mxu0 %v7265_v61  ;;  %v2955_v1 = vadd.f32 %v2940_v43, %v7241_v42 }
 0x834   : > { %v3048_v48 = vrot.slane %v2903_v16, 4  ;;  %v2833_v16 = vpop.f32.mrf.mxu1  ;;  %3461 = vmatpush.msrb.mxu0 %v3376_v3  ;;  %v3335_v3 = vld [vmem:[%s8464_s7 + $0x120] sm:$0xff] }
 0x835   : > { %v2978_v55 = vrot.slane %v2833_v16, 2 }
 0x836   : > { %v3049_v49 = vsel %vm973_vm11, %v3046_v51, %v3048_v48 }
 0x837   : > { %v3068_v25 = vadd.f32 %v3049_v49, %v3029_v17  ;;  %v2993_v17 = vadd.f32 %v2977_v36, %v2954_v8  ;;  %v2874_v49 = vpop.f32.mrf.mxu2  ;;  %v2979_v32 = vsel %vm893_vm9, %v2976_v24, %v2978_v55  ;;  %v2995_v42 = vadd.f32 %v2978_v55, %v2956_v10  ;;  %v3359_v10 = vld [vmem:[%s8464_s7 + $0x1e0] sm:$0xff] }
 0x838   : > { %v3017_v0 = vrot.slane %v2874_v49, 3 }
 0x839   : > { %v7274_v53 = vadd.f32 %v7252_v47, %v3068_v25  ;;  %v3032_v25 = vadd.f32 %v3016_v37, %v2993_v17 }
 0x83a   : > { %v3034_v39 = vadd.f32 %v3017_v0, %v2995_v42  ;;  %v3355_v42 = vld [vmem:[%s8464_s7 + $0x1c0] sm:$0xff] }
 0x83b   : > { %v2906_v23 = vpop.f32.mrf.mxu3  ;;  %3107 = vmatmul.f32.gmra.mxu0 %v7274_v53 }
 0x83c   : > { %v3050_v14 = vrot.slane %v2906_v23, 4  ;;  %v2994_v23 = vadd.f32 %v2979_v32, %v2955_v1  ;;  %v3369_v1 = vld [vmem:[%s8464_s7 + $0x230] sm:$0xff]  ;;  %v3370_v32 = vld [vmem:[%s8464_s7 + $0x238] sm:$0xff] }
 0x83e   : > { %v3051_v58 = vsel %vm973_vm11, %v3048_v48, %v3050_v14 }
 0x83f   : > { %v3069_v51 = vadd.f32 %v3051_v58, %v3030_v35  ;;  %v3018_v35 = vsel %vm933_vm10, %v3015_v60, %v3017_v0  ;;  %v3371_v0 = vld [vmem:[%s8464_s7 + $0x240] sm:$0xff] }
 0x840   : > { %v3033_v33 = vadd.f32 %v3018_v35, %v2994_v23  ;;  %3462 = vmatpush.msrb.mxu0 %v3371_v0  ;;  %v3365_v23 = vld [vmem:[%s8464_s7 + $0x210] sm:$0xff]  ;;  %v3367_v35 = vld [vmem:[%s8464_s7 + $0x220] sm:$0xff]  ;;  %v3320_v0 = vld [vmem:[%s8464_s7 + $0xa8] sm:$0xff] }
 0x841   : > { %v3080_v34 = vadd.f32 %v7252_v47, %v3069_v51 }
 0x843   : > { %v2909_v2 = vpop.f32.mrf.mxu3  ;;  %3110 = vmatmul.f32.gmra.mxu0 %v3080_v34 }
 0x844   : > { %v3052_v52 = vrot.slane %v2909_v2, 4 }
 0x846   : > { %v3053_v44 = vsel %vm973_vm11, %v3050_v14, %v3052_v52 }
 0x847   : > { %v3070_v48 = vadd.f32 %v3053_v44, %v3031_v31 }
 0x849   : > { %v3081_v15 = vadd.f32 %v7252_v47, %v3070_v48 }
 0x84b   : > { %v2912_v19 = vpop.f32.mrf.mxu3  ;;  %3113 = vmatmul.f32.gmra.mxu0 %v3081_v15 }
 0x84c   : > { %v3054_v41 = vrot.slane %v2912_v19, 4 }
 0x84e   : > { %v3055_v40 = vsel %vm973_vm11, %v3052_v52, %v3054_v41 }
 0x84f   : > { %v3071_v11 = vadd.f32 %v3055_v40, %v3032_v25  ;;  %v3372_v40 = vld [vmem:[%s8464_s7 + $0x248] sm:$0xff] }
 0x851   : > { %v3082_v14 = vadd.f32 %v7252_v47, %v3071_v11  ;;  %v3364_v11 = vld [vmem:[%s8464_s7 + $0x208] sm:$0xff] }
 0x853   : > { %v2915_v62 = vpop.f32.mrf.mxu3  ;;  %3116 = vmatmul.f32.gmra.mxu0 %v3082_v14 }
 0x854   : > { %v3056_v57 = vrot.slane %v2915_v62, 4  ;;  %v3360_v62 = vld [vmem:[%s8464_s7 + $0x1e8] sm:$0xff] }
 0x856   : > { %v3057_v26 = vsel %vm973_vm11, %v3054_v41, %v3056_v57  ;;  %v3073_v46 = vadd.f32 %v3056_v57, %v3034_v39  ;;  %v3361_v57 = vld [vmem:[%s8464_s7 + $0x1f0] sm:$0xff] }
 0x857   : > { %v3072_v58 = vadd.f32 %v3057_v26, %v3033_v33  ;;  %v3362_v33 = vld [vmem:[%s8464_s7 + $0x1f8] sm:$0xff]  ;;  %v3349_v39 = vld [vmem:[%s8464_s7 + $0x190] sm:$0xff] }
 0x858   : > { %v3084_v38 = vadd.f32 %v7252_v47, %v3073_v46  ;;  %v3354_v26 = vld [vmem:[%s8464_s7 + $0x1b8] sm:$0xff] }
 0x859   : > { %v3083_v51 = vadd.f32 %v7252_v47, %v3072_v58  ;;  %v3356_v58 = vld [vmem:[%s8464_s7 + $0x1c8] sm:$0xff]  ;;  %v3350_v46 = vld [vmem:[%s8464_s7 + $0x198] sm:$0xff] }
 0x85b   : > { %3119 = vmatmul.f32.gmra.mxu0 %v3083_v51 }
 0x863   : > { %3122 = vmatmul.f32.gmra.mxu0 %v3084_v38 }
 0x8a8   : > { %v3102_v24 = vpop.f32.mrf.mxu0 }
 0x8a9   : > { %v7301_v9 = vsub.f32 %v7257_v6, %v3102_v24  ;;  %v3352_v24 = vld [vmem:[%s8464_s7 + $0x1a8] sm:$0xff] }
 0x8ab   : > { %v3134_v22 = vmul.f32 %v7301_v9, %v7301_v9 }
 0x8ad   : > { %3158 = vmatmul.f32.vlgmr.msra.gmra.mxu1 %v3134_v22  ;;  %v3344_v22 = vld [vmem:[%s8464_s7 + $0x168] sm:$0xff] }
 0x8b0   : > { %v3105_v63 = vpop.f32.mrf.mxu0 }
 0x8b1   : > { %v7306_v2 = vsub.f32 %v7265_v61, %v3105_v63  ;;  %v3374_v61 = vld [vmem:[%s8464_s7 + $0x258] sm:$0xff]  ;;  %v3345_v63 = vld [vmem:[%s8464_s7 + $0x170] sm:$0xff] }
 0x8b2   : > { %3380 = vmatpush.msra.mxu2 %v3374_v61  ;;  %v3342_v61 = vld [vmem:[%s8464_s7 + $0x158] sm:$0xff] }
 0x8b3   : > { %v3135_v52 = vmul.f32 %v7306_v2, %v7306_v2 }
 0x8b4   : > { %3381 = vmatpush.msra.mxu2 %v3369_v1  ;;  %v3327_v1 = vld [vmem:[%s8464_s7 + $0xe0] sm:$0xff] }
 0x8b5   : > { %3161 = vmatmul.f32.gmra.mxu1 %v3135_v52  ;;  %v3346_v52 = vld [vmem:[%s8464_s7 + $0x178] sm:$0xff] }
 0x8b6   : > { %3382 = vmatpush.msra.mxu2 %v3364_v11  ;;  %v3322_v11 = vld [vmem:[%s8464_s7 + $0xb8] sm:$0xff] }
 0x8b8   : > { %v3108_v31 = vpop.f32.mrf.mxu0  ;;  %3383 = vmatpush.msra.mxu2 %v3359_v10  ;;  %v3317_v10 = vld [vmem:[%s8464_s7 + $0x90] sm:$0xff] }
 0x8b9   : > { %v7311_v47 = vsub.f32 %v7274_v53, %v3108_v31  ;;  %v3375_v53 = vld [vmem:[%s8464_s7 + $0x260] sm:$0xff] }
 0x8ba   : > { %3420 = vmatpush.msrb.mxu3 %v3375_v53  ;;  %3384 = vmatpush.msra.mxu2 %v3354_v26  ;;  %v3347_v31 = vld [vmem:[%s8464_s7 + $0x180] sm:$0xff]  ;;  %v3334_v53 = vld [vmem:[%s8464_s7 + $0x118] sm:$0xff]  ;;  %v3312_v26 = vld [vmem:[%s8464_s7 + $0x68] sm:$0xff] }
 0x8bb   : > { %v3136_v6 = vmul.f32 %v7311_v47, %v7311_v47 }
 0x8bc   : > { %3421 = vmatpush.msrb.mxu3 %v3370_v32  ;;  %3385 = vmatpush.msra.mxu2 %v3349_v39  ;;  %v3319_v32 = vld [vmem:[%s8464_s7 + $0xa0] sm:$0xff] }
 0x8bd   : > { %3164 = vmatmul.f32.gmra.mxu1 %v3136_v6  ;;  %v3339_v6 = vld [vmem:[%s8464_s7 + $0x140] sm:$0xff] }
 0x8be   : > { %3422 = vmatpush.msrb.mxu3 %v3365_v23  ;;  %3386 = vmatpush.msra.mxu2 %v3344_v22  ;;  %v3314_v23 = vld [vmem:[%s8464_s7 + $0x78] sm:$0xff]  ;;  %v3307_v39 = vld [vmem:[%s8464_s7 + $0x40] sm:$0xff] }
 0x8bf   : > { %v3302_v22 = vld [vmem:[%s8464_s7 + $0x18] sm:$0xff] }
 0x8c0   : > { %v3111_v8 = vpop.f32.mrf.mxu0  ;;  %3423 = vmatpush.msrb.mxu3 %v3360_v62  ;;  %3387 = vmatpush.msra.mxu2 %v3339_v6  ;;  %v3309_v62 = vld [vmem:[%s8464_s7 + $0x50] sm:$0xff] }
 0x8c1   : > { %v7315_v36 = vsub.f32 %v3080_v34, %v3111_v8  ;;  %v3377_v34 = vld [vmem:[%s8464_s7 + $0x270] sm:$0xff]  ;;  %v3340_v8 = vld [vmem:[%s8464_s7 + $0x148] sm:$0xff] }
 0x8c2   : > { %3502 = vmatpush.msrb.mxu1 %v3377_v34  ;;  %3424 = vmatpush.msrb.mxu3 %v3355_v42  ;;  %v3336_v34 = vld [vmem:[%s8464_s7 + $0x128] sm:$0xff] }
 0x8c3   : > { %v3137_v60 = vmul.f32 %v7315_v36, %v7315_v36  ;;  %3388 = vmatpush.msra.mxu2 %v3334_v53  ;;  %v3304_v42 = vld [vmem:[%s8464_s7 + $0x28] sm:$0xff] }
 0x8c4   : > { %3503 = vmatpush.msrb.mxu1 %v3372_v40  ;;  %3425 = vmatpush.msrb.mxu3 %v3350_v46  ;;  %v3321_v40 = vld [vmem:[%s8464_s7 + $0xb0] sm:$0xff]  ;;  %v3299_v46 = vld [vmem:[%s8464_s7] sm:$0xff] }
 0x8c5   : > { %3167 = vmatmul.f32.gmra.mxu1 %v3137_v60  ;;  %v3341_v60 = vld [vmem:[%s8464_s7 + $0x150] sm:$0xff] }
 0x8c6   : > { %3504 = vmatpush.msrb.mxu1 %v3367_v35  ;;  %3426 = vmatpush.msrb.mxu3 %v3345_v63  ;;  %v3316_v35 = vld [vmem:[%s8464_s7 + $0x88] sm:$0xff] }
 0x8c8   : > { %v3114_v44 = vpop.f32.mrf.mxu0  ;;  %3505 = vmatpush.msrb.mxu1 %v3362_v33  ;;  %3427 = vmatpush.msrb.mxu3 %v3340_v8  ;;  %v3311_v33 = vld [vmem:[%s8464_s7 + $0x60] sm:$0xff] }
 0x8c9   : > { %v7331_v16 = vsub.f32 %v3081_v15, %v3114_v44  ;;  %v3337_v44 = vld [vmem:[%s8464_s7 + $0x130] sm:$0xff] }
 0x8ca   : > { %3428 = vmatpush.msrb.mxu3 %v3335_v3 }
 0x8cb   : > { %v3138_v48 = vmul.f32 %v7331_v16, %v7331_v16 }
 0x8cd   : > { %3170 = vmatmul.f32.gmra.mxu1 %v3138_v48  ;;  %v3329_v48 = vld [vmem:[%s8464_s7 + $0xf0] sm:$0xff] }
 0x8ce   : > { %3389 = vmatpush.msra.mxu2 %v3329_v48 }
 0x8d0   : > { %v3117_v17 = vpop.f32.mrf.mxu0 }
 0x8d1   : > { %v7335_v37 = vsub.f32 %v3082_v14, %v3117_v17  ;;  %v3366_v14 = vld [vmem:[%s8464_s7 + $0x218] sm:$0xff] }
 0x8d2   : > { %3463 = vmatpush.msrb.mxu0 %v3366_v14  ;;  %v3330_v17 = vld [vmem:[%s8464_s7 + $0xf8] sm:$0xff]  ;;  %v3315_v14 = vld [vmem:[%s8464_s7 + $0x80] sm:$0xff] }
 0x8d3   : > { %v3139_v55 = vmul.f32 %v7335_v37, %v7335_v37  ;;  %3429 = vmatpush.msrb.mxu3 %v3330_v17 }
 0x8d4   : > { %3464 = vmatpush.msrb.mxu0 %v3361_v57  ;;  %v3310_v57 = vld [vmem:[%s8464_s7 + $0x58] sm:$0xff] }
 0x8d5   : > { %3173 = vmatmul.f32.gmra.mxu1 %v3139_v55  ;;  %v3331_v55 = vld [vmem:[%s8464_s7 + $0x100] sm:$0xff] }
 0x8d6   : > { %3465 = vmatpush.msrb.mxu0 %v3356_v58  ;;  %v3305_v58 = vld [vmem:[%s8464_s7 + $0x30] sm:$0xff] }
 0x8d8   : > { %v3120_v43 = vpop.f32.mrf.mxu0 }
 0x8d9   : > { %v7339_v49 = vsub.f32 %v3083_v51, %v3120_v43  ;;  %v3357_v51 = vld [vmem:[%s8464_s7 + $0x1d0] sm:$0xff]  ;;  %v3332_v43 = vld [vmem:[%s8464_s7 + $0x108] sm:$0xff] }
 0x8da   : > { %3506 = vmatpush.msrb.mxu1 %v3357_v51  ;;  %v3306_v51 = vld [vmem:[%s8464_s7 + $0x38] sm:$0xff] }
 0x8db   : > { %v3140_v19 = vmul.f32 %v7339_v49, %v7339_v49 }
 0x8dc   : > { %3507 = vmatpush.msrb.mxu1 %v3352_v24  ;;  %v3301_v24 = vld [vmem:[%s8464_s7 + $0x10] sm:$0xff] }
 0x8dd   : > { %3176 = vmatmul.f32.gmra.mxu1 %v3140_v19  ;;  %v3324_v19 = vld [vmem:[%s8464_s7 + $0xc8] sm:$0xff] }
 0x8de   : > { %3508 = vmatpush.msrb.mxu1 %v3347_v31  ;;  %3390 = vmatpush.msra.mxu2 %v3324_v19 }
 0x8e0   : > { %v3123_v15 = vpop.f32.mrf.mxu0  ;;  %3509 = vmatpush.msrb.mxu1 %v3342_v61  ;;  %3391 = vmatpush.msra.mxu2 %v3319_v32 }
 0x8e1   : > { %v7343_v41 = vsub.f32 %v3084_v38, %v3123_v15  ;;  %v3351_v38 = vld [vmem:[%s8464_s7 + $0x1a0] sm:$0xff]  ;;  %v3325_v15 = vld [vmem:[%s8464_s7 + $0xd0] sm:$0xff] }
 0x8e2   : > { %3466 = vmatpush.msrb.mxu0 %v3351_v38  ;;  %3510 = vmatpush.msrb.mxu1 %v3337_v44  ;;  %v3300_v38 = vld [vmem:[%s8464_s7 + $0x8] sm:$0xff] }
 0x8e3   : > { %v3141_v25 = vmul.f32 %v7343_v41, %v7343_v41  ;;  %3430 = vmatpush.msrb.mxu3 %v3325_v15  ;;  %3392 = vmatpush.msra.mxu2 %v3314_v23 }
 0x8e4   : > { %3467 = vmatpush.msrb.mxu0 %v3346_v52  ;;  %3511 = vmatpush.msrb.mxu1 %v3332_v43 }
 0x8e5   : > { %3179 = vmatmul.f32.gmra.mxu1 %v3141_v25  ;;  %v3326_v25 = vld [vmem:[%s8464_s7 + $0xd8] sm:$0xff]  ;;  %3431 = vmatpush.msrb.mxu3 %v3320_v0  ;;  %v3373_v0 = vld [vmem:[%s8464_s7 + $0x250] sm:$0xff] }
 0x8e6   : > { %3468 = vmatpush.msrb.mxu0 %v3341_v60  ;;  %3512 = vmatpush.msrb.mxu1 %v3327_v1  ;;  %v3378_v1 = vld [vmem:[%s8464_s7 + $0x278] sm:$0xff] }
 0x8e7   : > { %3432 = vmatpush.msrb.mxu3 %v3315_v14  ;;  %3393 = vmatpush.msra.mxu2 %v3309_v62 }
 0x8e8   : > { %3469 = vmatpush.msrb.mxu0 %v3336_v34  ;;  %3513 = vmatpush.msrb.mxu1 %v3322_v11 }
 0x8e9   : > { %3433 = vmatpush.msrb.mxu3 %v3310_v57  ;;  %3394 = vmatpush.msra.mxu2 %v3304_v42 }
 0x8ea   : > { %3470 = vmatpush.msrb.mxu0 %v3331_v55  ;;  %3514 = vmatpush.msrb.mxu1 %v3317_v10  ;;  %v3368_v10 = vld [vmem:[%s8464_s7 + $0x228] sm:$0xff] }
 0x8eb   : > { %3434 = vmatpush.msrb.mxu3 %v3305_v58  ;;  %3395 = vmatpush.msra.mxu2 %v3299_v46  ;;  %v3358_v58 = vld [vmem:[%s8464_s7 + $0x1d8] sm:$0xff] }
 0x8ec   : > { %3471 = vmatpush.msrb.mxu0 %v3326_v25  ;;  %3515 = vmatpush.msrb.mxu1 %v3312_v26 }
 0x8ed   : > { %3435 = vmatpush.msrb.mxu3 %v3300_v38  ;;  %3543 = vmatpush.msrb.mxu2 %v3378_v1 }
 0x8ee   : > { %3472 = vmatpush.msrb.mxu0 %v3321_v40  ;;  %3516 = vmatpush.msrb.mxu1 %v3307_v39 }
 0x8ef   : > { %3544 = vmatpush.msrb.mxu2 %v3373_v0 }
 0x8f0   : > { %3473 = vmatpush.msrb.mxu0 %v3316_v35  ;;  %3517 = vmatpush.msrb.mxu1 %v3302_v22 }
 0x8f1   : > { %3545 = vmatpush.msrb.mxu2 %v3368_v10 }
 0x8f2   : > { %3474 = vmatpush.msrb.mxu0 %v3311_v33  ;;  %3859 = vmatpush.msra.mxu1 %v7017_v59  ;;  %v3363_v33 = vld [vmem:[%s8464_s7 + $0x200] sm:$0xff] }
 0x8f3   : > { %3546 = vmatpush.msrb.mxu2 %v3363_v33 }
 0x8f4   : > { %3475 = vmatpush.msrb.mxu0 %v3306_v51  ;;  %3860 = vmatpush.msra.mxu1 %v7026_v5 }
 0x8f5   : > { %3547 = vmatpush.msrb.mxu2 %v3358_v58 }
 0x8f6   : > { %3476 = vmatpush.msrb.mxu0 %v3301_v24  ;;  %3861 = vmatpush.msra.mxu1 %v7034_v29 }
 0x8f8   : > { %3822 = vmatpush.msra.mxu0 %v7017_v59  ;;  %3862 = vmatpush.msra.mxu1 %v7045_v50 }
 0x8fa   : > { %3823 = vmatpush.msra.mxu0 %v7026_v5  ;;  %3863 = vmatpush.msra.mxu1 %v7057_v12 }
 0x8fc   : > { %3824 = vmatpush.msra.mxu0 %v7034_v29  ;;  %3864 = vmatpush.msra.mxu1 %v7065_v56 }
 0x8fe   : > { %3825 = vmatpush.msra.mxu0 %v7045_v50  ;;  %3865 = vmatpush.msra.mxu1 %v7073_v27 }
 0x900   : > { %3826 = vmatpush.msra.mxu0 %v7057_v12  ;;  %3866 = vmatpush.msra.mxu1 %v7084_v4 }
 0x902   : > { %3827 = vmatpush.msra.mxu0 %v7065_v56  ;;  %3867 = vmatpush.msra.mxu1 %v7096_v20 }
 0x904   : > { %3828 = vmatpush.msra.mxu0 %v7073_v27  ;;  %3868 = vmatpush.msra.mxu1 %v7104_v54 }
 0x906   : > { %3829 = vmatpush.msra.mxu0 %v7084_v4  ;;  %v7550_v4 = vld [vmem:[%s8462_s5] ss:$0 sm:$0xff]  ;;  %3869 = vmatpush.msra.mxu1 %v7112_v45 }
 0x908   : > { %3830 = vmatpush.msra.mxu0 %v7096_v20  ;;  %3870 = vmatpush.msra.mxu1 %v7122_v18 }
 0x90a   : > { %3831 = vmatpush.msra.mxu0 %v7104_v54  ;;  %v7558_v54 = vld [vmem:[%s8463_s6] ss:$0 sm:$0xff]  ;;  %3871 = vmatpush.msra.mxu1 %v7135_v28 }
 0x90c   : > { %3832 = vmatpush.msra.mxu0 %v7112_v45  ;;  %3872 = vmatpush.msra.mxu1 %v7142_v13 }
 0x90e   : > { %3833 = vmatpush.msra.mxu0 %v7122_v18  ;;  %3873 = vmatpush.msra.mxu1 %v7150_v21 }
 0x910   : > { %3834 = vmatpush.msra.mxu0 %v7135_v28  ;;  %3874 = vmatpush.msra.mxu1 %v7160_v7 }
 0x912   : > { %3835 = vmatpush.msra.mxu0 %v7142_v13 }
 0x914   : > { %3836 = vmatpush.msra.mxu0 %v7150_v21 }
 0x916   : > { %3837 = vmatpush.msra.mxu0 %v7160_v7 }
 0x92a   : > { %v3159_v63 = vpop.f32.mrf.mxu1 }
 0x92b   : > { %v3160_v52 = vadd.f32 1e-05, %v3159_v63 }
 0x92d   : > { %4988 = vrsqrt.f32 %v3160_v52  ;;  %vm3189_vm15 = vweird.f32 %v3160_v52 }
 0x932   : > { %v3162_v59 = vpop.f32.mrf.mxu1 }
 0x933   : > { %v4989_v31 = vpop.eup %4988  ;;  %v3163_v6 = vadd.f32 1e-05, %v3162_v59 }
 0x934   : > { %v3184_v5 = vmul.f32 %v4989_v31, %v3160_v52  ;;  %vm3190_vm13 = vweird.f32 %v4989_v31 }
 0x935   : > { %4990 = vrsqrt.f32 %v3163_v6  ;;  %vm3191_vm0 = vmor %vm3189_vm15, %vm3190_vm13  ;;  %vm3199_vm2 = vweird.f32 %v3163_v6 }
 0x936   : > { %v3185_v29 = vmul.f32 %v4989_v31, %v3184_v5  ;;  %v3348_v5 = vld [vmem:[%s8464_s7 + $0x188] sm:$0xff] }
 0x938   : > { %v3186_v50 = vmul.f32 0.5, %v3185_v29 }
 0x93a   : > { %v3187_v12 = vsub.f32 1.5, %v3186_v50  ;;  %v3165_v8 = vpop.f32.mrf.mxu1 }
 0x93b   : > { %v4991_v56 = vpop.eup %4990  ;;  %v3166_v60 = vadd.f32 1e-05, %v3165_v8 }
 0x93c   : > { %v3188_v27 = vmul.f32 %v4989_v31, %v3187_v12  ;;  %v3194_v61 = vmul.f32 %v4991_v56, %v3163_v6  ;;  %vm3200_vm1 = vweird.f32 %v4991_v56  ;;  %v3343_v12 = vld [vmem:[%s8464_s7 + $0x160] sm:$0xff] }
 0x93d   : > { %4992 = vrsqrt.f32 %v3166_v60  ;;  %vm3201_vm4 = vmor %vm3199_vm2, %vm3200_vm1  ;;  %vm3209_vm6 = vweird.f32 %v3166_v60 }
 0x93e   : > { %v3192_v20 = vsel %vm3191_vm0, %v4989_v31, %v3188_v27  ;;  %v3195_v53 = vmul.f32 %v4991_v56, %v3194_v61 }
 0x93f   : > { %v3263_v3 = vmul.f32 %v3192_v20, %v7301_v9 }
 0x940   : > { %v3196_v34 = vmul.f32 0.5, %v3195_v53 }
 0x941   : > { %v3273_v44 = vmul.f32 %v7550_v4, %v3263_v3 }
 0x942   : > { %v3197_v45 = vsub.f32 1.5, %v3196_v34  ;;  %v3168_v48 = vpop.f32.mrf.mxu1 }
 0x943   : > { %v4993_v9 = vpop.eup %4992  ;;  %v7565_v17 = vadd.f32 1e-05, %v3168_v48  ;;  %v3283_v55 = vadd.f32 %v7558_v54, %v3273_v44  ;;  %v3333_v48 = vld [vmem:[%s8464_s7 + $0x110] sm:$0xff] }
 0x944   : > { %v3198_v18 = vmul.f32 %v4991_v56, %v3197_v45  ;;  %v3204_v43 = vmul.f32 %v4993_v9, %v3166_v60  ;;  %vm3210_vm5 = vweird.f32 %v4993_v9 }
 0x945   : > { %4994 = vrsqrt.f32 %v7565_v17  ;;  %v7571_v19 = vmax.f32 %v3283_v55, 0.0  ;;  %vm3211_vm7 = vmor %vm3209_vm6, %vm3210_vm5  ;;  %vm3219_vm15 = vweird.f32 %v7565_v17  ;;  %v3328_v55 = vld [vmem:[%s8464_s7 + $0xe8] sm:$0xff] }
 0x946   : > { %v3202_v28 = vsel %vm3201_vm4, %v4991_v56, %v3198_v18  ;;  %v3205_v15 = vmul.f32 %v4993_v9, %v3204_v43 }
 0x947   : > { %v3264_v25 = vmul.f32 %v3202_v28, %v7306_v2  ;;  %3396 = vmatmul.f32.vlgmr.msra.gmra.mxu2 %v7571_v19  ;;  %3436 = vmatmul.f32.vlgmr.msrb.gmra.mxu3 %v7571_v19 }
 0x948   : > { %v3206_v13 = vmul.f32 0.5, %v3205_v15  ;;  %3477 = vmatmul.f32.vlgmr.msrb.gmra.mxu0 %v7571_v19  ;;  %3518 = vmatmul.f32.vlgmr.msrb.gmra.mxu1 %v7571_v19 }
 0x949   : > { %v3274_v32 = vmul.f32 %v7550_v4, %v3264_v25 }
 0x94a   : > { %v3207_v21 = vsub.f32 1.5, %v3206_v13  ;;  %v3171_v2 = vpop.f32.mrf.mxu1 }
 0x94b   : > { %v4995_v40 = vpop.eup %4994  ;;  %v3172_v11 = vadd.f32 1e-05, %v3171_v2  ;;  %v3284_v23 = vadd.f32 %v7558_v54, %v3274_v32 }
 0x94c   : > { %v3208_v14 = vmul.f32 %v4993_v9, %v3207_v21  ;;  %v3214_v35 = vmul.f32 %v4995_v40, %v7565_v17  ;;  %vm3220_vm13 = vweird.f32 %v4995_v40 }
 0x94d   : > { %4996 = vrsqrt.f32 %v3172_v11  ;;  %v7594_v62 = vmax.f32 %v3284_v23, 0.0  ;;  %vm3221_vm0 = vmor %vm3219_vm15, %vm3220_vm13  ;;  %vm3229_vm2 = vweird.f32 %v3172_v11 }
 0x94e   : > { %v3212_v57 = vsel %vm3211_vm7, %v4993_v9, %v3208_v14  ;;  %v3215_v7 = vmul.f32 %v4995_v40, %v3214_v35  ;;  %v3313_v14 = vld [vmem:[%s8464_s7 + $0x70] sm:$0xff] }
 0x94f   : > { %v3265_v26 = vmul.f32 %v3212_v57, %v7311_v47  ;;  %3399 = vmatmul.f32.gmra.mxu2 %v7594_v62  ;;  %3439 = vmatmul.f32.gmra.mxu3 %v7594_v62  ;;  %v3353_v47 = vld [vmem:[%s8464_s7 + $0x1b0] sm:$0xff]  ;;  %v3308_v57 = vld [vmem:[%s8464_s7 + $0x48] sm:$0xff] }
 0x950   : > { %v3216_v42 = vmul.f32 0.5, %v3215_v7  ;;  %3480 = vmatmul.f32.gmra.mxu0 %v7594_v62  ;;  %3521 = vmatmul.f32.gmra.mxu1 %v7594_v62 }
 0x951   : > { %v3275_v51 = vmul.f32 %v7550_v4, %v3265_v26  ;;  %3548 = vmatpush.msrb.mxu2 %v3353_v47 }
 0x952   : > { %v3217_v39 = vsub.f32 1.5, %v3216_v42  ;;  %v3174_v46 = vpop.f32.mrf.mxu1 }
 0x953   : > { %v4997_v38 = vpop.eup %4996  ;;  %v3175_v24 = vadd.f32 1e-05, %v3174_v46  ;;  %v3285_v22 = vadd.f32 %v7558_v54, %v3275_v51  ;;  %3549 = vmatpush.msrb.mxu2 %v3348_v5 }
 0x954   : > { %v3218_v63 = vmul.f32 %v4995_v40, %v3217_v39  ;;  %v3224_v52 = vmul.f32 %v4997_v38, %v3172_v11  ;;  %vm3230_vm1 = vweird.f32 %v4997_v38  ;;  %v3303_v39 = vld [vmem:[%s8464_s7 + $0x20] sm:$0xff] }
 0x955   : > { %4998 = vrsqrt.f32 %v3175_v24  ;;  %v7613_v59 = vmax.f32 %v3285_v22, 0.0  ;;  %3550 = vmatpush.msrb.mxu2 %v3343_v12  ;;  %vm3231_vm4 = vmor %vm3229_vm2, %vm3230_vm1  ;;  %vm3239_vm6 = vweird.f32 %v3175_v24 }
 0x956   : > { %v3222_v31 = vsel %vm3221_vm0, %v4995_v40, %v3218_v63  ;;  %v3225_v6 = vmul.f32 %v4997_v38, %v3224_v52  ;;  %v3318_v40 = vld [vmem:[%s8464_s7 + $0x98] sm:$0xff] }
 0x957   : > { %v3266_v29 = vmul.f32 %v3222_v31, %v7315_v36  ;;  %3402 = vmatmul.f32.gmra.mxu2 %v7613_v59  ;;  %3442 = vmatmul.f32.gmra.mxu3 %v7613_v59  ;;  %v3338_v36 = vld [vmem:[%s8464_s7 + $0x138] sm:$0xff] }
 0x958   : > { %v3226_v50 = vmul.f32 0.5, %v3225_v6  ;;  %3483 = vmatmul.f32.gmra.mxu0 %v7613_v59  ;;  %3524 = vmatmul.f32.gmra.mxu1 %v7613_v59 }
 0x959   : > { %v3276_v8 = vmul.f32 %v7550_v4, %v3266_v29  ;;  %3551 = vmatpush.msrb.mxu2 %v3338_v36 }
 0x95a   : > { %v3227_v56 = vsub.f32 1.5, %v3226_v50  ;;  %v3177_v60 = vpop.f32.mrf.mxu1 }
 0x95b   : > { %v4999_v27 = vpop.eup %4998  ;;  %v3178_v61 = vadd.f32 1e-05, %v3177_v60  ;;  %v3286_v20 = vadd.f32 %v7558_v54, %v3276_v8  ;;  %3552 = vmatpush.msrb.mxu2 %v3333_v48 }
 0x95c   : > { %v3228_v53 = vmul.f32 %v4997_v38, %v3227_v56  ;;  %v3234_v3 = vmul.f32 %v4999_v27, %v3175_v24  ;;  %vm3240_vm5 = vweird.f32 %v4999_v27 }
 0x95d   : > { %5000 = vrsqrt.f32 %v3178_v61  ;;  %v7631_v34 = vmax.f32 %v3286_v20, 0.0  ;;  %3553 = vmatpush.msrb.mxu2 %v3328_v55  ;;  %vm3241_vm7 = vmor %vm3239_vm6, %vm3240_vm5  ;;  %vm3249_vm15 = vweird.f32 %v3178_v61 }
 0x95e   : > { %v3232_v44 = vsel %vm3231_vm4, %v4997_v38, %v3228_v53  ;;  %v3235_v45 = vmul.f32 %v4999_v27, %v3234_v3 }
 0x95f   : > { %v3267_v9 = vmul.f32 %v3232_v44, %v7331_v16  ;;  %3405 = vmatmul.f32.gmra.mxu2 %v7631_v34  ;;  %3445 = vmatmul.f32.gmra.mxu3 %v7631_v34  ;;  %v3323_v16 = vld [vmem:[%s8464_s7 + $0xc0] sm:$0xff] }
 0x960   : > { %v3236_v17 = vmul.f32 0.5, %v3235_v45  ;;  %3486 = vmatmul.f32.gmra.mxu0 %v7631_v34  ;;  %3527 = vmatmul.f32.gmra.mxu1 %v7631_v34 }
 0x961   : > { %v3277_v18 = vmul.f32 %v7550_v4, %v3267_v9  ;;  %3554 = vmatpush.msrb.mxu2 %v3323_v16 }
 0x962   : > { %v3237_v43 = vsub.f32 1.5, %v3236_v17  ;;  %v3180_v28 = vpop.f32.mrf.mxu1 }
 0x963   : > { %v5001_v15 = vpop.eup %5000  ;;  %v3181_v25 = vadd.f32 1e-05, %v3180_v28  ;;  %v3287_v13 = vadd.f32 %v7558_v54, %v3277_v18  ;;  %3555 = vmatpush.msrb.mxu2 %v3318_v40 }
 0x964   : > { %v3238_v1 = vmul.f32 %v4999_v27, %v3237_v43  ;;  %v3244_v32 = vmul.f32 %v5001_v15, %v3178_v61  ;;  %vm3250_vm13 = vweird.f32 %v5001_v15 }
 0x965   : > { %5002 = vrsqrt.f32 %v3181_v25  ;;  %v3295_v21 = vmax.f32 %v3287_v13, 0.0  ;;  %3556 = vmatpush.msrb.mxu2 %v3313_v14  ;;  %vm3251_vm0 = vmor %vm3249_vm15, %vm3250_vm13  ;;  %vm3259_vm2 = vweird.f32 %v3181_v25 }
 0x966   : > { %v3242_v2 = vsel %vm3241_vm7, %v4999_v27, %v3238_v1  ;;  %v3245_v0 = vmul.f32 %v5001_v15, %v3244_v32 }
 0x967   : > { %v3268_v11 = vmul.f32 %v3242_v2, %v7335_v37  ;;  %3408 = vmatmul.f32.gmra.mxu2 %v3295_v21  ;;  %3448 = vmatmul.f32.gmra.mxu3 %v3295_v21 }
 0x968   : > { %v3246_v23 = vmul.f32 0.5, %v3245_v0  ;;  %3489 = vmatmul.f32.gmra.mxu0 %v3295_v21  ;;  %3530 = vmatmul.f32.gmra.mxu1 %v3295_v21 }
 0x969   : > { %v3278_v35 = vmul.f32 %v7550_v4, %v3268_v11  ;;  %3557 = vmatpush.msrb.mxu2 %v3308_v57 }
 0x96a   : > { %v3247_v10 = vsub.f32 1.5, %v3246_v23 }
 0x96b   : > { %v5003_v7 = vpop.eup %5002  ;;  %v3288_v37 = vadd.f32 %v7558_v54, %v3278_v35  ;;  %3558 = vmatpush.msrb.mxu2 %v3303_v39 }
 0x96c   : > { %v3248_v33 = vmul.f32 %v5001_v15, %v3247_v10  ;;  %v3254_v26 = vmul.f32 %v5003_v7, %v3181_v25  ;;  %vm3260_vm1 = vweird.f32 %v5003_v7 }
 0x96d   : > { %v3296_v42 = vmax.f32 %v3288_v37, 0.0  ;;  %vm3261_vm4 = vmor %vm3259_vm2, %vm3260_vm1 }
 0x96e   : > { %v3252_v58 = vsel %vm3251_vm0, %v5001_v15, %v3248_v33  ;;  %v3255_v51 = vmul.f32 %v5003_v7, %v3254_v26 }
 0x96f   : > { %v3269_v46 = vmul.f32 %v3252_v58, %v7339_v49  ;;  %3411 = vmatmul.f32.gmra.mxu2 %v3296_v42  ;;  %3451 = vmatmul.f32.gmra.mxu3 %v3296_v42 }
 0x970   : > { %v3256_v47 = vmul.f32 0.5, %v3255_v51  ;;  %3492 = vmatmul.f32.gmra.mxu0 %v3296_v42  ;;  %3533 = vmatmul.f32.gmra.mxu1 %v3296_v42 }
 0x971   : > { %v3279_v38 = vmul.f32 %v7550_v4, %v3269_v46 }
 0x972   : > { %v3257_v24 = vsub.f32 1.5, %v3256_v47 }
 0x973   : > { %v3289_v22 = vadd.f32 %v7558_v54, %v3279_v38 }
 0x974   : > { %v3258_v63 = vmul.f32 %v5003_v7, %v3257_v24 }
 0x975   : > { %v3297_v52 = vmax.f32 %v3289_v22, 0.0 }
 0x976   : > { %v3262_v31 = vsel %vm3261_vm4, %v5003_v7, %v3258_v63 }
 0x977   : > { %v3270_v6 = vmul.f32 %v3262_v31, %v7343_v41  ;;  %3414 = vmatmul.f32.gmra.mxu2 %v3297_v52  ;;  %3454 = vmatmul.f32.gmra.mxu3 %v3297_v52 }
 0x978   : > { %3495 = vmatmul.f32.gmra.mxu0 %v3297_v52  ;;  %3536 = vmatmul.f32.gmra.mxu1 %v3297_v52 }
 0x979   : > { %v3280_v49 = vmul.f32 %v7550_v4, %v3270_v6 }
 0x97b   : > { %v3290_v5 = vadd.f32 %v7558_v54, %v3280_v49 }
 0x97d   : > { %v3298_v29 = vmax.f32 %v3290_v5, 0.0 }
 0x97f   : > { %3417 = vmatmul.f32.gmra.mxu2 %v3298_v29  ;;  %3457 = vmatmul.f32.gmra.mxu3 %v3298_v29 }
 0x980   : > { %3498 = vmatmul.f32.gmra.mxu0 %v3298_v29  ;;  %3539 = vmatmul.f32.gmra.mxu1 %v3298_v29 }
 0x987   : > { %3559 = vmatmul.f32.vlgmr.msrb.gmra.mxu2 %v7571_v19 }
 0x98f   : > { %3562 = vmatmul.f32.gmra.mxu2 %v7594_v62 }
 0x997   : > { %3565 = vmatmul.f32.gmra.mxu2 %v7613_v59 }
 0x99f   : > { %3568 = vmatmul.f32.gmra.mxu2 %v7631_v34 }
 0x9a7   : > { %3571 = vmatmul.f32.gmra.mxu2 %v3295_v21 }
 0x9af   : > { %3574 = vmatmul.f32.gmra.mxu2 %v3296_v42 }
 0x9b7   : > { %3577 = vmatmul.f32.gmra.mxu2 %v3297_v52 }
 0x9bf   : > { %3580 = vmatmul.f32.gmra.mxu2 %v3298_v29 }
 0x9c5   : > { %v3478_v41 = vpop.f32.mrf.mxu0  ;;  %v3519_v4 = vpop.f32.mrf.mxu1 }
 0x9c6   : > { %v3629_v36 = vrot.slane %v3478_v41, 2  ;;  %v3666_v53 = vrot.slane %v3519_v4, 3 }
 0x9ca   : > { %v3397_v54 = vpop.f32.mrf.mxu2  ;;  %v3437_v50 = vpop.f32.mrf.mxu3 }
 0x9cb   : > { %v3592_v62 = vrot.slane %v3437_v50, 1 }
 0x9cd   : > { %v7674_v12 = vpop.f32.mrf.mxu0  ;;  %v7676_v8 = vpop.f32.mrf.mxu1 }
 0x9ce   : > { %v3630_v59 = vrot.slane %v7674_v12, 2  ;;  %v3667_v27 = vrot.slane %v7676_v8, 3 }
 0x9d0   : > { %v3631_v3 = vsel %vm893_vm9, %v3629_v36, %v3630_v59  ;;  %v3668_v44 = vsel %vm933_vm10, %v3666_v53, %v3667_v27 }
 0x9d2   : > { %v7678_v56 = vpop.f32.mrf.mxu2  ;;  %v7680_v19 = vpop.f32.mrf.mxu3 }
 0x9d3   : > { %v3593_v60 = vrot.slane %v7680_v19, 1 }
 0x9d5   : > { %v3594_v61 = vsel %vm853_vm8, %v3592_v62, %v3593_v60  ;;  %v7700_v16 = vpop.f32.mrf.mxu0  ;;  %v7702_v15 = vpop.f32.mrf.mxu1 }
 0x9d6   : > { %v3614_v20 = vadd.f32 %v3594_v61, %v3397_v54 }
 0x9d8   : > { %v3651_v34 = vadd.f32 %v3631_v3, %v3614_v20 }
 0x9da   : > { %v7694_v45 = vpop.f32.mrf.mxu2  ;;  %v3688_v48 = vadd.f32 %v3668_v44, %v3651_v34  ;;  %v7698_v43 = vpop.f32.mrf.mxu3 }
 0x9dd   : > { %v7706_v1 = vpop.f32.mrf.mxu0  ;;  %v7710_v21 = vpop.f32.mrf.mxu1 }
 0x9de   : > { %v3634_v38 = vrot.slane %v7706_v1, 2  ;;  %v3671_v29 = vrot.slane %v7710_v21, 3 }
 0x9e2   : > { %v3406_v9 = vpop.f32.mrf.mxu2  ;;  %v7704_v25 = vpop.f32.mrf.mxu3 }
 0x9e3   : > { %v3597_v33 = vrot.slane %v7704_v25, 1 }
 0x9e5   : > { %v3490_v14 = vpop.f32.mrf.mxu0  ;;  %v3531_v10 = vpop.f32.mrf.mxu1 }
 0x9e6   : > { %v3636_v51 = vrot.slane %v3490_v14, 2  ;;  %v3673_v52 = vrot.slane %v3531_v10, 3 }
 0x9e8   : > { %v3637_v63 = vsel %vm893_vm9, %v3634_v38, %v3636_v51  ;;  %v3674_v50 = vsel %vm933_vm10, %v3671_v29, %v3673_v52 }
 0x9ea   : > { %v3409_v17 = vpop.f32.mrf.mxu2  ;;  %v3449_v40 = vpop.f32.mrf.mxu3 }
 0x9eb   : > { %v3599_v7 = vrot.slane %v3449_v40, 1 }
 0x9ed   : > { %v3493_v26 = vpop.f32.mrf.mxu0  ;;  %v3600_v42 = vsel %vm853_vm8, %v3597_v33, %v3599_v7  ;;  %v3534_v39 = vpop.f32.mrf.mxu1 }
 0x9ee   : > { %v3617_v46 = vadd.f32 %v3600_v42, %v3406_v9  ;;  %v3638_v31 = vrot.slane %v3493_v26, 2  ;;  %v3675_v36 = vrot.slane %v3534_v39, 3  ;;  %v3595_v26 = vrot.slane %v7698_v43, 1 }
 0x9f0   : > { %v3654_v49 = vadd.f32 %v3637_v63, %v3617_v46  ;;  %v3639_v62 = vsel %vm893_vm9, %v3636_v51, %v3638_v31  ;;  %v3598_v39 = vsel %vm853_vm8, %v3595_v26, %v3597_v33  ;;  %v3596_v43 = vsel %vm853_vm8, %v3593_v60, %v3595_v26 }
 0x9f1   : > { %v3616_v33 = vadd.f32 %v3598_v39, %v7694_v45 }
 0x9f2   : > { %v3412_v55 = vpop.f32.mrf.mxu2  ;;  %v3452_v57 = vpop.f32.mrf.mxu3  ;;  %v3691_v53 = vadd.f32 %v3674_v50, %v3654_v49  ;;  %v3632_v50 = vrot.slane %v7700_v16, 2 }
 0x9f3   : > { %v3601_v58 = vrot.slane %v3452_v57, 1 }
 0x9f4   : > { %v3633_v45 = vsel %vm893_vm9, %v3630_v59, %v3632_v50 }
 0x9f5   : > { %v3602_v24 = vsel %vm853_vm8, %v3599_v7, %v3601_v58  ;;  %v3496_v54 = vpop.f32.mrf.mxu0  ;;  %v3537_v3 = vpop.f32.mrf.mxu1 }
 0x9f6   : > { %v3618_v5 = vadd.f32 %v3602_v24, %v3409_v17  ;;  %v3676_v17 = vsel %vm933_vm10, %v3673_v52, %v3675_v36  ;;  %v3677_v7 = vrot.slane %v3537_v3, 3  ;;  %v3669_v3 = vrot.slane %v7702_v15, 3 }
 0x9f8   : > { %v3655_v20 = vadd.f32 %v3639_v62, %v3618_v5 }
 0x9fa   : > { %v7696_v18 = vpop.f32.mrf.mxu2  ;;  %v3455_v47 = vpop.f32.mrf.mxu3  ;;  %v3692_v1 = vadd.f32 %v3676_v17, %v3655_v20 }
 0x9fb   : > { %v3603_v41 = vrot.slane %v3455_v47, 1 }
 0x9fd   : > { %v3604_v34 = vsel %vm853_vm8, %v3601_v58, %v3603_v41 }
 0xa02   : > { %v3418_v28 = vpop.f32.mrf.mxu2  ;;  %v3458_v44 = vpop.f32.mrf.mxu3 }
 0xa03   : > { %v3640_v28 = vrot.slane %v3496_v54, 2  ;;  %v3605_v40 = vrot.slane %v3458_v44, 1 }
 0xa05   : > { %v3641_v57 = vsel %vm893_vm9, %v3638_v31, %v3640_v28  ;;  %v3606_v51 = vsel %vm853_vm8, %v3603_v41, %v3605_v40  ;;  %v3540_v31 = vpop.f32.mrf.mxu1 }
 0xa06   : > { %v3679_v60 = vrot.slane %v3540_v31, 3  ;;  %v4921_v31 = vld [vmem:[%s8464_s7 + $0x4e0] sm:$0xff] }
 0xa0a   : > { %v3560_v13 = vpop.f32.mrf.mxu2 }
 0xa0b   : > { %v3703_v2 = vrot.slane %v3560_v13, 4  ;;  %v3619_v13 = vadd.f32 %v3604_v34, %v3412_v55  ;;  %v3499_v55 = vpop.f32.mrf.mxu0 }
 0xa0c   : > { %v3642_v63 = vrot.slane %v3499_v55, 2 }
 0xa0d   : > { %v3656_v42 = vadd.f32 %v3641_v57, %v3619_v13 }
 0xa0e   : > { %v3643_v19 = vsel %vm893_vm9, %v3640_v28, %v3642_v63 }
 0xa12   : > { %v7708_v32 = vpop.f32.mrf.mxu2 }
 0xa13   : > { %v3704_v0 = vrot.slane %v7708_v32, 4 }
 0xa15   : > { %v3705_v11 = vsel %vm973_vm11, %v3703_v2, %v3704_v0  ;;  %v7741_v2 = vld [vmem:[%s8465_s8] ss:$0 sm:$0xff] }
 0xa16   : > { %v7716_v23 = vadd.f32 %v3705_v11, %v3688_v48 }
 0xa18   : > { %v3733_v32 = vadd.f32 %v7741_v2, %v7716_v23  ;;  %v3774_v23 = vld [vmem:[%s8466_s9] sm:$0xff] }
 0xa1a   : > { %v7718_v35 = vpop.f32.mrf.mxu2 }
 0xa1b   : > { %v3706_v16 = vrot.slane %v7718_v35, 4 }
 0xa1d   : > { %v3707_v21 = vsel %vm973_vm11, %v3704_v0, %v3706_v16 }
 0xa22   : > { %v7720_v37 = vpop.f32.mrf.mxu2 }
 0xa23   : > { %v3708_v4 = vrot.slane %v7720_v37, 4 }
 0xa25   : > { %v3709_v12 = vsel %vm973_vm11, %v3706_v16, %v3708_v4  ;;  %v4918_v16 = vld [vmem:[%s8464_s7 + $0x4c8] sm:$0xff] }
 0xa2a   : > { %v3572_v22 = vpop.f32.mrf.mxu2 }
 0xa2b   : > { %v3710_v6 = vrot.slane %v3572_v22, 4  ;;  %v3678_v22 = vsel %vm933_vm10, %v3675_v36, %v3677_v7  ;;  %v3615_v36 = vadd.f32 %v3596_v43, %v7678_v56  ;;  %v4920_v43 = vld [vmem:[%s8464_s7 + $0x4d8] sm:$0xff] }
 0xa2c   : > { %v3693_v49 = vadd.f32 %v3678_v22, %v3656_v42  ;;  %v3747_v42 = vrot.slane %v3733_v32, 1  ;;  %4029 = vmatpush.msra.mxu2 %v4920_v43  ;;  %v4863_v43 = vld [vmem:[%s8464_s7 + $0x310] sm:$0xff] }
 0xa2d   : > { %v3711_v61 = vsel %vm973_vm11, %v3708_v4, %v3710_v6  ;;  %v3652_v56 = vadd.f32 %v3633_v45, %v3615_v36  ;;  %v4916_v45 = vld [vmem:[%s8464_s7 + $0x4b8] sm:$0xff] }
 0xa2e   : > { %v3728_v48 = vadd.f32 %v3711_v61, %v3691_v53  ;;  %v3635_v61 = vsel %vm893_vm9, %v3632_v50, %v3634_v38  ;;  %v3672_v38 = vsel %vm933_vm10, %v3669_v3, %v3671_v29 }
 0xa2f   : > { %v3653_v53 = vadd.f32 %v3635_v61, %v3616_v33 }
 0xa30   : > { %v7745_v10 = vadd.f32 %v7741_v2, %v3728_v48  ;;  %v3680_v48 = vsel %vm933_vm10, %v3677_v7, %v3679_v60 }
 0xa31   : > { %v3690_v15 = vadd.f32 %v3672_v38, %v3653_v53  ;;  %v4915_v53 = vld [vmem:[%s8464_s7 + $0x4b0] sm:$0xff]  ;;  %v4906_v38 = vld [vmem:[%s8464_s7 + $0x468] sm:$0xff] }
 0xa32   : > { %v3575_v9 = vpop.f32.mrf.mxu2  ;;  %v3752_v24 = vrot.slane %v7745_v10, 1  ;;  %4030 = vmatpush.msra.mxu2 %v4915_v53  ;;  %v4848_v53 = vld [vmem:[%s8464_s7 + $0x298] sm:$0xff] }
 0xa33   : > { %v3712_v25 = vrot.slane %v3575_v9, 4  ;;  %v3727_v37 = vadd.f32 %v3709_v12, %v3690_v15  ;;  %v4907_v12 = vld [vmem:[%s8464_s7 + $0x470] sm:$0xff]  ;;  %v4901_v15 = vld [vmem:[%s8464_s7 + $0x440] sm:$0xff] }
 0xa35   : > { %v3713_v11 = vsel %vm973_vm11, %v3710_v6, %v3712_v25  ;;  %v3620_v6 = vadd.f32 %v3606_v51, %v7696_v18 }
 0xa36   : > { %v3729_v14 = vadd.f32 %v3713_v11, %v3692_v1  ;;  %v3735_v11 = vadd.f32 %v7741_v2, %v3727_v37  ;;  %v4890_v37 = vld [vmem:[%s8464_s7 + $0x3e8] sm:$0xff] }
 0xa37   : > { %v3657_v18 = vadd.f32 %v3643_v19, %v3620_v6  ;;  %v4922_v6 = vld [vmem:[%s8464_s7 + $0x4e8] sm:$0xff] }
 0xa38   : > { %v3737_v58 = vadd.f32 %v7741_v2, %v3729_v14  ;;  %4086 = vmatpush.msrb.mxu0 %v4922_v6  ;;  %v4856_v6 = vld [vmem:[%s8464_s7 + $0x2d8] sm:$0xff] }
 0xa39   : > { %v3694_v17 = vadd.f32 %v3680_v48, %v3657_v18  ;;  %v4913_v48 = vld [vmem:[%s8464_s7 + $0x4a0] sm:$0xff] }
 0xa3a   : > { %v3578_v46 = vpop.f32.mrf.mxu2  ;;  %v3754_v47 = vrot.slane %v3737_v58, 1 }
 0xa3b   : > { %v3714_v52 = vrot.slane %v3578_v46, 4  ;;  %v3776_v46 = vld [vmem:[%s8466_s9 + $0x10] sm:$0xff] }
 0xa3c   : > { %v3755_v5 = vsel %vm853_vm8, %v3752_v24, %v3754_v47 }
 0xa3d   : > { %v3715_v41 = vsel %vm973_vm11, %v3712_v25, %v3714_v52  ;;  %v3770_v54 = vmax.f32 %v7745_v10, %v3755_v5  ;;  %v3670_v25 = vsel %vm933_vm10, %v3667_v27, %v3669_v3  ;;  %v3750_v27 = vrot.slane %v3735_v11, 1  ;;  %v4917_v3 = vld [vmem:[%s8464_s7 + $0x4c0] sm:$0xff] }
 0xa3e   : > { %v3730_v62 = vadd.f32 %v3715_v41, %v3693_v49  ;;  %v3689_v13 = vadd.f32 %v3670_v25, %v3652_v56  ;;  %v4923_v49 = vld [vmem:[%s8464_s7 + $0x4f0] sm:$0xff]  ;;  %4087 = vmatpush.msrb.mxu0 %v4917_v3  ;;  %v4912_v56 = vld [vmem:[%s8464_s7 + $0x498] sm:$0xff] }
 0xa3f   : > { %v3753_v0 = vsel %vm853_vm8, %v3750_v27, %v3752_v24  ;;  %4115 = vmatpush.msrb.mxu1 %v4923_v49  ;;  %v4895_v25 = vld [vmem:[%s8464_s7 + $0x410] sm:$0xff]  ;;  %v4857_v49 = vld [vmem:[%s8464_s7 + $0x2e0] sm:$0xff] }
 0xa40   : > { %v3738_v20 = vadd.f32 %v7741_v2, %v3730_v62  ;;  %v3726_v1 = vadd.f32 %v3707_v21, %v3689_v13  ;;  %v3769_v55 = vmax.f32 %v3735_v11, %v3753_v0  ;;  %4088 = vmatpush.msrb.mxu0 %v4912_v56  ;;  %v4896_v21 = vld [vmem:[%s8464_s7 + $0x418] sm:$0xff]  ;;  %v4898_v13 = vld [vmem:[%s8464_s7 + $0x428] sm:$0xff]  ;;  %v4885_v11 = vld [vmem:[%s8464_s7 + $0x3c0] sm:$0xff] }
 0xa41   : > { %4116 = vmatpush.msrb.mxu1 %v4918_v16  ;;  %v4883_v0 = vld [vmem:[%s8464_s7 + $0x3b0] sm:$0xff]  ;;  %v4909_v56 = vld [vmem:[%s8464_s7 + $0x480] sm:$0xff] }
 0xa42   : > { %v3581_v34 = vpop.f32.mrf.mxu2  ;;  %v3756_v44 = vrot.slane %v3738_v20, 1  ;;  %v3734_v8 = vadd.f32 %v7741_v2, %v3726_v1  ;;  %4089 = vmatpush.msrb.mxu0 %v4907_v12  ;;  %v4892_v1 = vld [vmem:[%s8464_s7 + $0x3f8] sm:$0xff]  ;;  %v4919_v16 = vld [vmem:[%s8464_s7 + $0x4d0] sm:$0xff] }
 0xa43   : > { %v3716_v9 = vrot.slane %v3581_v34, 4  ;;  %v4910_v34 = vld [vmem:[%s8464_s7 + $0x488] sm:$0xff]  ;;  %4117 = vmatpush.msrb.mxu1 %v4913_v48  ;;  %v4904_v48 = vld [vmem:[%s8464_s7 + $0x458] sm:$0xff] }
 0xa44   : > { %v3757_v59 = vsel %vm853_vm8, %v3754_v47, %v3756_v44  ;;  %v3748_v7 = vrot.slane %v3734_v8, 1  ;;  %v3777_v47 = vld [vmem:[%s8466_s9 + $0x18] sm:$0xf]  ;;  %4031 = vmatpush.msra.mxu2 %v4910_v34 }
 0xa45   : > { %v3717_v35 = vsel %vm973_vm11, %v3714_v52, %v3716_v9  ;;  %v3771_v28 = vmax.f32 %v3737_v58, %v3757_v59  ;;  %v4905_v9 = vld [vmem:[%s8464_s7 + $0x460] sm:$0xff]  ;;  %v4900_v59 = vld [vmem:[%s8464_s7 + $0x438] sm:$0xff] }
 0xa46   : > { %v3731_v29 = vadd.f32 %v3717_v35, %v3694_v17  ;;  %v3751_v26 = vsel %vm853_vm8, %v3748_v7, %v3750_v27  ;;  %v3749_v58 = vsel %vm853_vm8, %v3747_v42, %v3748_v7  ;;  %4032 = vmatpush.msra.mxu2 %v4905_v9  ;;  %v4908_v17 = vld [vmem:[%s8464_s7 + $0x478] sm:$0xff]  ;;  %v4902_v35 = vld [vmem:[%s8464_s7 + $0x448] sm:$0xff]  ;;  %v4881_v27 = vld [vmem:[%s8464_s7 + $0x3a0] sm:$0xff] }
 0xa47   : > { %v3768_v51 = vmax.f32 %v3734_v8, %v3751_v26  ;;  %v3767_v39 = vmax.f32 %v3733_v32, %v3749_v58  ;;  %4118 = vmatpush.msrb.mxu1 %v4908_v17  ;;  %4090 = vmatpush.msrb.mxu0 %v4902_v35  ;;  %v4880_v8 = vld [vmem:[%s8464_s7 + $0x398] sm:$0xff]  ;;  %v4882_v32 = vld [vmem:[%s8464_s7 + $0x3a8] sm:$0xff]  ;;  %v4875_v7 = vld [vmem:[%s8464_s7 + $0x370] sm:$0xff] }
 0xa48   : > { %v3739_v4 = vadd.f32 %v7741_v2, %v3731_v29  ;;  %v3775_v2 = vld [vmem:[%s8466_s9 + $0x8] sm:$0xff]  ;;  %4033 = vmatpush.msra.mxu2 %v4900_v59  ;;  %v4897_v29 = vld [vmem:[%s8464_s7 + $0x420] sm:$0xff]  ;;  %v4876_v26 = vld [vmem:[%s8464_s7 + $0x378] sm:$0xff] }
 0xa49   : > { %4091 = vmatpush.msrb.mxu0 %v4897_v29  ;;  %v4877_v42 = vld [vmem:[%s8464_s7 + $0x380] sm:$0xff]  ;;  %v4870_v58 = vld [vmem:[%s8464_s7 + $0x348] sm:$0xff]  ;;  %v4879_v29 = vld [vmem:[%s8464_s7 + $0x390] sm:$0xff] }
 0xa4a   : > { %v3758_v40 = vrot.slane %v3739_v4, 1  ;;  %4034 = vmatpush.msra.mxu2 %v4895_v25 }
 0xa4b   : > { %4092 = vmatpush.msrb.mxu0 %v4892_v1 }
 0xa4c   : > { %v3773_v14 = vmax.f32 %v3739_v4, %v3758_v40  ;;  %v3759_v10 = vsel %vm853_vm8, %v3756_v44, %v3758_v40  ;;  %v4911_v44 = vld [vmem:[%s8464_s7 + $0x490] sm:$0xff]  ;;  %4035 = vmatpush.msra.mxu2 %v4890_v37  ;;  %v4893_v40 = vld [vmem:[%s8464_s7 + $0x400] sm:$0xff] }
 0xa4d   : > { %v3772_v57 = vmax.f32 %v3738_v20, %v3759_v10  ;;  %v4891_v4 = vld [vmem:[%s8464_s7 + $0x3f0] sm:$0xff] }
 0xa4e   : > { %4840 = vmatpush.msk.msra.mxu3 %vm853_vm8, %v3773_v14  ;;  %v4886_v14 = vld [vmem:[%s8464_s7 + $0x3c8] sm:$0xff]  ;;  %v4887_v10 = vld [vmem:[%s8464_s7 + $0x3d0] sm:$0xff]  ;;  %4036 = vmatpush.msra.mxu2 %v4885_v11 }
 0xa4f   : > { %4093 = vmatpush.msrb.mxu0 %v4887_v10  ;;  %v4869_v10 = vld [vmem:[%s8464_s7 + $0x340] sm:$0xff] }
 0xa50   : > { %3803 = vmatpush.msra.mxu3 %v3772_v57  ;;  %v4888_v57 = vld [vmem:[%s8464_s7 + $0x3d8] sm:$0xff]  ;;  %4037 = vmatpush.msra.mxu2 %v4880_v8 }
 0xa51   : > { %4094 = vmatpush.msrb.mxu0 %v4882_v32 }
 0xa52   : > { %3804 = vmatpush.msra.mxu3 %v3771_v28  ;;  %v4903_v28 = vld [vmem:[%s8464_s7 + $0x450] sm:$0xff]  ;;  %4038 = vmatpush.msra.mxu2 %v4875_v7 }
 0xa53   : > { %4119 = vmatpush.msrb.mxu1 %v4903_v28  ;;  %4095 = vmatpush.msrb.mxu0 %v4877_v42  ;;  %v4889_v28 = vld [vmem:[%s8464_s7 + $0x3e0] sm:$0xff]  ;;  %v4859_v42 = vld [vmem:[%s8464_s7 + $0x2f0] sm:$0xff] }
 0xa54   : > { %3805 = vmatpush.msra.mxu3 %v3770_v54  ;;  %4039 = vmatpush.msra.mxu2 %v4870_v58 }
 0xa55   : > { %4120 = vmatpush.msrb.mxu1 %v4898_v13 }
 0xa56   : > { %3806 = vmatpush.msra.mxu3 %v3769_v55  ;;  %v4878_v55 = vld [vmem:[%s8464_s7 + $0x388] sm:$0xff] }
 0xa57   : > { %4121 = vmatpush.msrb.mxu1 %v4893_v40 }
 0xa58   : > { %3807 = vmatpush.msra.mxu3 %v3768_v51  ;;  %v4871_v51 = vld [vmem:[%s8464_s7 + $0x350] sm:$0xff] }
 0xa59   : > { %4122 = vmatpush.msrb.mxu1 %v4888_v57  ;;  %v8060_v57 = vld [vmem:[%s8462_s5 + $0x1] ss:$0 sm:$0xff] }
 0xa5a   : > { %3808 = vmatpush.msra.mxu3 %v3767_v39  ;;  %v4872_v39 = vld [vmem:[%s8464_s7 + $0x358] sm:$0xff] }
 0xa5b   : > { %4841 = vmatmul.msk.f32.vlgmr.msra.gmra.mxu3 %vm1709_vm12, %v3774_v23  ;;  %4123 = vmatpush.msrb.mxu1 %v4883_v0  ;;  %v4873_v23 = vld [vmem:[%s8464_s7 + $0x360] sm:$0xff] }
 0xa5c   : > { %4057 = vmatpush.msrb.mxu3 %v4921_v31  ;;  %4096 = vmatpush.msrb.mxu0 %v4872_v39  ;;  %v4855_v31 = vld [vmem:[%s8464_s7 + $0x2d0] sm:$0xff]  ;;  %v8066_v0 = vld [vmem:[%s8463_s6 + $0x1] ss:$0 sm:$0xff] }
 0xa5d   : > { %4124 = vmatpush.msrb.mxu1 %v4878_v55 }
 0xa5e   : > { %4058 = vmatpush.msrb.mxu3 %v4916_v45  ;;  %v4924_v45 = vld [vmem:[%s8464_s7 + $0x4f8] sm:$0xff] }
 0xa5f   : > { %4125 = vmatpush.msrb.mxu1 %v4873_v23 }
 0xa60   : > { %4059 = vmatpush.msrb.mxu3 %v4911_v44  ;;  %v4914_v44 = vld [vmem:[%s8464_s7 + $0x4a8] sm:$0xff] }
 0xa62   : > { %4060 = vmatpush.msrb.mxu3 %v4906_v38  ;;  %v4899_v38 = vld [vmem:[%s8464_s7 + $0x430] sm:$0xff] }
 0xa63   : > { %4842 = vmatmul.msk.f32.gmra.mxu3 %vm1709_vm12, %v3775_v2  ;;  %v4865_v2 = vld [vmem:[%s8464_s7 + $0x320] sm:$0xff] }
 0xa64   : > { %4061 = vmatpush.msrb.mxu3 %v4901_v15  ;;  %4040 = vmatpush.msra.mxu2 %v4865_v2  ;;  %v4894_v15 = vld [vmem:[%s8464_s7 + $0x408] sm:$0xff] }
 0xa66   : > { %4062 = vmatpush.msrb.mxu3 %v4896_v21  ;;  %v4884_v21 = vld [vmem:[%s8464_s7 + $0x3b8] sm:$0xff] }
 0xa68   : > { %4063 = vmatpush.msrb.mxu3 %v4891_v4  ;;  %v4874_v4 = vld [vmem:[%s8464_s7 + $0x368] sm:$0xff] }
 0xa6a   : > { %4064 = vmatpush.msrb.mxu3 %v4886_v14 }
 0xa6b   : > { %4843 = vmatmul.msk.f32.gmra.mxu3 %vm1709_vm12, %v3776_v46  ;;  %v4866_v46 = vld [vmem:[%s8464_s7 + $0x328] sm:$0xff] }
 0xa6c   : > { %4065 = vmatpush.msrb.mxu3 %v4881_v27 }
 0xa6e   : > { %4066 = vmatpush.msrb.mxu3 %v4876_v26  ;;  %v4864_v26 = vld [vmem:[%s8464_s7 + $0x318] sm:$0xff] }
 0xa70   : > { %4067 = vmatpush.msrb.mxu3 %v4871_v51  ;;  %v4854_v51 = vld [vmem:[%s8464_s7 + $0x2c8] sm:$0xff] }
 0xa72   : > { %4068 = vmatpush.msrb.mxu3 %v4866_v46 }
 0xa73   : > { %4844 = vmatmul.msk.f32.gmra.mxu3 %vm1709_vm12, %v3777_v47  ;;  %v4867_v47 = vld [vmem:[%s8464_s7 + $0x330] sm:$0xff] }
 0xa74   : > { %4097 = vmatpush.msrb.mxu0 %v4867_v47 }
 0xade   : > { %v3810_v24 = vpop.f32.mrf.mxu3 }
 0xadf   : > { %3838 = vmatmul.f32.vlgmr.msra.gmra.mxu0 %v3810_v24 }
 0xae6   : > { %v3813_v22 = vpop.f32.mrf.mxu3 }
 0xae7   : > { %3841 = vmatmul.f32.gmra.mxu0 %v3813_v22 }
 0xaee   : > { %v3816_v63 = vpop.f32.mrf.mxu3 }
 0xaef   : > { %3844 = vmatmul.f32.gmra.mxu0 %v3816_v63 }
 0xaf6   : > { %v3819_v52 = vpop.f32.mrf.mxu3 }
 0xaf7   : > { %3847 = vmatmul.f32.gmra.mxu0 %v3819_v52 }
 0xb5c   : > { %v3839_v5 = vpop.f32.mrf.mxu0 }
 0xb5d   : > { %v7825_v33 = vsub.f32 %v3810_v24, %v3839_v5  ;;  %v4868_v24 = vld [vmem:[%s8464_s7 + $0x338] sm:$0xff]  ;;  %v4858_v5 = vld [vmem:[%s8464_s7 + $0x2e8] sm:$0xff] }
 0xb5e   : > { %4126 = vmatpush.msrb.mxu1 %v4868_v24 }
 0xb5f   : > { %v3855_v41 = vmul.f32 %v7825_v33, %v7825_v33 }
 0xb60   : > { %4127 = vmatpush.msrb.mxu1 %v4863_v43 }
 0xb61   : > { %3875 = vmatmul.f32.vlgmr.msra.gmra.mxu1 %v3855_v41  ;;  %v4850_v41 = vld [vmem:[%s8464_s7 + $0x2a8] sm:$0xff] }
 0xb62   : > { %4128 = vmatpush.msrb.mxu1 %v4858_v5 }
 0xb64   : > { %v3842_v54 = vpop.f32.mrf.mxu0 }
 0xb65   : > { %v7829_v50 = vsub.f32 %v3813_v22, %v3842_v54  ;;  %v4860_v22 = vld [vmem:[%s8464_s7 + $0x2f8] sm:$0xff]  ;;  %v4851_v54 = vld [vmem:[%s8464_s7 + $0x2b0] sm:$0xff] }
 0xb66   : > { %4041 = vmatpush.msra.mxu2 %v4860_v22 }
 0xb67   : > { %v3856_v62 = vmul.f32 %v7829_v50, %v7829_v50 }
 0xb68   : > { %4042 = vmatpush.msra.mxu2 %v4855_v31 }
 0xb69   : > { %3878 = vmatmul.f32.gmra.mxu1 %v3856_v62  ;;  %v4852_v62 = vld [vmem:[%s8464_s7 + $0x2b8] sm:$0xff] }
 0xb6a   : > { %4043 = vmatpush.msra.mxu2 %v4850_v41 }
 0xb6c   : > { %v3845_v36 = vpop.f32.mrf.mxu0 }
 0xb6d   : > { %v7833_v19 = vsub.f32 %v3816_v63, %v3845_v36  ;;  %v4861_v63 = vld [vmem:[%s8464_s7 + $0x300] sm:$0xff] }
 0xb6e   : > { %4069 = vmatpush.msrb.mxu3 %v4861_v63  ;;  %v4853_v36 = vld [vmem:[%s8464_s7 + $0x2c0] sm:$0xff] }
 0xb6f   : > { %v3857_v60 = vmul.f32 %v7833_v19, %v7833_v19  ;;  %4129 = vmatpush.msrb.mxu1 %v4853_v36 }
 0xb70   : > { %4070 = vmatpush.msrb.mxu3 %v4856_v6 }
 0xb71   : > { %3881 = vmatmul.f32.gmra.mxu1 %v3857_v60  ;;  %v4845_v60 = vld [vmem:[%s8464_s7 + $0x280] sm:$0xff] }
 0xb72   : > { %4071 = vmatpush.msrb.mxu3 %v4851_v54  ;;  %4044 = vmatpush.msra.mxu2 %v4845_v60 }
 0xb73   : > { %4130 = vmatpush.msrb.mxu1 %v4848_v53 }
 0xb74   : > { %v3848_v61 = vpop.f32.mrf.mxu0  ;;  %4144 = vmatpush.msrb.mxu2 %v4924_v45 }
 0xb75   : > { %v7837_v18 = vsub.f32 %v3819_v52, %v3848_v61  ;;  %v4862_v52 = vld [vmem:[%s8464_s7 + $0x308] sm:$0xff] }
 0xb76   : > { %4098 = vmatpush.msrb.mxu0 %v4862_v52  ;;  %v4846_v61 = vld [vmem:[%s8464_s7 + $0x288] sm:$0xff]  ;;  %4145 = vmatpush.msrb.mxu2 %v4919_v16  ;;  %v4849_v52 = vld [vmem:[%s8464_s7 + $0x2a0] sm:$0xff] }
 0xb77   : > { %v3858_v20 = vmul.f32 %v7837_v18, %v7837_v18  ;;  %4072 = vmatpush.msrb.mxu3 %v4846_v61 }
 0xb78   : > { %4099 = vmatpush.msrb.mxu0 %v4857_v49  ;;  %4146 = vmatpush.msrb.mxu2 %v4914_v44 }
 0xb79   : > { %3884 = vmatmul.f32.gmra.mxu1 %v3858_v20  ;;  %v4847_v20 = vld [vmem:[%s8464_s7 + $0x290] sm:$0xff] }
 0xb7a   : > { %4100 = vmatpush.msrb.mxu0 %v4852_v62  ;;  %4147 = vmatpush.msrb.mxu2 %v4909_v56 }
 0xb7c   : > { %4101 = vmatpush.msrb.mxu0 %v4847_v20  ;;  %4148 = vmatpush.msrb.mxu2 %v4904_v48 }
 0xb7e   : > { %4149 = vmatpush.msrb.mxu2 %v4899_v38 }
 0xb80   : > { %4150 = vmatpush.msrb.mxu2 %v4894_v15 }
 0xb82   : > { %4151 = vmatpush.msrb.mxu2 %v4889_v28 }
 0xb84   : > { %4152 = vmatpush.msrb.mxu2 %v4884_v21 }
 0xb86   : > { %4153 = vmatpush.msrb.mxu2 %v4879_v29 }
 0xb88   : > { %4154 = vmatpush.msrb.mxu2 %v4874_v4 }
 0xb8a   : > { %4155 = vmatpush.msrb.mxu2 %v4869_v10 }
 0xb8c   : > { %4156 = vmatpush.msrb.mxu2 %v4864_v26 }
 0xb8e   : > { %4157 = vmatpush.msrb.mxu2 %v4859_v42 }
 0xb90   : > { %4158 = vmatpush.msrb.mxu2 %v4854_v51 }
 0xb92   : > { %4159 = vmatpush.msrb.mxu2 %v4849_v52 }
 0xbde   : > { %v3876_v3 = vpop.f32.mrf.mxu1 }
 0xbdf   : > { %v3877_v34 = vadd.f32 1e-05, %v3876_v3 }
 0xbe1   : > { %5004 = vrsqrt.f32 %v3877_v34  ;;  %vm3894_vm5 = vweird.f32 %v3877_v34 }
 0xbe6   : > { %v3879_v9 = vpop.f32.mrf.mxu1 }
 0xbe7   : > { %v5005_v12 = vpop.eup %5004  ;;  %v3880_v17 = vadd.f32 1e-05, %v3879_v9 }
 0xbe8   : > { %v3889_v59 = vmul.f32 %v5005_v12, %v3877_v34  ;;  %vm3895_vm12 = vweird.f32 %v5005_v12 }
 0xbe9   : > { %5006 = vrsqrt.f32 %v3880_v17  ;;  %vm3896_vm6 = vmor %vm3894_vm5, %vm3895_vm12  ;;  %vm3904_vm13 = vweird.f32 %v3880_v17 }
 0xbea   : > { %v3890_v35 = vmul.f32 %v5005_v12, %v3889_v59 }
 0xbec   : > { %v3891_v25 = vmul.f32 0.5, %v3890_v35 }
 0xbee   : > { %v3892_v13 = vsub.f32 1.5, %v3891_v25  ;;  %v3882_v37 = vpop.f32.mrf.mxu1 }
 0xbef   : > { %v5007_v1 = vpop.eup %5006  ;;  %v3883_v40 = vadd.f32 1e-05, %v3882_v37 }
 0xbf0   : > { %v3893_v11 = vmul.f32 %v5005_v12, %v3892_v13  ;;  %v3899_v14 = vmul.f32 %v5007_v1, %v3880_v17  ;;  %vm3905_vm7 = vweird.f32 %v5007_v1 }
 0xbf1   : > { %5008 = vrsqrt.f32 %v3883_v40  ;;  %vm3906_vm15 = vmor %vm3904_vm13, %vm3905_vm7  ;;  %vm3914_vm1 = vweird.f32 %v3883_v40 }
 0xbf2   : > { %v3897_v8 = vsel %vm3896_vm6, %v5005_v12, %v3893_v11  ;;  %v3900_v27 = vmul.f32 %v5007_v1, %v3899_v14 }
 0xbf3   : > { %v3928_v32 = vmul.f32 %v3897_v8, %v7825_v33 }
 0xbf4   : > { %v3901_v7 = vmul.f32 0.5, %v3900_v27 }
 0xbf5   : > { %v3934_v55 = vmul.f32 %v8060_v57, %v3928_v32 }
 0xbf6   : > { %v3902_v58 = vsub.f32 1.5, %v3901_v7  ;;  %v3885_v33 = vpop.f32.mrf.mxu1 }
 0xbf7   : > { %v5009_v39 = vpop.eup %5008  ;;  %v3886_v23 = vadd.f32 1e-05, %v3885_v33  ;;  %v3940_v2 = vadd.f32 %v8066_v0, %v3934_v55 }
 0xbf8   : > { %v3903_v46 = vmul.f32 %v5007_v1, %v3902_v58  ;;  %v3909_v47 = vmul.f32 %v5009_v39, %v3883_v40  ;;  %vm3915_vm0 = vweird.f32 %v5009_v39 }
 0xbf9   : > { %5010 = vrsqrt.f32 %v3886_v23  ;;  %v3944_v24 = vmax.f32 %v3940_v2, 0.0  ;;  %vm3916_vm2 = vmor %vm3914_vm1, %vm3915_vm0  ;;  %vm3924_vm12 = vweird.f32 %v3886_v23 }
 0xbfa   : > { %v3907_v22 = vsel %vm3906_vm15, %v5007_v1, %v3903_v46  ;;  %v3910_v63 = vmul.f32 %v5009_v39, %v3909_v47  ;;  %v4383_v47 = vld [vmem:[%s8467_s10 + $0x2d0] sm:$0xff] }
 0xbfb   : > { %v3929_v43 = vmul.f32 %v3907_v22, %v7829_v50  ;;  %4045 = vmatmul.f32.vlgmr.msra.gmra.mxu2 %v3944_v24  ;;  %4073 = vmatmul.f32.vlgmr.msrb.gmra.mxu3 %v3944_v24 }
 0xbfc   : > { %v3911_v31 = vmul.f32 0.5, %v3910_v63  ;;  %4102 = vmatmul.f32.vlgmr.msrb.gmra.mxu0 %v3944_v24  ;;  %4131 = vmatmul.f32.vlgmr.msrb.gmra.mxu1 %v3944_v24 }
 0xbfd   : > { %v3935_v6 = vmul.f32 %v8060_v57, %v3929_v43  ;;  %4389 = vmatpush.msra.mxu0 %v4383_v47  ;;  %v4324_v47 = vld [vmem:[%s8467_s10 + $0xf8] sm:$0xff] }
 0xbfe   : > { %v3912_v49 = vsub.f32 1.5, %v3911_v31 }
 0xbff   : > { %v5011_v5 = vpop.eup %5010  ;;  %v3941_v41 = vadd.f32 %v8066_v0, %v3935_v6  ;;  %v4384_v6 = vld [vmem:[%s8467_s10 + $0x2d8] sm:$0xff] }
 0xc00   : > { %v3913_v54 = vmul.f32 %v5009_v39, %v3912_v49  ;;  %v3919_v62 = vmul.f32 %v5011_v5, %v3886_v23  ;;  %vm3925_vm4 = vweird.f32 %v5011_v5  ;;  %4411 = vmatpush.msra.mxu1 %v4384_v6  ;;  %v4926_v6 = vld [vmem:[%s8466_s9 + $0x28] sm:$0xf] }
 0xc01   : > { %v3945_v36 = vmax.f32 %v3941_v41, 0.0  ;;  %vm3926_vm5 = vmor %vm3924_vm12, %vm3925_vm4  ;;  %v4378_v41 = vld [vmem:[%s8467_s10 + $0x2a8] sm:$0xff] }
 0xc02   : > { %v3917_v60 = vsel %vm3916_vm2, %v5009_v39, %v3913_v54  ;;  %v3920_v50 = vmul.f32 %v5011_v5, %v3919_v62  ;;  %4412 = vmatpush.msra.mxu1 %v4378_v41  ;;  %v4374_v41 = vld [vmem:[%s8467_s10 + $0x288] sm:$0xff] }
 0xc03   : > { %v3930_v61 = vmul.f32 %v3917_v60, %v7833_v19  ;;  %4048 = vmatmul.f32.gmra.mxu2 %v3945_v36  ;;  %4076 = vmatmul.f32.gmra.mxu3 %v3945_v36 }
 0xc04   : > { %v3921_v20 = vmul.f32 0.5, %v3920_v50  ;;  %4105 = vmatmul.f32.gmra.mxu0 %v3945_v36  ;;  %4134 = vmatmul.f32.gmra.mxu1 %v3945_v36  ;;  %v4372_v50 = vld [vmem:[%s8467_s10 + $0x278] sm:$0xff] }
 0xc05   : > { %v3936_v53 = vmul.f32 %v8060_v57, %v3930_v61  ;;  %4413 = vmatpush.msra.mxu1 %v4372_v50  ;;  %v4356_v50 = vld [vmem:[%s8467_s10 + $0x1f8] sm:$0xff] }
 0xc06   : > { %v3922_v45 = vsub.f32 1.5, %v3921_v20 }
 0xc07   : > { %v3942_v3 = vadd.f32 %v8066_v0, %v3936_v53 }
 0xc08   : > { %v3923_v16 = vmul.f32 %v5011_v5, %v3922_v45  ;;  %v4365_v45 = vld [vmem:[%s8467_s10 + $0x240] sm:$0xff] }
 0xc09   : > { %v3946_v34 = vmax.f32 %v3942_v3, 0.0 }
 0xc0a   : > { %v3927_v44 = vsel %vm3926_vm5, %v5011_v5, %v3923_v16  ;;  %v4371_v5 = vld [vmem:[%s8467_s10 + $0x270] sm:$0xff] }
 0xc0b   : > { %v3931_v56 = vmul.f32 %v3927_v44, %v7837_v18  ;;  %4051 = vmatmul.f32.gmra.mxu2 %v3946_v34  ;;  %4079 = vmatmul.f32.gmra.mxu3 %v3946_v34  ;;  %v4366_v44 = vld [vmem:[%s8467_s10 + $0x248] sm:$0xff] }
 0xc0c   : > { %4108 = vmatmul.f32.gmra.mxu0 %v3946_v34  ;;  %4137 = vmatmul.f32.gmra.mxu1 %v3946_v34 }
 0xc0d   : > { %v3937_v19 = vmul.f32 %v8060_v57, %v3931_v56  ;;  %v4385_v56 = vld [vmem:[%s8467_s10 + $0x2e0] sm:$0xff]  ;;  %4414 = vmatpush.msra.mxu1 %v4366_v44  ;;  %v4294_v44 = vld [vmem:[%s8467_s10 + $0x8] sm:$0xff] }
 0xc0e   : > { %4433 = vmatpush.msra.mxu2 %v4385_v56  ;;  %v4337_v56 = vld [vmem:[%s8467_s10 + $0x160] sm:$0xff] }
 0xc0f   : > { %v3943_v48 = vadd.f32 %v8066_v0, %v3937_v19 }
 0xc11   : > { %v3947_v9 = vmax.f32 %v3943_v48, 0.0 }
 0xc13   : > { %4054 = vmatmul.f32.gmra.mxu2 %v3947_v9  ;;  %4082 = vmatmul.f32.gmra.mxu3 %v3947_v9 }
 0xc14   : > { %4111 = vmatmul.f32.gmra.mxu0 %v3947_v9  ;;  %4140 = vmatmul.f32.gmra.mxu1 %v3947_v9 }
 0xc1b   : > { %4160 = vmatmul.f32.vlgmr.msrb.gmra.mxu2 %v3944_v24  ;;  %v4377_v24 = vld [vmem:[%s8467_s10 + $0x2a0] sm:$0xff] }
 0xc1c   : > { %4390 = vmatpush.msra.mxu0 %v4377_v24  ;;  %v4317_v24 = vld [vmem:[%s8467_s10 + $0xc0] sm:$0xff] }
 0xc1e   : > { %4391 = vmatpush.msra.mxu0 %v4371_v5  ;;  %v4380_v5 = vld [vmem:[%s8467_s10 + $0x2b8] sm:$0xff] }
 0xc20   : > { %4392 = vmatpush.msra.mxu0 %v4365_v45  ;;  %v4300_v45 = vld [vmem:[%s8467_s10 + $0x38] sm:$0xff] }
 0xc23   : > { %4163 = vmatmul.f32.gmra.mxu2 %v3945_v36 }
 0xc2b   : > { %4166 = vmatmul.f32.gmra.mxu2 %v3946_v34 }
 0xc33   : > { %4169 = vmatmul.f32.gmra.mxu2 %v3947_v9  ;;  %v4359_v9 = vld [vmem:[%s8467_s10 + $0x210] sm:$0xff] }
 0xc34   : > { %4393 = vmatpush.msra.mxu0 %v4359_v9  ;;  %v4388_v9 = vld [vmem:[%s8467_s10 + $0x2f8] sm:$0xff] }
 0xc79   : > { %v4103_v17 = vpop.f32.mrf.mxu0  ;;  %v4132_v15 = vpop.f32.mrf.mxu1 }
 0xc7a   : > { %v4194_v58 = vrot.slane %v4103_v17, 2  ;;  %v4211_v54 = vrot.slane %v4132_v15, 3  ;;  %v4373_v17 = vld [vmem:[%s8467_s10 + $0x280] sm:$0xff] }
 0xc7e   : > { %v4046_v38 = vpop.f32.mrf.mxu2  ;;  %v4074_v18 = vpop.f32.mrf.mxu3 }
 0xc7f   : > { %v4177_v10 = vrot.slane %v4074_v18, 1  ;;  %v4360_v18 = vld [vmem:[%s8467_s10 + $0x218] sm:$0xff] }
 0xc80   : > { %4415 = vmatpush.msra.mxu1 %v4360_v18  ;;  %v4332_v18 = vld [vmem:[%s8467_s10 + $0x138] sm:$0xff] }
 0xc81   : > { %v4106_v25 = vpop.f32.mrf.mxu0  ;;  %v4135_v21 = vpop.f32.mrf.mxu1 }
 0xc82   : > { %v4195_v7 = vrot.slane %v4106_v25, 2  ;;  %v4212_v63 = vrot.slane %v4135_v21, 3  ;;  %v4353_v25 = vld [vmem:[%s8467_s10 + $0x1e0] sm:$0xff] }
 0xc83   : > { %4394 = vmatpush.msra.mxu0 %v4353_v25  ;;  %v4319_v25 = vld [vmem:[%s8467_s10 + $0xd0] sm:$0xff] }
 0xc84   : > { %v4196_v22 = vsel %vm893_vm9, %v4194_v58, %v4195_v7  ;;  %v4213_v3 = vsel %vm933_vm10, %v4211_v54, %v4212_v63  ;;  %v4329_v58 = vld [vmem:[%s8467_s10 + $0x120] sm:$0xff]  ;;  %v4368_v54 = vld [vmem:[%s8467_s10 + $0x258] sm:$0xff] }
 0xc86   : > { %v4049_v12 = vpop.f32.mrf.mxu2  ;;  %v4077_v35 = vpop.f32.mrf.mxu3 }
 0xc87   : > { %v4178_v40 = vrot.slane %v4077_v35, 1 }
 0xc89   : > { %v4109_v37 = vpop.f32.mrf.mxu0  ;;  %v8091_v1 = vpop.f32.mrf.mxu1  ;;  %v4179_v27 = vsel %vm853_vm8, %v4177_v10, %v4178_v40 }
 0xc8a   : > { %v4197_v32 = vrot.slane %v4109_v37, 2  ;;  %v4187_v42 = vadd.f32 %v4179_v27, %v4046_v38  ;;  %v4214_v51 = vrot.slane %v8091_v1, 3  ;;  %v4379_v38 = vld [vmem:[%s8467_s10 + $0x2b0] sm:$0xff]  ;;  %v4342_v27 = vld [vmem:[%s8467_s10 + $0x188] sm:$0xff] }
 0xc8b   : > { %4434 = vmatpush.msra.mxu2 %v4379_v38  ;;  %v4347_v1 = vld [vmem:[%s8467_s10 + $0x1b0] sm:$0xff] }
 0xc8c   : > { %v4198_v33 = vsel %vm893_vm9, %v4195_v7, %v4197_v32  ;;  %v4204_v49 = vadd.f32 %v4196_v22, %v4187_v42  ;;  %v4215_v62 = vsel %vm933_vm10, %v4212_v63, %v4214_v51  ;;  %4395 = vmatpush.msra.mxu0 %v4347_v1  ;;  %v4335_v7 = vld [vmem:[%s8467_s10 + $0x150] sm:$0xff]  ;;  %v4336_v42 = vld [vmem:[%s8467_s10 + $0x158] sm:$0xff]  ;;  %v4925_v63 = vld [vmem:[%s8466_s9 + $0x20] sm:$0xff] }
 0xc8d   : > { %4435 = vmatpush.msra.mxu2 %v4373_v17  ;;  %v4331_v38 = vld [vmem:[%s8467_s10 + $0x130] sm:$0xff]  ;;  %v4382_v17 = vld [vmem:[%s8467_s10 + $0x2c8] sm:$0xff] }
 0xc8e   : > { %v4052_v59 = vpop.f32.mrf.mxu2  ;;  %v4080_v29 = vpop.f32.mrf.mxu3  ;;  %v4221_v19 = vadd.f32 %v4213_v3, %v4204_v49  ;;  %v4386_v49 = vld [vmem:[%s8467_s10 + $0x2e8] sm:$0xff]  ;;  %v4343_v3 = vld [vmem:[%s8467_s10 + $0x190] sm:$0xff] }
 0xc8f   : > { %v4180_v4 = vrot.slane %v4080_v29, 1  ;;  %v4354_v29 = vld [vmem:[%s8467_s10 + $0x1e8] sm:$0xff] }
 0xc90   : > { %4416 = vmatpush.msra.mxu1 %v4354_v29  ;;  %v4320_v29 = vld [vmem:[%s8467_s10 + $0xd8] sm:$0xff]  ;;  %v4314_v1 = vld [vmem:[%s8467_s10 + $0xa8] sm:$0xff] }
 0xc91   : > { %v4181_v57 = vsel %vm853_vm8, %v4178_v40, %v4180_v4  ;;  %v4112_v26 = vpop.f32.mrf.mxu0  ;;  %v4141_v52 = vpop.f32.mrf.mxu1 }
 0xc92   : > { %v4188_v0 = vadd.f32 %v4181_v57, %v4049_v12  ;;  %v4199_v2 = vrot.slane %v4112_v26, 2  ;;  %v4216_v20 = vrot.slane %v4141_v52, 3  ;;  %v4341_v57 = vld [vmem:[%s8467_s10 + $0x180] sm:$0xff]  ;;  %v4311_v52 = vld [vmem:[%s8467_s10 + $0x90] sm:$0xff] }
 0xc93   : > { %4396 = vmatpush.msra.mxu0 %v4341_v57  ;;  %v4358_v57 = vld [vmem:[%s8467_s10 + $0x208] sm:$0xff] }
 0xc94   : > { %v4205_v23 = vadd.f32 %v4198_v33, %v4188_v0  ;;  %v4200_v61 = vsel %vm893_vm9, %v4197_v32, %v4199_v2  ;;  %v4355_v32 = vld [vmem:[%s8467_s10 + $0x1f0] sm:$0xff] }
 0xc95   : > { %4397 = vmatpush.msra.mxu0 %v4335_v7  ;;  %v4295_v7 = vld [vmem:[%s8467_s10 + $0x10] sm:$0xff] }
 0xc96   : > { %v4055_v28 = vpop.f32.mrf.mxu2  ;;  %v4083_v11 = vpop.f32.mrf.mxu3  ;;  %v4222_v53 = vadd.f32 %v4215_v62, %v4205_v23  ;;  %v4318_v62 = vld [vmem:[%s8467_s10 + $0xc8] sm:$0xff] }
 0xc97   : > { %v4182_v8 = vrot.slane %v4083_v11, 1  ;;  %v4963_v28 = vld [vmem:[%s8465_s8 + $0x1] ss:$0 sm:$0xff]  ;;  %v4348_v11 = vld [vmem:[%s8467_s10 + $0x1b8] sm:$0xff]  ;;  %4398 = vmatpush.msra.mxu0 %v4329_v58  ;;  %v4339_v58 = vld [vmem:[%s8467_s10 + $0x170] sm:$0xff] }
 0xc98   : > { %4417 = vmatpush.msra.mxu1 %v4348_v11  ;;  %v4307_v11 = vld [vmem:[%s8467_s10 + $0x70] sm:$0xff] }
 0xc99   : > { %v4183_v55 = vsel %vm853_vm8, %v4180_v4, %v4182_v8 }
 0xc9a   : > { %v4189_v43 = vadd.f32 %v4183_v55, %v4052_v59  ;;  %v4217_v59 = vsel %vm933_vm10, %v4214_v51, %v4216_v20  ;;  %4418 = vmatpush.msra.mxu1 %v4342_v27  ;;  %v4349_v20 = vld [vmem:[%s8467_s10 + $0x1c0] sm:$0xff]  ;;  %v4351_v27 = vld [vmem:[%s8467_s10 + $0x1d0] sm:$0xff]  ;;  %vm2586_vm10 = vcmask 24576  }
 0xc9c   : > { %v4206_v16 = vadd.f32 %v4200_v61, %v4189_v43  ;;  %4419 = vmatpush.msra.mxu1 %v4336_v42  ;;  %v4305_v43 = vld [vmem:[%s8467_s10 + $0x60] sm:$0xff]  ;;  %v4306_v61 = vld [vmem:[%s8467_s10 + $0x68] sm:$0xff]  ;;  %v4296_v42 = vld [vmem:[%s8467_s10 + $0x18] sm:$0xff] }
 0xc9e   : > { %v4161_v13 = vpop.f32.mrf.mxu2  ;;  %v4223_v21 = vadd.f32 %v4217_v59, %v4206_v16  ;;  %v4344_v16 = vld [vmem:[%s8467_s10 + $0x198] sm:$0xff]  ;;  %v4325_v59 = vld [vmem:[%s8467_s10 + $0x100] sm:$0xff] }
 0xc9f   : > { %v4228_v36 = vrot.slane %v4161_v13, 4  ;;  %v4367_v13 = vld [vmem:[%s8467_s10 + $0x250] sm:$0xff] }
 0xca0   : > { %4436 = vmatpush.msra.mxu2 %v4367_v13  ;;  %v4370_v13 = vld [vmem:[%s8467_s10 + $0x268] sm:$0xff] }
 0xca6   : > { %v4164_v14 = vpop.f32.mrf.mxu2 }
 0xca7   : > { %v4229_v31 = vrot.slane %v4164_v14, 4  ;;  %v4361_v14 = vld [vmem:[%s8467_s10 + $0x220] sm:$0xff] }
 0xca8   : > { %4437 = vmatpush.msra.mxu2 %v4361_v14  ;;  %v4357_v14 = vld [vmem:[%s8467_s10 + $0x200] sm:$0xff] }
 0xca9   : > { %v4230_v34 = vsel %vm973_vm11, %v4228_v36, %v4229_v31  ;;  %v4362_v36 = vld [vmem:[%s8467_s10 + $0x228] sm:$0xff] }
 0xcaa   : > { %v4238_v15 = vadd.f32 %v4230_v34, %v4221_v19  ;;  %4438 = vmatpush.msra.mxu2 %v4355_v32  ;;  %v4293_v34 = vld [vmem:[%s8467_s10] sm:$0xff]  ;;  %v4387_v19 = vld [vmem:[%s8467_s10 + $0x2f0] sm:$0xff]  ;;  %v4302_v32 = vld [vmem:[%s8467_s10 + $0x48] sm:$0xff] }
 0xcac   : > { %v4242_v10 = vadd.f32 %v4963_v28, %v4238_v15  ;;  %4439 = vmatpush.msra.mxu2 %v4349_v20  ;;  %v4375_v15 = vld [vmem:[%s8467_s10 + $0x290] sm:$0xff] }
 0xcae   : > { %v4167_v39 = vpop.f32.mrf.mxu2  ;;  %v4248_v55 = vrot.slane %v4242_v10, 1  ;;  %4440 = vmatpush.msra.mxu2 %v4343_v3 }
 0xcaf   : > { %v4231_v46 = vrot.slane %v4167_v39, 4  ;;  %v4330_v39 = vld [vmem:[%s8467_s10 + $0x128] sm:$0xff] }
 0xcb0   : > { %4420 = vmatpush.msra.mxu1 %v4330_v39  ;;  %4441 = vmatpush.msra.mxu2 %v4337_v56  ;;  %v4334_v39 = vld [vmem:[%s8467_s10 + $0x148] sm:$0xff]  ;;  %v5046_v56 = vmov 0  }
 0xcb1   : > { %v4232_v60 = vsel %vm973_vm11, %v4229_v31, %v4231_v46  ;;  %v4299_v31 = vld [vmem:[%s8467_s10 + $0x30] sm:$0xff]  ;;  %4946 = vset.pattern.permute.xlu0 %v5046_v56  ;;  %4947 = vset.pattern.permute.xlu1 %v5046_v56 }
 0xcb2   : > { %v4239_v48 = vadd.f32 %v4232_v60, %v4222_v53  ;;  %4421 = vmatpush.msra.mxu1 %v4324_v47  ;;  %v4312_v60 = vld [vmem:[%s8467_s10 + $0x98] sm:$0xff]  ;;  %v4350_v53 = vld [vmem:[%s8467_s10 + $0x1c8] sm:$0xff]  ;;  %4442 = vmatpush.msra.mxu2 %v4331_v38 }
 0xcb3   : > { %v4322_v47 = vld [vmem:[%s8467_s10 + $0xe8] sm:$0xff] }
 0xcb4   : > { %v4243_v4 = vadd.f32 %v4963_v28, %v4239_v48  ;;  %4422 = vmatpush.msra.mxu1 %v4318_v62  ;;  %v4338_v48 = vld [vmem:[%s8467_s10 + $0x168] sm:$0xff]  ;;  %4443 = vmatpush.msra.mxu2 %v4325_v59 }
 0xcb6   : > { %v4170_v12 = vpop.f32.mrf.mxu2  ;;  %v4249_v0 = vrot.slane %v4243_v4, 1  ;;  %4423 = vmatpush.msra.mxu1 %v4312_v60  ;;  %4444 = vmatpush.msra.mxu2 %v4319_v25  ;;  %v4599_v25 = vld [vmem:[%s8469_s12 + $0x30] sm:$0xff] }
 0xcb7   : > { %v4233_v35 = vrot.slane %v4170_v12, 4  ;;  %v4381_v12 = vld [vmem:[%s8467_s10 + $0x2c0] sm:$0xff] }
 0xcb8   : > { %v4250_v2 = vsel %vm853_vm8, %v4248_v55, %v4249_v0  ;;  %4424 = vmatpush.msra.mxu1 %v4306_v61  ;;  %v4346_v55 = vld [vmem:[%s8467_s10 + $0x1a8] sm:$0xff] }
 0xcb9   : > { %v4234_v37 = vsel %vm973_vm11, %v4231_v46, %v4233_v35  ;;  %v4323_v46 = vld [vmem:[%s8467_s10 + $0xf0] sm:$0xff]  ;;  %v4256_v22 = vmax.f32 %v4242_v10, %v4250_v2  ;;  %v4326_v35 = vld [vmem:[%s8467_s10 + $0x108] sm:$0xff]  ;;  %v4308_v10 = vld [vmem:[%s8467_s10 + $0x78] sm:$0xff] }
 0xcba   : > { %v4240_v40 = vadd.f32 %v4234_v37, %v4223_v21  ;;  %4399 = vmatpush.msra.mxu0 %v4323_v46  ;;  %4425 = vmatpush.msra.mxu1 %v4300_v45  ;;  %v4369_v21 = vld [vmem:[%s8467_s10 + $0x260] sm:$0xff]  ;;  %v4328_v2 = vld [vmem:[%s8467_s10 + $0x118] sm:$0xff] }
 0xcbb   : > { %v4313_v37 = vld [vmem:[%s8467_s10 + $0xa0] sm:$0xff] }
 0xcbc   : > { %v4244_v8 = vadd.f32 %v4963_v28, %v4240_v40  ;;  %4400 = vmatpush.msra.mxu0 %v4317_v24  ;;  %4426 = vmatpush.msra.mxu1 %v4294_v44  ;;  %v4376_v28 = vld [vmem:[%s8467_s10 + $0x298] sm:$0xff]  ;;  %v4321_v46 = vld [vmem:[%s8467_s10 + $0xe0] sm:$0xff]  ;;  %v4315_v24 = vld [vmem:[%s8467_s10 + $0xb0] sm:$0xff] }
 0xcbd   : > { %4445 = vmatpush.msra.mxu2 %v4313_v37  ;;  %v4364_v40 = vld [vmem:[%s8467_s10 + $0x238] sm:$0xff] }
 0xcbe   : > { %v4251_v26 = vrot.slane %v4244_v8, 1  ;;  %4401 = vmatpush.msra.mxu0 %v4311_v52  ;;  %4499 = vmatpush.msrb.mxu1 %v4388_v9  ;;  %v4310_v52 = vld [vmem:[%s8467_s10 + $0x88] sm:$0xff]  ;;  %v4596_v37 = vld [vmem:[%s8469_s12 + $0x18] sm:$0xff] }
 0xcbf   : > { %4446 = vmatpush.msra.mxu2 %v4307_v11  ;;  %v4594_v11 = vld [vmem:[%s8469_s12 + $0x8] sm:$0xff] }
 0xcc0   : > { %v4258_v33 = vmax.f32 %v4244_v8, %v4251_v26  ;;  %v4252_v51 = vsel %vm853_vm8, %v4249_v0, %v4251_v26  ;;  %4402 = vmatpush.msra.mxu0 %v4305_v43  ;;  %4500 = vmatpush.msrb.mxu1 %v4382_v17  ;;  %v4301_v8 = vld [vmem:[%s8467_s10 + $0x40] sm:$0xff]  ;;  %v4352_v0 = vld [vmem:[%s8467_s10 + $0x1d8] sm:$0xff]  ;;  %v4303_v43 = vld [vmem:[%s8467_s10 + $0x50] sm:$0xff] }
 0xcc1   : > { %v4257_v23 = vmax.f32 %v4243_v4, %v4252_v51  ;;  %v4363_v4 = vld [vmem:[%s8467_s10 + $0x230] sm:$0xff]  ;;  %4447 = vmatpush.msra.mxu2 %v4301_v8  ;;  %v4345_v26 = vld [vmem:[%s8467_s10 + $0x1a0] sm:$0xff]  ;;  %v4340_v51 = vld [vmem:[%s8467_s10 + $0x178] sm:$0xff] }
 0xcc2   : > { %4927 = vmatpush.msk.msra.mxu3 %vm853_vm8, %v4258_v33  ;;  %4403 = vmatpush.msra.mxu0 %v4299_v31  ;;  %v4333_v33 = vld [vmem:[%s8467_s10 + $0x140] sm:$0xff] }
 0xcc3   : > { %4501 = vmatpush.msrb.mxu1 %v4376_v28  ;;  %4448 = vmatpush.msra.mxu2 %v4295_v7  ;;  %v4297_v31 = vld [vmem:[%s8467_s10 + $0x20] sm:$0xff]  ;;  %v4600_v28 = vld [vmem:[%s8469_s12 + $0x38] sm:$0xff] }
 0xcc4   : > { %4284 = vmatpush.msra.mxu3 %v4257_v23  ;;  %4404 = vmatpush.msra.mxu0 %v4293_v34  ;;  %v4327_v23 = vld [vmem:[%s8467_s10 + $0x110] sm:$0xff] }
 0xcc5   : > { %4502 = vmatpush.msrb.mxu1 %v4370_v13  ;;  %4619 = vmatpush.msrb.mxu2 %v4600_v28  ;;  %v4521_v13 = vld [vmem:[%s8468_s11] sm:$0x1] }
 0xcc6   : > { %4285 = vmatpush.msra.mxu3 %v4256_v22  ;;  %4477 = vmatpush.msrb.mxu0 %v4387_v19  ;;  %v4316_v22 = vld [vmem:[%s8467_s10 + $0xb8] sm:$0xff] }
 0xcc7   : > { %4928 = vmatmul.msk.f32.vlgmr.msra.gmra.mxu3 %vm2195_vm14, %v4925_v63  ;;  %4503 = vmatpush.msrb.mxu1 %v4364_v40  ;;  %v4309_v63 = vld [vmem:[%s8467_s10 + $0x80] sm:$0xff] }
 0xcc8   : > { %4455 = vmatpush.msrb.mxu3 %v4386_v49  ;;  %4478 = vmatpush.msrb.mxu0 %v4381_v12  ;;  %v4298_v49 = vld [vmem:[%s8467_s10 + $0x28] sm:$0xff] }
 0xcc9   : > { %4504 = vmatpush.msrb.mxu1 %v4358_v57  ;;  %4620 = vmatpush.msrb.mxu2 %v4599_v25 }
 0xcca   : > { %4456 = vmatpush.msrb.mxu3 %v4380_v5  ;;  %4479 = vmatpush.msrb.mxu0 %v4375_v15 }
 0xccb   : > { %4505 = vmatpush.msrb.mxu1 %v4352_v0 }
 0xccc   : > { %4457 = vmatpush.msrb.mxu3 %v4374_v41  ;;  %4480 = vmatpush.msrb.mxu0 %v4369_v21  ;;  %v4598_v21 = vld [vmem:[%s8469_s12 + $0x28] sm:$0xff] }
 0xccd   : > { %4506 = vmatpush.msrb.mxu1 %v4346_v55  ;;  %4621 = vmatpush.msrb.mxu2 %v4598_v21 }
 0xcce   : > { %4458 = vmatpush.msrb.mxu3 %v4368_v54  ;;  %4481 = vmatpush.msrb.mxu0 %v4363_v4 }
 0xccf   : > { %4929 = vmatmul.msk.f32.gmra.mxu3 %vm2195_vm14, %v4926_v6  ;;  %4507 = vmatpush.msrb.mxu1 %v4340_v51  ;;  %v4304_v6 = vld [vmem:[%s8467_s10 + $0x58] sm:$0xff] }
 0xcd0   : > { %4459 = vmatpush.msrb.mxu3 %v4362_v36  ;;  %4482 = vmatpush.msrb.mxu0 %v4357_v14 }
 0xcd1   : > { %4508 = vmatpush.msrb.mxu1 %v4334_v39 }
 0xcd2   : > { %4460 = vmatpush.msrb.mxu3 %v4356_v50  ;;  %4483 = vmatpush.msrb.mxu0 %v4351_v27 }
 0xcd3   : > { %4509 = vmatpush.msrb.mxu1 %v4328_v2 }
 0xcd4   : > { %4461 = vmatpush.msrb.mxu3 %v4350_v53  ;;  %4484 = vmatpush.msrb.mxu0 %v4345_v26 }
 0xcd5   : > { %4510 = vmatpush.msrb.mxu1 %v4322_v47 }
 0xcd6   : > { %4462 = vmatpush.msrb.mxu3 %v4344_v16  ;;  %4485 = vmatpush.msrb.mxu0 %v4339_v58 }
 0xcd7   : > { %4511 = vmatpush.msrb.mxu1 %v4316_v22 }
 0xcd8   : > { %4463 = vmatpush.msrb.mxu3 %v4338_v48  ;;  %4486 = vmatpush.msrb.mxu0 %v4333_v33 }
 0xcd9   : > { %4512 = vmatpush.msrb.mxu1 %v4310_v52 }
 0xcda   : > { %4464 = vmatpush.msrb.mxu3 %v4332_v18  ;;  %4487 = vmatpush.msrb.mxu0 %v4327_v23  ;;  %v2536_v18 = vld [vmem:[#allocation2] sm:$0x1] }
 0xcdb   : > { %4513 = vmatpush.msrb.mxu1 %v4304_v6 }
 0xcdc   : > { %4465 = vmatpush.msrb.mxu3 %v4326_v35  ;;  %4488 = vmatpush.msrb.mxu0 %v4321_v46 }
 0xcdd   : > { %4514 = vmatpush.msrb.mxu1 %v4298_v49 }
 0xcde   : > { %4466 = vmatpush.msrb.mxu3 %v4320_v29  ;;  %4489 = vmatpush.msrb.mxu0 %v4315_v24  ;;  %v4597_v29 = vld [vmem:[%s8469_s12 + $0x20] sm:$0xff] }
 0xcdf   : > { %4622 = vmatpush.msrb.mxu2 %v4597_v29 }
 0xce0   : > { %4467 = vmatpush.msrb.mxu3 %v4314_v1  ;;  %4490 = vmatpush.msrb.mxu0 %v4309_v63  ;;  %v4595_v1 = vld [vmem:[%s8469_s12 + $0x10] sm:$0xff] }
 0xce1   : > { %4623 = vmatpush.msrb.mxu2 %v4596_v37 }
 0xce2   : > { %4468 = vmatpush.msrb.mxu3 %v4308_v10  ;;  %4491 = vmatpush.msrb.mxu0 %v4303_v43  ;;  %v4593_v10 = vld [vmem:[%s8469_s12] sm:$0xff] }
 0xce3   : > { %4624 = vmatpush.msrb.mxu2 %v4595_v1 }
 0xce4   : > { %4469 = vmatpush.msrb.mxu3 %v4302_v32  ;;  %4492 = vmatpush.msrb.mxu0 %v4297_v31 }
 0xce5   : > { %4625 = vmatpush.msrb.mxu2 %v4594_v11 }
 0xce6   : > { %4470 = vmatpush.msrb.mxu3 %v4296_v42  ;;  %v4601_v42 = vld [vmem:[#allocation2] sm:$0x1] }
 0xce7   : > { %4626 = vmatpush.msrb.mxu2 %v4593_v10 }
 0xd4a   : > { %v4287_v5 = vpop.f32.mrf.mxu3 }
 0xd4b   : > { %4405 = vmatmul.f32.vlgmr.msra.gmra.mxu0 %v4287_v5  ;;  %4427 = vmatmul.f32.vlgmr.msra.gmra.mxu1 %v4287_v5 }
 0xd4c   : > { %4449 = vmatmul.f32.vlgmr.msra.gmra.mxu2 %v4287_v5  ;;  %4471 = vmatmul.f32.vlgmr.msrb.gmra.mxu3 %v4287_v5 }
 0xd52   : > { %v4290_v41 = vpop.f32.mrf.mxu3 }
 0xd53   : > { %4408 = vmatmul.f32.gmra.mxu0 %v4290_v41  ;;  %4430 = vmatmul.f32.gmra.mxu1 %v4290_v41 }
 0xd54   : > { %4452 = vmatmul.f32.gmra.mxu2 %v4290_v41  ;;  %4474 = vmatmul.f32.gmra.mxu3 %v4290_v41 }
 0xd5b   : > { %4493 = vmatmul.f32.vlgmr.msrb.gmra.mxu0 %v4287_v5  ;;  %4515 = vmatmul.f32.vlgmr.msrb.gmra.mxu1 %v4287_v5 }
 0xd63   : > { %4495 = vmatmul.f32.gmra.mxu0 %v4290_v41  ;;  %4517 = vmatmul.f32.gmra.mxu1 %v4290_v41 }
 0xdc8   : > { %v4406_v54 = vpop.f32.mrf.mxu0  ;;  %v4428_v62 = vpop.f32.mrf.mxu1 }
 0xdc9   : > { %4524 = vst [vmem:[#allocation1] sm:$0xff] %v4406_v54  ;;  %v4522_v40 = vadd.f32 %v4521_v13, %v4406_v54 }
 0xdcf   : > { %v4450_v36 = vpop.f32.mrf.mxu2  ;;  %v4472_v60 = vpop.f32.mrf.mxu3 }
 0xdd0   : > { %v4526_v50 = vld [vmem:[#allocation1 + $0x1] ss:$9 sm:$0xff]  ;;  %v4409_v61 = vpop.f32.mrf.mxu0  ;;  %v4431_v20 = vpop.f32.mrf.mxu1 }
 0xdd1   : > { %4527 = vrot.lane.b32.xlu0 %v4526_v50, %s5045_s22  ;;  %4532 = vst [vmem:[#allocation1] sm:$0xff] %v4428_v62 }
 0xdd7   : > { %v4453_v53 = vpop.f32.mrf.mxu2  ;;  %v4475_v45 = vpop.f32.mrf.mxu3 }
 0xdd8   : > { %v4534_v3 = vld [vmem:[#allocation1 + $0x2] ss:$9 sm:$0xff]  ;;  %v4494_v16 = vpop.f32.mrf.mxu0  ;;  %v4516_v34 = vpop.f32.mrf.mxu1 }
 0xdd9   : > { %4537 = vst [vmem:[#allocation1] sm:$0xff] %v4428_v62 }
 0xde0   : > { %v4539_v44 = vld [vmem:[#allocation1 + $0x3] ss:$9 sm:$0xff]  ;;  %v4496_v38 = vpop.f32.mrf.mxu0  ;;  %v4518_v59 = vpop.f32.mrf.mxu1 }
 0xde1   : > { %4540 = vrot.lane.b32.xlu1 %v4539_v44, %s5045_s22  ;;  %4545 = vst [vmem:[#allocation1] sm:$0xff] %v4450_v36 }
 0xde8   : > { %v4547_v19 = vld [vmem:[#allocation1 + $0x4] ss:$9 sm:$0xff] }
 0xde9   : > { %4550 = vst [vmem:[#allocation1] sm:$0xff] %v4450_v36 }
 0xdf0   : > { %v4552_v48 = vld [vmem:[#allocation1 + $0x5] ss:$9 sm:$0xff] }
 0xdf1   : > { %4553 = vrot.lane.b32.xlu2 %v4552_v48, %s5045_s22  ;;  %4558 = vst [vmem:[#allocation1] sm:$0xff] %v4472_v60 }
 0xdf8   : > { %v4560_v9 = vld [vmem:[#allocation1 + $0x6] ss:$9 sm:$0xff] }
 0xdf9   : > { %4563 = vst [vmem:[#allocation1] sm:$0xff] %v4472_v60 }
 0xe00   : > { %v4565_v12 = vld [vmem:[#allocation1 + $0x7] ss:$9 sm:$0xff] }
 0xe01   : > { %4566 = vrot.lane.b32.xlu0 %v4565_v12, %s5045_s22  ;;  %4572 = vst [vmem:[#allocation1] sm:$0xff] %v4496_v38 }
 0xe08   : > { %v4574_v17 = vld [vmem:[#allocation1 + $0x1] ss:$9 sm:$0xff] }
 0xe09   : > { %2539 = vperm.xlu0 %4946, %v2536_v18   ;;  %4575 = vrot.lane.b32.xlu1 %v4574_v17, %s5045_s22  ;;  %4580 = vst [vmem:[#allocation1] sm:$0xff] %v4518_v59 }
 0xe10   : > { %v4582_v15 = vld [vmem:[#allocation1 + $0x2] ss:$9 sm:$0xff] }
 0xe11   : > { %4585 = vst [vmem:[#allocation1] sm:$0xff] %v4518_v59  ;;  %4604 = vperm.xlu1 %4947, %v4601_v42  }
 0xe18   : > { %v4587_v35 = vld [vmem:[#allocation1 + $0x3] ss:$9 sm:$0xff] }
 0xe19   : > { %4588 = vrot.lane.b32.xlu2 %v4587_v35, %s5045_s22 }
 0xe43   : > { %v4528_v4 = vpop.permute.xlu0 %4527 }
 0xe44   : > { %v4530_v14 = vadd.f32 %v4528_v4, %v4522_v40 }
 0xe46   : > { %v4536_v8 = vadd.f32 %v4534_v3, %v4530_v14 }
 0xe4b   : > { %v4554_v0 = vpop.permute.xlu2 %4553 }
 0xe53   : > { %v4541_v57 = vpop.permute.xlu1 %4540 }
 0xe54   : > { %v4543_v27 = vadd.f32 %v4541_v57, %v4536_v8 }
 0xe56   : > { %v4549_v32 = vadd.f32 %v4547_v19, %v4543_v27 }
 0xe58   : > { %v4556_v7 = vadd.f32 %v4554_v0, %v4549_v32 }
 0xe5a   : > { %v4562_v55 = vadd.f32 %v4560_v9, %v4556_v7 }
 0xe73   : > { %v4567_v26 = vpop.permute.xlu0 %4566  ;;  %v4589_v24 = vpop.permute.xlu2 %4588 }
 0xe74   : > { %v4569_v58 = vadd.f32 %v4567_v26, %v4562_v55 }
 0xe76   : > { %v4570_v33 = vadd.f32 %v4569_v58, %v4496_v38 }
 0xe7b   : > { %v2540_v51 = vpop.permute.xlu0 %2539  ;;  %v4576_v39 = vpop.permute.xlu1 %4575 }
 0xe7c   : > { %v2542_v23 = vperm.slane %v2540_v51, 0  ;;  %v4578_v2 = vadd.f32 %v4576_v39, %v4570_v33 }
 0xe7e   : > { %v2565_v46 = vadd.f32 %v7233_v30, %v2542_v23  ;;  %v4584_v47 = vadd.f32 %v4582_v15, %v4578_v2 }
 0xe80   : > { %v4822_v22 = vmul.f32 -1.442695, %v2565_v46  ;;  %v4591_v63 = vadd.f32 %v4589_v24, %v4584_v47 }
 0xe82   : > { %5012 = vpow2.f32 %v4822_v22  ;;  %v4592_v52 = vmax.f32 %v4591_v63, 0.0 }
 0xe83   : > { %v4605_v61 = vpop.permute.xlu1 %4604 }
 0xe84   : > { %4930 = vmatmul.msk.f32.vlgmr.msrb.gmra.mxu2 %vm2543_vm3, %v4592_v52  ;;  %v4607_v20 = vperm.slane %v4605_v61, 0 }
 0xe88   : > { %v5013_v43 = vpop.eup %5012 }
 0xe89   : > { %v2570_v31 = vadd.f32 1.0, %v5013_v43 }
 0xe8b   : > { %5014 = vrcp.f32 %v2570_v31  ;;  %v2582_v41 = vand.u32 2147483648, %v2570_v31  ;;  %v2580_v30 = vand.u32 2147483647, %v2570_v31  ;;  %vm2576_vm9 = vweird.f32 %v2570_v31 }
 0xe8d   : > { %v2583_v36 = vor.u32 1.1754944e-38, %v2582_v41  ;;  %vm2581_vm14 = vcmp.eq.f32.partialorder %v2580_v30, 8.507059e+37 }
 0xe91   : > { %v5015_v6 = vpop.eup %5014 }
 0xe92   : > { %v2572_v49 = vmul.f32 %v5015_v6, %v2570_v31  ;;  %vm2577_vm8 = vweird.f32 %v5015_v6 }
 0xe93   : > { %vm2578_vm11 = vmor %vm2576_vm9, %vm2577_vm8 }
 0xe94   : > { %v2573_v5 = vsub.f32 1.0, %v2572_v49 }
 0xe96   : > { %v2574_v54 = vmul.f32 %v5015_v6, %v2573_v5 }
 0xe98   : > { %v2575_v62 = vadd.f32 %v5015_v6, %v2574_v54 }
 0xe9a   : > { %v2579_v60 = vsel %vm2578_vm11, %v5015_v6, %v2575_v62 }
 0xe9b   : > { %v2584_v50 = vsel %vm2581_vm14, %v2583_v36, %v2579_v60 }
 0xe9c   : > { %2587 = vst.msk [vmem:[%s8448_s27] sm:$0x1] %vm2586_vm10, %v2584_v50 }
 0xf07   : > { %v4628_v53 = vpop.f32.mrf.mxu2 }
 0xf08   : > { %v4629_v45 = vadd.f32 %v4628_v53, %v4607_v20 }
 0xf0a   : > { %v4931_v3 = vmul.f32 -1.442695, %v4629_v45 }
 0xf0c   : > { %5016 = vpow2.f32 %v4931_v3 }
 0xf12   : > { %v5017_v16 = vpop.eup %5016 }
 0xf13   : > { %v4634_v34 = vadd.f32 1.0, %v5017_v16 }
 0xf15   : > { %5018 = vrcp.f32 %v4634_v34  ;;  %v4646_v48 = vand.u32 2147483648, %v4634_v34  ;;  %v4644_v38 = vand.u32 2147483647, %v4634_v34  ;;  %vm4640_vm6 = vweird.f32 %v4634_v34 }
 0xf17   : > { %v4647_v18 = vor.u32 1.1754944e-38, %v4646_v48  ;;  %vm4645_vm13 = vcmp.eq.f32.partialorder %v4644_v38, 8.507059e+37 }
 0xf1b   : > { %v5019_v44 = vpop.eup %5018 }
 0xf1c   : > { %v4636_v56 = vmul.f32 %v5019_v44, %v4634_v34  ;;  %vm4641_vm3 = vweird.f32 %v5019_v44 }
 0xf1d   : > { %vm4642_vm7 = vmor %vm4640_vm6, %vm4641_vm3 }
 0xf1e   : > { %v4637_v19 = vsub.f32 1.0, %v4636_v56 }
 0xf20   : > { %v4638_v9 = vmul.f32 %v5019_v44, %v4637_v19 }
 0xf22   : > { %v4639_v12 = vadd.f32 %v5019_v44, %v4638_v9 }
 0xf24   : > { %v4643_v17 = vsel %vm4642_vm7, %v5019_v44, %v4639_v12 }
 0xf25   : > { %v4648_v59 = vsel %vm4645_vm13, %v4647_v18, %v4643_v17 }
 0xf26   : > { %4650 = vst.msk [vmem:[%s8448_s27 + $0x1] sm:$0x1] %vm2586_vm10, %v4648_v59 }
 0xf27 PF: > { %s26_s15 = sadd.s32 1, %s5042_s15  }
 0xf28   : > { %p23_p5 = scmp.ge.s32.totalorder %s26_s15, 4  }
 0xf2a   :  { %25 = sbr.rel (!%p23_p5) target bundleno = 3 (0x3), region = 133 }

</bundles_post_ra>
